<compile_context>
chip_gen: v6e
topology: v6e:2x2x1
jax: 0.10.0
libtpu: 0.0.40
codegen_flags: <defaults>
</compile_context>

<pallas_src>
import math
import functools
import numpy as np

import jax
import jax.numpy as jnp
from jax.experimental import pallas as pl
from jax.experimental.pallas import tpu as pltpu


NEG_BIAS = -1e30  # additive stand-in for the reference's masked_fill_(-inf)


# ----------------------------- log-sparse mask (host-side, static) ------------------------
def row_mask_np(index, sub_len, win_len):
    log_l = math.ceil(np.log2(sub_len))
    mask = np.zeros(win_len, dtype=np.float32)
    if (win_len // sub_len) * 2 * log_l > index:
        mask[:index + 1] = 1
    else:
        while index >= 0:
            if index - log_l + 1 < 0:
                mask[:index] = 1
                break
            mask[index - log_l + 1:index + 1] = 1
            for i in range(0, log_l):
                new_index = index - log_l + 1 - 2 ** i
                if index - new_index <= sub_len and new_index >= 0:
                    mask[new_index] = 1
            index -= sub_len
    return mask


def log_mask_np(win_len, sub_len):
    mask = np.zeros((win_len, win_len), dtype=np.float32)
    for i in range(win_len):
        mask[i] = row_mask_np(i, sub_len, win_len)
    return mask


@functools.lru_cache(maxsize=None)
def get_mask_bias(L, S):
    # Matches LogSparseAttention.forward literally: log_mask(maxL, maxL) cropped to [:L, :S]
    # and filled with -inf WHERE mask == 1 (the reference's masked_fill polarity).
    # Expressed as an additive bias so a fully-masked row cannot produce NaN.
    maxL = max(L, S)
    m = log_mask_np(maxL, maxL)[:L, :S]
    return jnp.asarray(m * NEG_BIAS, dtype=jnp.float32)


@functools.lru_cache(maxsize=None)
def positional_embedding(L, d_model):
    pe = np.zeros((L, d_model), dtype=np.float32)
    position = np.arange(0, L, dtype=np.float32)[:, None]
    div_term = np.exp(np.arange(0, d_model, 2, dtype=np.float32)
                      * -(math.log(10000.0) / d_model))
    pe[:, 0::2] = np.sin(position * div_term)
    pe[:, 1::2] = np.cos(position * div_term)
    return jnp.asarray(pe)


@functools.lru_cache(maxsize=None)
def shift_matrices(L):
    # (P_prev @ x)[l] = x[(l-1) mod L], (P_next @ x)[l] = x[(l+1) mod L]
    idx = np.arange(L)
    p_prev = np.zeros((L, L), np.float32)
    p_next = np.zeros((L, L), np.float32)
    p_prev[idx, (idx - 1) % L] = 1.0
    p_next[idx, (idx + 1) % L] = 1.0
    return jnp.asarray(p_prev), jnp.asarray(p_next)


# ------------------------------------ in-kernel helpers -----------------------------------
def _ln(z, g, b, eps=1e-5):
    mu = jnp.mean(z, axis=-1, keepdims=True)
    zc = z - mu
    var = jnp.mean(zc * zc, axis=-1, keepdims=True)
    return zc * jax.lax.rsqrt(var + eps) * g + b


def _softmax_rows(s):
    m = jnp.max(s, axis=-1, keepdims=True)
    e = jnp.exp(s - m)
    return e * pl.reciprocal(jnp.sum(e, axis=-1, keepdims=True), approx=True)


def _mha(q_in, k_in, v_in, wo, bo, bias, n_heads, scale):
    """Multi-head log-sparse attention on 2-D (rows, D) VMEM blocks.

    Heads are lane slices of the projected activations; the output projection is
    accumulated per head (equivalent to concat(heads) @ wo), so no concat/transpose.
    """
    D = q_in.shape[-1]
    dk = D // n_heads
    q = q_in * scale                       # fold softmax scale into q
    out = bo                               # (1, D) -> broadcasts to (Lq, D)
    for h in range(n_heads):
        sl = slice(h * dk, (h + 1) * dk)
        s = jax.lax.dot_general(q[:, sl], k_in[:, sl],
                                (((1,), (1,)), ((), ())),
                                preferred_element_type=jnp.float32) + bias
        a = _softmax_rows(s)
        oh = jnp.dot(a, v_in[:, sl], preferred_element_type=jnp.float32)
        out = out + jnp.dot(oh, wo[sl, :], preferred_element_type=jnp.float32)
    return out


def _full_spec(shape):
    n = len(shape)
    return pl.BlockSpec(shape, lambda b, n=n: (0,) * n)


# ------------------------------------ Pallas kernels --------------------------------------
def _embed_kernel(x_ref, xm_ref, wl_ref, wc_ref, wr_ref, wt_ref,
                  pos_ref, pprev_ref, pnext_ref, o_ref):
    # TokenEmbedding (circular Conv1d k=3, bias=False) + TimeFeatureEmbedding + Positional.
    x = x_ref[0]                                   # (L, C)
    xm = xm_ref[0]                                 # (L, n_mark)
    x_prev = jnp.dot(pprev_ref[...], x, preferred_element_type=jnp.float32)
    x_next = jnp.dot(pnext_ref[...], x, preferred_element_type=jnp.float32)
    val = (jnp.dot(x_prev, wl_ref[...], preferred_element_type=jnp.float32)
           + jnp.dot(x, wc_ref[...], preferred_element_type=jnp.float32)
           + jnp.dot(x_next, wr_ref[...], preferred_element_type=jnp.float32))
    tem = jnp.dot(xm, wt_ref[...], preferred_element_type=jnp.float32)
    o_ref[0] = (val + tem + pos_ref[...]).astype(o_ref.dtype)


def _enc_layer_kernel(x_ref, wqkv_ref, bqkv_ref, wo_ref, bo_ref,
                      w1_ref, b1_ref, w2_ref, b2_ref,
                      ln1g_ref, ln1b_ref, ln2g_ref, ln2b_ref,
                      bias_ref, o_ref, *, n_heads, scale):
    x = x_ref[0]                                   # (L, D)
    D = x.shape[-1]
    # fused QKV projection
    qkv = jnp.dot(x, wqkv_ref[...], preferred_element_type=jnp.float32) + bqkv_ref[...]
    new_x = _mha(qkv[:, 0:D], qkv[:, D:2 * D], qkv[:, 2 * D:3 * D],
                 wo_ref[...], bo_ref[...], bias_ref[...], n_heads, scale)
    # residual + LN1
    z = _ln(x + new_x, ln1g_ref[...], ln1b_ref[...])
    # FFN (conv1x1 -> relu -> conv1x1) + residual + LN2
    h = jnp.maximum(jnp.dot(z, w1_ref[...], preferred_element_type=jnp.float32)
                    + b1_ref[...], 0.0)
    y = jnp.dot(h, w2_ref[...], preferred_element_type=jnp.float32) + b2_ref[...]
    o_ref[0] = _ln(z + y, ln2g_ref[...], ln2b_ref[...]).astype(o_ref.dtype)


def _dec_layer_kernel(x_ref, cross_ref,
                      s_wqkv_ref, s_bqkv_ref, s_wo_ref, s_bo_ref,
                      c_wq_ref, c_bq_ref, c_wkv_ref, c_bkv_ref, c_wo_ref, c_bo_ref,
                      w1_ref, b1_ref, w2_ref, b2_ref,
                      ln1g_ref, ln1b_ref, ln2g_ref, ln2b_ref, ln3g_ref, ln3b_ref,
                      self_bias_ref, cross_bias_ref, o_ref, *, n_heads, scale):
    x = x_ref[0]                                   # (Ld, D)
    cross = cross_ref[0]                           # (Ls, D)
    D = x.shape[-1]

    # --- self attention + residual + LN1 ---
    qkv = jnp.dot(x, s_wqkv_ref[...], preferred_element_type=jnp.float32) + s_bqkv_ref[...]
    sa = _mha(qkv[:, 0:D], qkv[:, D:2 * D], qkv[:, 2 * D:3 * D],
              s_wo_ref[...], s_bo_ref[...], self_bias_ref[...], n_heads, scale)
    x = _ln(x + sa, ln1g_ref[...], ln1b_ref[...])

    # --- cross attention + residual + LN2 ---
    q = jnp.dot(x, c_wq_ref[...], preferred_element_type=jnp.float32) + c_bq_ref[...]
    kv = jnp.dot(cross, c_wkv_ref[...], preferred_element_type=jnp.float32) + c_bkv_ref[...]
    ca = _mha(q, kv[:, 0:D], kv[:, D:2 * D],
              c_wo_ref[...], c_bo_ref[...], cross_bias_ref[...], n_heads, scale)
    x = _ln(x + ca, ln2g_ref[...], ln2b_ref[...])

    # --- FFN + residual + LN3 ---
    h = jnp.maximum(jnp.dot(x, w1_ref[...], preferred_element_type=jnp.float32)
                    + b1_ref[...], 0.0)
    y = jnp.dot(h, w2_ref[...], preferred_element_type=jnp.float32) + b2_ref[...]
    o_ref[0] = _ln(x + y, ln3g_ref[...], ln3b_ref[...]).astype(o_ref.dtype)


def _ln_kernel(x_ref, g_ref, b_ref, o_ref):
    o_ref[0] = _ln(x_ref[0], g_ref[...], b_ref[...]).astype(o_ref.dtype)


def _norm_proj_kernel(x_ref, g_ref, b_ref, wp_ref, bp_ref, o_ref):
    z = _ln(x_ref[0], g_ref[...], b_ref[...])
    o_ref[0] = (jnp.dot(z, wp_ref[...], preferred_element_type=jnp.float32)
                + bp_ref[...]).astype(o_ref.dtype)


# --------------------------------------- wrappers ------------------------------------------
_PARALLEL = pltpu.CompilerParams(dimension_semantics=("parallel",))


def data_embedding(x, x_mark, p, d_model):
    B, L, C = x.shape
    nm = x_mark.shape[-1]
    pos = positional_embedding(L, d_model)
    p_prev, p_next = shift_matrices(L)
    return pl.pallas_call(
        _embed_kernel,
        out_shape=jax.ShapeDtypeStruct((B, L, d_model), jnp.float32),
        grid=(B,),
        in_specs=[pl.BlockSpec((1, L, C), lambda b: (b, 0, 0)),
                  pl.BlockSpec((1, L, nm), lambda b: (b, 0, 0)),
                  _full_spec((C, d_model)), _full_spec((C, d_model)),
                  _full_spec((C, d_model)), _full_spec((nm, d_model)),
                  _full_spec((L, d_model)), _full_spec((L, L)), _full_spec((L, L))],
        out_specs=pl.BlockSpec((1, L, d_model), lambda b: (b, 0, 0)),
        compiler_params=_PARALLEL,
    )(x, x_mark, p['conv_wl'], p['conv_wc'], p['conv_wr'], p['timef_w'],
      pos, p_prev, p_next)


def encoder_layer(p, x, n_heads, mask_bias):
    B, L, D = x.shape
    Dff = p['w1'].shape[1]
    scale = 1.0 / math.sqrt(D // n_heads)
    kern = functools.partial(_enc_layer_kernel, n_heads=n_heads, scale=scale)
    return pl.pallas_call(
        kern,
        out_shape=jax.ShapeDtypeStruct((B, L, D), jnp.float32),
        grid=(B,),
        in_specs=[pl.BlockSpec((1, L, D), lambda b: (b, 0, 0)),
                  _full_spec((D, 3 * D)), _full_spec((1, 3 * D)),
                  _full_spec((D, D)), _full_spec((1, D)),
                  _full_spec((D, Dff)), _full_spec((1, Dff)),
                  _full_spec((Dff, D)), _full_spec((1, D)),
                  _full_spec((1, D)), _full_spec((1, D)),
                  _full_spec((1, D)), _full_spec((1, D)),
                  _full_spec((L, L))],
        out_specs=pl.BlockSpec((1, L, D), lambda b: (b, 0, 0)),
        compiler_params=_PARALLEL,
    )(x, p['wqkv'], p['bqkv'], p['wo'], p['bo'],
      p['w1'], p['b1'], p['w2'], p['b2'],
      p['ln1_g'], p['ln1_b'], p['ln2_g'], p['ln2_b'], mask_bias)


def decoder_layer(p, x, cross, n_heads, self_bias, cross_bias):
    B, Ld, D = x.shape
    Ls = cross.shape[1]
    Dff = p['w1'].shape[1]
    scale = 1.0 / math.sqrt(D // n_heads)
    kern = functools.partial(_dec_layer_kernel, n_heads=n_heads, scale=scale)
    sa, ca = p['self_attn'], p['cross_attn']
    return pl.pallas_call(
        kern,
        out_shape=jax.ShapeDtypeStruct((B, Ld, D), jnp.float32),
        grid=(B,),
        in_specs=[pl.BlockSpec((1, Ld, D), lambda b: (b, 0, 0)),
                  pl.BlockSpec((1, Ls, D), lambda b: (b, 0, 0)),
                  _full_spec((D, 3 * D)), _full_spec((1, 3 * D)),
                  _full_spec((D, D)), _full_spec((1, D)),
                  _full_spec((D, D)), _full_spec((1, D)),
                  _full_spec((D, 2 * D)), _full_spec((1, 2 * D)),
                  _full_spec((D, D)), _full_spec((1, D)),
                  _full_spec((D, Dff)), _full_spec((1, Dff)),
                  _full_spec((Dff, D)), _full_spec((1, D)),
                  _full_spec((1, D)), _full_spec((1, D)),
                  _full_spec((1, D)), _full_spec((1, D)),
                  _full_spec((1, D)), _full_spec((1, D)),
                  _full_spec((Ld, Ld)), _full_spec((Ld, Ls))],
        out_specs=pl.BlockSpec((1, Ld, D), lambda b: (b, 0, 0)),
        compiler_params=_PARALLEL,
    )(x, cross,
      sa['wqkv'], sa['bqkv'], sa['wo'], sa['bo'],
      ca['wq'], ca['bq'], ca['wkv'], ca['bkv'], ca['wo'], ca['bo'],
      p['w1'], p['b1'], p['w2'], p['b2'],
      p['ln1_g'], p['ln1_b'], p['ln2_g'], p['ln2_b'], p['ln3_g'], p['ln3_b'],
      self_bias, cross_bias)


def layer_norm(x, g, b):
    B, L, D = x.shape
    return pl.pallas_call(
        _ln_kernel,
        out_shape=jax.ShapeDtypeStruct((B, L, D), jnp.float32),
        grid=(B,),
        in_specs=[pl.BlockSpec((1, L, D), lambda bb: (bb, 0, 0)),
                  _full_spec((1, D)), _full_spec((1, D))],
        out_specs=pl.BlockSpec((1, L, D), lambda bb: (bb, 0, 0)),
        compiler_params=_PARALLEL,
    )(x, g, b)


def final_norm_proj(x, g, b, wp, bp):
    B, L, D = x.shape
    c_out = wp.shape[1]
    return pl.pallas_call(
        _norm_proj_kernel,
        out_shape=jax.ShapeDtypeStruct((B, L, c_out), jnp.float32),
        grid=(B,),
        in_specs=[pl.BlockSpec((1, L, D), lambda bb: (bb, 0, 0)),
                  _full_spec((1, D)), _full_spec((1, D)),
                  _full_spec((D, c_out)), _full_spec((1, c_out))],
        out_specs=pl.BlockSpec((1, L, c_out), lambda bb: (bb, 0, 0)),
        compiler_params=_PARALLEL,
    )(x, g, b, wp, bp)


# --------------------------------------- model glue ---------------------------------------
def model_forward(params, x_enc, x_mark_enc, x_dec, x_mark_dec, cfg):
    d_model, H = cfg['d_model'], cfg['n_heads']

    enc_out = data_embedding(x_enc, x_mark_enc, params['enc_emb'], d_model)
    Le = enc_out.shape[1]
    enc_mask = get_mask_bias(Le, Le)          # LogSparseAttention ignores the passed attn_mask
    for lp in params['enc_layers']:
        enc_out = encoder_layer(lp, enc_out, H, enc_mask)
    enc_out = layer_norm(enc_out, params['enc_norm_g'], params['enc_norm_b'])

    dec_out = data_embedding(x_dec, x_mark_dec, params['dec_emb'], d_model)
    Ld = dec_out.shape[1]
    self_mask = get_mask_bias(Ld, Ld)
    cross_mask = get_mask_bias(Ld, Le)
    for lp in params['dec_layers']:
        dec_out = decoder_layer(lp, dec_out, enc_out, H, self_mask, cross_mask)

    out = final_norm_proj(dec_out, params['dec_norm_g'], params['dec_norm_b'],
                          params['proj_w'], params['proj_b'])
    return out[:, -cfg['pred_len']:, :]


# ------------------------------------ parameter init --------------------------------------
def init_params(key, cfg):
    counter = [0]

    def nk():
        counter[0] += 1
        return jax.random.fold_in(key, counter[0])

    def w(*shape):
        return (0.02 * jax.random.normal(nk(), shape)).astype(jnp.float32)

    zeros = lambda *s: jnp.zeros(s, jnp.float32)
    ones = lambda *s: jnp.ones(s, jnp.float32)
    d, dff = cfg['d_model'], cfg['d_ff']

    def attn_self():
        return dict(wqkv=w(d, 3 * d), bqkv=zeros(1, 3 * d), wo=w(d, d), bo=zeros(1, d))

    def attn_cross():
        return dict(wq=w(d, d), bq=zeros(1, d), wkv=w(d, 2 * d), bkv=zeros(1, 2 * d),
                    wo=w(d, d), bo=zeros(1, d))

    def enc_layer_params():
        p = attn_self()
        p.update(w1=w(d, dff), b1=zeros(1, dff), w2=w(dff, d), b2=zeros(1, d),
                 ln1_g=ones(1, d), ln1_b=zeros(1, d), ln2_g=ones(1, d), ln2_b=zeros(1, d))
        return p

    def dec_layer_params():
        return dict(self_attn=attn_self(), cross_attn=attn_cross(),
                    w1=w(d, dff), b1=zeros(1, dff), w2=w(dff, d), b2=zeros(1, d),
                    ln1_g=ones(1, d), ln1_b=zeros(1, d),
                    ln2_g=ones(1, d), ln2_b=zeros(1, d),
                    ln3_g=ones(1, d), ln3_b=zeros(1, d))

    def emb_params(c_in):
        # circular Conv1d(k=3, bias=False) taps kept as three (C, d_model) blocks
        return dict(conv_wl=w(c_in, d), conv_wc=w(c_in, d), conv_wr=w(c_in, d),
                    timef_w=w(cfg['n_mark'], d))      # TimeFeatureEmbedding, bias=False

    return dict(
        enc_emb=emb_params(cfg['enc_in']),
        dec_emb=emb_params(cfg['dec_in']),
        enc_layers=[enc_layer_params() for _ in range(cfg['e_layers'])],
        enc_norm_g=ones(1, d), enc_norm_b=zeros(1, d),
        dec_layers=[dec_layer_params() for _ in range(cfg['d_layers'])],
        dec_norm_g=ones(1, d), dec_norm_b=zeros(1, d),
        proj_w=w(d, cfg['c_out']), proj_b=zeros(1, cfg['c_out']),
    )


# ------------------------------------------ main -------------------------------------------
if __name__ == "__main__":
    cfg = dict(enc_in=4, dec_in=4, c_out=4, d_model=32, n_heads=4, d_ff=64,
               e_layers=2, d_layers=1, seq_len=8, label_len=4, pred_len=4, n_mark=4)

    key = jax.random.PRNGKey(0)
    kp, k1, k2, k3, k4 = jax.random.split(key, 5)
    params = init_params(kp, cfg)

    B = 2
    dec_len = cfg['label_len'] + cfg['pred_len']
    x_enc = jax.random.normal(k1, (B, cfg['seq_len'], cfg['enc_in']), jnp.float32)
    x_mark_enc = jax.random.normal(k2, (B, cfg['seq_len'], cfg['n_mark']), jnp.float32)
    x_dec = jax.random.normal(k3, (B, dec_len, cfg['dec_in']), jnp.float32)
    x_mark_dec = jax.random.normal(k4, (B, dec_len, cfg['n_mark']), jnp.float32)

    fwd = jax.jit(functools.partial(model_forward, cfg=cfg))
    out = fwd(params, x_enc, x_mark_enc, x_dec, x_mark_dec)
    out = jax.block_until_ready(out)

    assert out.shape == (B, cfg['pred_len'], cfg['c_out']), out.shape
    assert bool(jnp.all(jnp.isfinite(out)))
    print("KERNEL_OK")
</pallas_src>

<mosaic_0001>
module attributes {stable_mosaic.version = 11 : i64} {
  func.func @_embed_kernel(%arg0: i32, %arg1: memref<1x8x4xf32, #tpu.memory_space<vmem>>, %arg2: memref<1x8x4xf32, #tpu.memory_space<vmem>>, %arg3: memref<4x32xf32, #tpu.memory_space<vmem>>, %arg4: memref<4x32xf32, #tpu.memory_space<vmem>>, %arg5: memref<4x32xf32, #tpu.memory_space<vmem>>, %arg6: memref<4x32xf32, #tpu.memory_space<vmem>>, %arg7: memref<8x32xf32, #tpu.memory_space<vmem>>, %arg8: memref<8x8xf32, #tpu.memory_space<vmem>>, %arg9: memref<8x8xf32, #tpu.memory_space<vmem>>, %arg10: memref<1x8x32xf32, #tpu.memory_space<vmem>>) attributes {dimension_semantics = [#tpu.dimension_semantics<parallel>], iteration_bounds = array<i64: 2>, scalar_prefetch = 0 : i64, scratch_operands = 0 : i64, tpu.core_type = #tpu.core_type<tc>, window_params = [{transform_indices = @transform_0, window_bounds = array<i64: 1, 8, 4>}, {transform_indices = @transform_1, window_bounds = array<i64: 1, 8, 4>}, {pipeline_mode = #tpu.pipeline_mode<synchronous>, transform_indices = @transform_2, window_bounds = array<i64: 4, 32>}, {pipeline_mode = #tpu.pipeline_mode<synchronous>, transform_indices = @transform_3, window_bounds = array<i64: 4, 32>}, {pipeline_mode = #tpu.pipeline_mode<synchronous>, transform_indices = @transform_4, window_bounds = array<i64: 4, 32>}, {pipeline_mode = #tpu.pipeline_mode<synchronous>, transform_indices = @transform_5, window_bounds = array<i64: 4, 32>}, {pipeline_mode = #tpu.pipeline_mode<synchronous>, transform_indices = @transform_6, window_bounds = array<i64: 8, 32>}, {pipeline_mode = #tpu.pipeline_mode<synchronous>, transform_indices = @transform_7, window_bounds = array<i64: 8, 8>}, {pipeline_mode = #tpu.pipeline_mode<synchronous>, transform_indices = @transform_8, window_bounds = array<i64: 8, 8>}, {transform_indices = @transform_9, window_bounds = array<i64: 1, 8, 32>}]} {
    %c0 = arith.constant 0 : index
    %c0_0 = arith.constant 0 : index
    %c0_1 = arith.constant 0 : index
    %0 = vector.load %arg1[%c0, %c0_0, %c0_1] : memref<1x8x4xf32, #tpu.memory_space<vmem>>, vector<1x8x4xf32>
    %1 = vector.shape_cast %0 : vector<1x8x4xf32> to vector<8x4xf32>
    %c0_2 = arith.constant 0 : index
    %c0_3 = arith.constant 0 : index
    %c0_4 = arith.constant 0 : index
    %2 = vector.load %arg2[%c0_2, %c0_3, %c0_4] : memref<1x8x4xf32, #tpu.memory_space<vmem>>, vector<1x8x4xf32>
    %3 = vector.shape_cast %2 : vector<1x8x4xf32> to vector<8x4xf32>
    %c0_5 = arith.constant 0 : index
    %c0_6 = arith.constant 0 : index
    %4 = vector.load %arg8[%c0_5, %c0_6] : memref<8x8xf32, #tpu.memory_space<vmem>>, vector<8x8xf32>
    %cst = arith.constant dense<0.000000e+00> : vector<8x4xf32>
    %5 = tpu.matmul %4, %1, %cst {dimension_numbers = #tpu.dot_dimension_numbers<[1], [0], [0], [1], [0, 0, 1, 1], [], []>} : vector<8x8xf32>, vector<8x4xf32>, vector<8x4xf32> -> vector<8x4xf32>
    %c0_7 = arith.constant 0 : index
    %c0_8 = arith.constant 0 : index
    %6 = vector.load %arg9[%c0_7, %c0_8] : memref<8x8xf32, #tpu.memory_space<vmem>>, vector<8x8xf32>
    %cst_9 = arith.constant dense<0.000000e+00> : vector<8x4xf32>
    %7 = tpu.matmul %6, %1, %cst_9 {dimension_numbers = #tpu.dot_dimension_numbers<[1], [0], [0], [1], [0, 0, 1, 1], [], []>} : vector<8x8xf32>, vector<8x4xf32>, vector<8x4xf32> -> vector<8x4xf32>
    %c0_10 = arith.constant 0 : index
    %c0_11 = arith.constant 0 : index
    %8 = vector.load %arg3[%c0_10, %c0_11] : memref<4x32xf32, #tpu.memory_space<vmem>>, vector<4x32xf32>
    %cst_12 = arith.constant dense<0.000000e+00> : vector<8x32xf32>
    %9 = tpu.matmul %5, %8, %cst_12 {dimension_numbers = #tpu.dot_dimension_numbers<[1], [0], [0], [1], [0, 0, 1, 1], [], []>} : vector<8x4xf32>, vector<4x32xf32>, vector<8x32xf32> -> vector<8x32xf32>
    %c0_13 = arith.constant 0 : index
    %c0_14 = arith.constant 0 : index
    %10 = vector.load %arg4[%c0_13, %c0_14] : memref<4x32xf32, #tpu.memory_space<vmem>>, vector<4x32xf32>
    %cst_15 = arith.constant dense<0.000000e+00> : vector<8x32xf32>
    %11 = tpu.matmul %1, %10, %cst_15 {dimension_numbers = #tpu.dot_dimension_numbers<[1], [0], [0], [1], [0, 0, 1, 1], [], []>} : vector<8x4xf32>, vector<4x32xf32>, vector<8x32xf32> -> vector<8x32xf32>
    %12 = arith.addf %9, %11 : vector<8x32xf32>
    %c0_16 = arith.constant 0 : index
    %c0_17 = arith.constant 0 : index
    %13 = vector.load %arg5[%c0_16, %c0_17] : memref<4x32xf32, #tpu.memory_space<vmem>>, vector<4x32xf32>
    %cst_18 = arith.constant dense<0.000000e+00> : vector<8x32xf32>
    %14 = tpu.matmul %7, %13, %cst_18 {dimension_numbers = #tpu.dot_dimension_numbers<[1], [0], [0], [1], [0, 0, 1, 1], [], []>} : vector<8x4xf32>, vector<4x32xf32>, vector<8x32xf32> -> vector<8x32xf32>
    %15 = arith.addf %12, %14 : vector<8x32xf32>
    %c0_19 = arith.constant 0 : index
    %c0_20 = arith.constant 0 : index
    %16 = vector.load %arg6[%c0_19, %c0_20] : memref<4x32xf32, #tpu.memory_space<vmem>>, vector<4x32xf32>
    %cst_21 = arith.constant dense<0.000000e+00> : vector<8x32xf32>
    %17 = tpu.matmul %3, %16, %cst_21 {dimension_numbers = #tpu.dot_dimension_numbers<[1], [0], [0], [1], [0, 0, 1, 1], [], []>} : vector<8x4xf32>, vector<4x32xf32>, vector<8x32xf32> -> vector<8x32xf32>
    %18 = arith.addf %15, %17 : vector<8x32xf32>
    %c0_22 = arith.constant 0 : index
    %c0_23 = arith.constant 0 : index
    %19 = vector.load %arg7[%c0_22, %c0_23] : memref<8x32xf32, #tpu.memory_space<vmem>>, vector<8x32xf32>
    %20 = arith.addf %18, %19 : vector<8x32xf32>
    %c0_24 = arith.constant 0 : index
    %c0_25 = arith.constant 0 : index
    %c0_26 = arith.constant 0 : index
    %21 = vector.load %arg10[%c0_24, %c0_25, %c0_26] : memref<1x8x32xf32, #tpu.memory_space<vmem>>, vector<1x8x32xf32>
    %22 = vector.shape_cast %21 : vector<1x8x32xf32> to vector<8x32xf32>
    %23 = vector.shape_cast %20 : vector<8x32xf32> to vector<1x8x32xf32>
    tpu.vector_store %arg10[%c0_24, %c0_25, %c0_26], %23 {strides = array<i32>} : memref<1x8x32xf32, #tpu.memory_space<vmem>>, vector<1x8x32xf32>,
    return
  }
  func.func @transform_0(%arg0: i32) -> (i32, i32, i32) {
    %c0_i32 = arith.constant 0 : i32
    %c0_i32_0 = arith.constant 0 : i32
    %c0_i32_1 = arith.constant 0 : i32
    return %arg0, %c0_i32, %c0_i32_0 : i32, i32, i32
  }
  func.func @transform_1(%arg0: i32) -> (i32, i32, i32) {
    %c0_i32 = arith.constant 0 : i32
    %c0_i32_0 = arith.constant 0 : i32
    %c0_i32_1 = arith.constant 0 : i32
    return %arg0, %c0_i32, %c0_i32_0 : i32, i32, i32
  }
  func.func @transform_2(%arg0: i32) -> (i32, i32) {
    %c0_i32 = arith.constant 0 : i32
    %c0_i32_0 = arith.constant 0 : i32
    %c0_i32_1 = arith.constant 0 : i32
    return %c0_i32, %c0_i32_0 : i32, i32
  }
  func.func @transform_3(%arg0: i32) -> (i32, i32) {
    %c0_i32 = arith.constant 0 : i32
    %c0_i32_0 = arith.constant 0 : i32
    %c0_i32_1 = arith.constant 0 : i32
    return %c0_i32, %c0_i32_0 : i32, i32
  }
  func.func @transform_4(%arg0: i32) -> (i32, i32) {
    %c0_i32 = arith.constant 0 : i32
    %c0_i32_0 = arith.constant 0 : i32
    %c0_i32_1 = arith.constant 0 : i32
    return %c0_i32, %c0_i32_0 : i32, i32
  }
  func.func @transform_5(%arg0: i32) -> (i32, i32) {
    %c0_i32 = arith.constant 0 : i32
    %c0_i32_0 = arith.constant 0 : i32
    %c0_i32_1 = arith.constant 0 : i32
    return %c0_i32, %c0_i32_0 : i32, i32
  }
  func.func @transform_6(%arg0: i32) -> (i32, i32) {
    %c0_i32 = arith.constant 0 : i32
    %c0_i32_0 = arith.constant 0 : i32
    %c0_i32_1 = arith.constant 0 : i32
    return %c0_i32, %c0_i32_0 : i32, i32
  }
  func.func @transform_7(%arg0: i32) -> (i32, i32) {
    %c0_i32 = arith.constant 0 : i32
    %c0_i32_0 = arith.constant 0 : i32
    %c0_i32_1 = arith.constant 0 : i32
    return %c0_i32, %c0_i32_0 : i32, i32
  }
  func.func @transform_8(%arg0: i32) -> (i32, i32) {
    %c0_i32 = arith.constant 0 : i32
    %c0_i32_0 = arith.constant 0 : i32
    %c0_i32_1 = arith.constant 0 : i32
    return %c0_i32, %c0_i32_0 : i32, i32
  }
  func.func @transform_9(%arg0: i32) -> (i32, i32, i32) {
    %c0_i32 = arith.constant 0 : i32
    %c0_i32_0 = arith.constant 0 : i32
    %c0_i32_1 = arith.constant 0 : i32
    return %arg0, %c0_i32, %c0_i32_0 : i32, i32, i32
  }
}

module attributes {stable_mosaic.version = 11 : i64} {
  func.func @_enc_layer_kernel(%arg0: i32, %arg1: memref<1x8x32xf32, #tpu.memory_space<vmem>>, %arg2: memref<32x96xf32, #tpu.memory_space<vmem>>, %arg3: memref<1x96xf32, #tpu.memory_space<vmem>>, %arg4: memref<32x32xf32, #tpu.memory_space<vmem>>, %arg5: memref<1x32xf32, #tpu.memory_space<vmem>>, %arg6: memref<32x64xf32, #tpu.memory_space<vmem>>, %arg7: memref<1x64xf32, #tpu.memory_space<vmem>>, %arg8: memref<64x32xf32, #tpu.memory_space<vmem>>, %arg9: memref<1x32xf32, #tpu.memory_space<vmem>>, %arg10: memref<1x32xf32, #tpu.memory_space<vmem>>, %arg11: memref<1x32xf32, #tpu.memory_space<vmem>>, %arg12: memref<1x32xf32, #tpu.memory_space<vmem>>, %arg13: memref<1x32xf32, #tpu.memory_space<vmem>>, %arg14: memref<8x8xf32, #tpu.memory_space<vmem>>, %arg15: memref<1x8x32xf32, #tpu.memory_space<vmem>>) attributes {dimension_semantics = [#tpu.dimension_semantics<parallel>], iteration_bounds = array<i64: 2>, scalar_prefetch = 0 : i64, scratch_operands = 0 : i64, tpu.core_type = #tpu.core_type<tc>, window_params = [{transform_indices = @transform_0, window_bounds = array<i64: 1, 8, 32>}, {pipeline_mode = #tpu.pipeline_mode<synchronous>, transform_indices = @transform_1, window_bounds = array<i64: 32, 96>}, {pipeline_mode = #tpu.pipeline_mode<synchronous>, transform_indices = @transform_2, window_bounds = array<i64: 1, 96>}, {pipeline_mode = #tpu.pipeline_mode<synchronous>, transform_indices = @transform_3, window_bounds = array<i64: 32, 32>}, {pipeline_mode = #tpu.pipeline_mode<synchronous>, transform_indices = @transform_4, window_bounds = array<i64: 1, 32>}, {pipeline_mode = #tpu.pipeline_mode<synchronous>, transform_indices = @transform_5, window_bounds = array<i64: 32, 64>}, {pipeline_mode = #tpu.pipeline_mode<synchronous>, transform_indices = @transform_6, window_bounds = array<i64: 1, 64>}, {pipeline_mode = #tpu.pipeline_mode<synchronous>, transform_indices = @transform_7, window_bounds = array<i64: 64, 32>}, {pipeline_mode = #tpu.pipeline_mode<synchronous>, transform_indices = @transform_8, window_bounds = array<i64: 1, 32>}, {pipeline_mode = #tpu.pipeline_mode<synchronous>, transform_indices = @transform_9, window_bounds = array<i64: 1, 32>}, {pipeline_mode = #tpu.pipeline_mode<synchronous>, transform_indices = @transform_10, window_bounds = array<i64: 1, 32>}, {pipeline_mode = #tpu.pipeline_mode<synchronous>, transform_indices = @transform_11, window_bounds = array<i64: 1, 32>}, {pipeline_mode = #tpu.pipeline_mode<synchronous>, transform_indices = @transform_12, window_bounds = array<i64: 1, 32>}, {pipeline_mode = #tpu.pipeline_mode<synchronous>, transform_indices = @transform_13, window_bounds = array<i64: 8, 8>}, {transform_indices = @transform_14, window_bounds = array<i64: 1, 8, 32>}]} {
    %c0 = arith.constant 0 : index
    %c0_0 = arith.constant 0 : index
    %c0_1 = arith.constant 0 : index
    %0 = vector.load %arg1[%c0, %c0_0, %c0_1] : memref<1x8x32xf32, #tpu.memory_space<vmem>>, vector<1x8x32xf32>
    %1 = vector.shape_cast %0 : vector<1x8x32xf32> to vector<8x32xf32>
    %c0_2 = arith.constant 0 : index
    %c0_3 = arith.constant 0 : index
    %2 = vector.load %arg2[%c0_2, %c0_3] : memref<32x96xf32, #tpu.memory_space<vmem>>, vector<32x96xf32>
    %cst = arith.constant dense<0.000000e+00> : vector<8x96xf32>
    %3 = tpu.matmul %1, %2, %cst {dimension_numbers = #tpu.dot_dimension_numbers<[1], [0], [0], [1], [0, 0, 1, 1], [], []>} : vector<8x32xf32>, vector<32x96xf32>, vector<8x96xf32> -> vector<8x96xf32>
    %c0_4 = arith.constant 0 : index
    %c0_5 = arith.constant 0 : index
    %4 = vector.load %arg3[%c0_4, %c0_5] : memref<1x96xf32, #tpu.memory_space<vmem>>, vector<1x96xf32>
    %5 = vector.broadcast %4 : vector<1x96xf32> to vector<8x96xf32>
    %6 = arith.addf %3, %5 : vector<8x96xf32>
    %7 = vector.extract_strided_slice %6 {offsets = [0, 0], sizes = [8, 32], strides = [1, 1]} : vector<8x96xf32> to vector<8x32xf32>
    %8 = vector.extract_strided_slice %6 {offsets = [0, 32], sizes = [8, 32], strides = [1, 1]} : vector<8x96xf32> to vector<8x32xf32>
    %9 = vector.extract_strided_slice %6 {offsets = [0, 64], sizes = [8, 32], strides = [1, 1]} : vector<8x96xf32> to vector<8x32xf32>
    %c0_6 = arith.constant 0 : index
    %c0_7 = arith.constant 0 : index
    %10 = vector.load %arg4[%c0_6, %c0_7] : memref<32x32xf32, #tpu.memory_space<vmem>>, vector<32x32xf32>
    %c0_8 = arith.constant 0 : index
    %c0_9 = arith.constant 0 : index
    %11 = vector.load %arg5[%c0_8, %c0_9] : memref<1x32xf32, #tpu.memory_space<vmem>>, vector<1x32xf32>
    %c0_10 = arith.constant 0 : index
    %c0_11 = arith.constant 0 : index
    %12 = vector.load %arg14[%c0_10, %c0_11] : memref<8x8xf32, #tpu.memory_space<vmem>>, vector<8x8xf32>
    %cst_12 = arith.constant 0.353553385 : f32
    %13 = vector.broadcast %cst_12 : f32 to vector<8x32xf32>
    %14 = arith.mulf %7, %13 : vector<8x32xf32>
    %15 = vector.extract_strided_slice %14 {offsets = [0, 0], sizes = [8, 8], strides = [1, 1]} : vector<8x32xf32> to vector<8x8xf32>
    %16 = vector.extract_strided_slice %8 {offsets = [0, 0], sizes = [8, 8], strides = [1, 1]} : vector<8x32xf32> to vector<8x8xf32>
    %cst_13 = arith.constant dense<0.000000e+00> : vector<8x8xf32>
    %17 = tpu.matmul %15, %16, %cst_13 {dimension_numbers = #tpu.dot_dimension_numbers<[1], [1], [0], [0], [0, 0, 1, 0], [], []>} : vector<8x8xf32>, vector<8x8xf32>, vector<8x8xf32> -> vector<8x8xf32>
    %18 = arith.addf %17, %12 : vector<8x8xf32>
    %cst_14 = arith.constant dense<0xFF800000> : vector<8xf32>
    %19 = vector.multi_reduction <maximumf>, %18, %cst_14 [1] : vector<8x8xf32> to vector<8xf32>
    %20 = vector.shape_cast %19 : vector<8xf32> to vector<8x1xf32>
    %21 = vector.broadcast %20 : vector<8x1xf32> to vector<8x8xf32>
    %22 = arith.subf %18, %21 : vector<8x8xf32>
    %23 = math.exp %22 : vector<8x8xf32>
    %cst_15 = arith.constant dense<0.000000e+00> : vector<8xf32>
    %24 = vector.multi_reduction <add>, %23, %cst_15 [1] : vector<8x8xf32> to vector<8xf32>
    %25 = vector.shape_cast %24 : vector<8xf32> to vector<8x1xf32>
    %26 = tpu.reciprocal %25 {approx = true} : vector<8x1xf32> -> vector<8x1xf32>
    %27 = vector.broadcast %26 : vector<8x1xf32> to vector<8x8xf32>
    %28 = arith.mulf %23, %27 : vector<8x8xf32>
    %29 = vector.extract_strided_slice %9 {offsets = [0, 0], sizes = [8, 8], strides = [1, 1]} : vector<8x32xf32> to vector<8x8xf32>
    %cst_16 = arith.constant dense<0.000000e+00> : vector<8x8xf32>
    %30 = tpu.matmul %28, %29, %cst_16 {dimension_numbers = #tpu.dot_dimension_numbers<[1], [0], [0], [1], [0, 0, 1, 1], [], []>} : vector<8x8xf32>, vector<8x8xf32>, vector<8x8xf32> -> vector<8x8xf32>
    %31 = vector.extract_strided_slice %10 {offsets = [0, 0], sizes = [8, 32], strides = [1, 1]} : vector<32x32xf32> to vector<8x32xf32>
    %cst_17 = arith.constant dense<0.000000e+00> : vector<8x32xf32>
    %32 = tpu.matmul %30, %31, %cst_17 {dimension_numbers = #tpu.dot_dimension_numbers<[1], [0], [0], [1], [0, 0, 1, 1], [], []>} : vector<8x8xf32>, vector<8x32xf32>, vector<8x32xf32> -> vector<8x32xf32>
    %33 = vector.broadcast %11 : vector<1x32xf32> to vector<8x32xf32>
    %34 = arith.addf %33, %32 : vector<8x32xf32>
    %35 = vector.extract_strided_slice %14 {offsets = [0, 8], sizes = [8, 8], strides = [1, 1]} : vector<8x32xf32> to vector<8x8xf32>
    %36 = vector.extract_strided_slice %8 {offsets = [0, 8], sizes = [8, 8], strides = [1, 1]} : vector<8x32xf32> to vector<8x8xf32>
    %cst_18 = arith.constant dense<0.000000e+00> : vector<8x8xf32>
    %37 = tpu.matmul %35, %36, %cst_18 {dimension_numbers = #tpu.dot_dimension_numbers<[1], [1], [0], [0], [0, 0, 1, 0], [], []>} : vector<8x8xf32>, vector<8x8xf32>, vector<8x8xf32> -> vector<8x8xf32>
    %38 = arith.addf %37, %12 : vector<8x8xf32>
    %cst_19 = arith.constant dense<0xFF800000> : vector<8xf32>
    %39 = vector.multi_reduction <maximumf>, %38, %cst_19 [1] : vector<8x8xf32> to vector<8xf32>
    %40 = vector.shape_cast %39 : vector<8xf32> to vector<8x1xf32>
    %41 = vector.broadcast %40 : vector<8x1xf32> to vector<8x8xf32>
    %42 = arith.subf %38, %41 : vector<8x8xf32>
    %43 = math.exp %42 : vector<8x8xf32>
    %cst_20 = arith.constant dense<0.000000e+00> : vector<8xf32>
    %44 = vector.multi_reduction <add>, %43, %cst_20 [1] : vector<8x8xf32> to vector<8xf32>
    %45 = vector.shape_cast %44 : vector<8xf32> to vector<8x1xf32>
    %46 = tpu.reciprocal %45 {approx = true} : vector<8x1xf32> -> vector<8x1xf32>
    %47 = vector.broadcast %46 : vector<8x1xf32> to vector<8x8xf32>
    %48 = arith.mulf %43, %47 : vector<8x8xf32>
    %49 = vector.extract_strided_slice %9 {offsets = [0, 8], sizes = [8, 8], strides = [1, 1]} : vector<8x32xf32> to vector<8x8xf32>
    %cst_21 = arith.constant dense<0.000000e+00> : vector<8x8xf32>
    %50 = tpu.matmul %48, %49, %cst_21 {dimension_numbers = #tpu.dot_dimension_numbers<[1], [0], [0], [1], [0, 0, 1, 1], [], []>} : vector<8x8xf32>, vector<8x8xf32>, vector<8x8xf32> -> vector<8x8xf32>
    %51 = vector.extract_strided_slice %10 {offsets = [8, 0], sizes = [8, 32], strides = [1, 1]} : vector<32x32xf32> to vector<8x32xf32>
    %cst_22 = arith.constant dense<0.000000e+00> : vector<8x32xf32>
    %52 = tpu.matmul %50, %51, %cst_22 {dimension_numbers = #tpu.dot_dimension_numbers<[1], [0], [0], [1], [0, 0, 1, 1], [], []>} : vector<8x8xf32>, vector<8x32xf32>, vector<8x32xf32> -> vector<8x32xf32>
    %53 = arith.addf %34, %52 : vector<8x32xf32>
    %54 = vector.extract_strided_slice %14 {offsets = [0, 16], sizes = [8, 8], strides = [1, 1]} : vector<8x32xf32> to vector<8x8xf32>
    %55 = vector.extract_strided_slice %8 {offsets = [0, 16], sizes = [8, 8], strides = [1, 1]} : vector<8x32xf32> to vector<8x8xf32>
    %cst_23 = arith.constant dense<0.000000e+00> : vector<8x8xf32>
    %56 = tpu.matmul %54, %55, %cst_23 {dimension_numbers = #tpu.dot_dimension_numbers<[1], [1], [0], [0], [0, 0, 1, 0], [], []>} : vector<8x8xf32>, vector<8x8xf32>, vector<8x8xf32> -> vector<8x8xf32>
    %57 = arith.addf %56, %12 : vector<8x8xf32>
    %cst_24 = arith.constant dense<0xFF800000> : vector<8xf32>
    %58 = vector.multi_reduction <maximumf>, %57, %cst_24 [1] : vector<8x8xf32> to vector<8xf32>
    %59 = vector.shape_cast %58 : vector<8xf32> to vector<8x1xf32>
    %60 = vector.broadcast %59 : vector<8x1xf32> to vector<8x8xf32>
    %61 = arith.subf %57, %60 : vector<8x8xf32>
    %62 = math.exp %61 : vector<8x8xf32>
    %cst_25 = arith.constant dense<0.000000e+00> : vector<8xf32>
    %63 = vector.multi_reduction <add>, %62, %cst_25 [1] : vector<8x8xf32> to vector<8xf32>
    %64 = vector.shape_cast %63 : vector<8xf32> to vector<8x1xf32>
    %65 = tpu.reciprocal %64 {approx = true} : vector<8x1xf32> -> vector<8x1xf32>
    %66 = vector.broadcast %65 : vector<8x1xf32> to vector<8x8xf32>
    %67 = arith.mulf %62, %66 : vector<8x8xf32>
    %68 = vector.extract_strided_slice %9 {offsets = [0, 16], sizes = [8, 8], strides = [1, 1]} : vector<8x32xf32> to vector<8x8xf32>
    %cst_26 = arith.constant dense<0.000000e+00> : vector<8x8xf32>
    %69 = tpu.matmul %67, %68, %cst_26 {dimension_numbers = #tpu.dot_dimension_numbers<[1], [0], [0], [1], [0, 0, 1, 1], [], []>} : vector<8x8xf32>, vector<8x8xf32>, vector<8x8xf32> -> vector<8x8xf32>
    %70 = vector.extract_strided_slice %10 {offsets = [16, 0], sizes = [8, 32], strides = [1, 1]} : vector<32x32xf32> to vector<8x32xf32>
    %cst_27 = arith.constant dense<0.000000e+00> : vector<8x32xf32>
    %71 = tpu.matmul %69, %70, %cst_27 {dimension_numbers = #tpu.dot_dimension_numbers<[1], [0], [0], [1], [0, 0, 1, 1], [], []>} : vector<8x8xf32>, vector<8x32xf32>, vector<8x32xf32> -> vector<8x32xf32>
    %72 = arith.addf %53, %71 : vector<8x32xf32>
    %73 = vector.extract_strided_slice %14 {offsets = [0, 24], sizes = [8, 8], strides = [1, 1]} : vector<8x32xf32> to vector<8x8xf32>
    %74 = vector.extract_strided_slice %8 {offsets = [0, 24], sizes = [8, 8], strides = [1, 1]} : vector<8x32xf32> to vector<8x8xf32>
    %cst_28 = arith.constant dense<0.000000e+00> : vector<8x8xf32>
    %75 = tpu.matmul %73, %74, %cst_28 {dimension_numbers = #tpu.dot_dimension_numbers<[1], [1], [0], [0], [0, 0, 1, 0], [], []>} : vector<8x8xf32>, vector<8x8xf32>, vector<8x8xf32> -> vector<8x8xf32>
    %76 = arith.addf %75, %12 : vector<8x8xf32>
    %cst_29 = arith.constant dense<0xFF800000> : vector<8xf32>
    %77 = vector.multi_reduction <maximumf>, %76, %cst_29 [1] : vector<8x8xf32> to vector<8xf32>
    %78 = vector.shape_cast %77 : vector<8xf32> to vector<8x1xf32>
    %79 = vector.broadcast %78 : vector<8x1xf32> to vector<8x8xf32>
    %80 = arith.subf %76, %79 : vector<8x8xf32>
    %81 = math.exp %80 : vector<8x8xf32>
    %cst_30 = arith.constant dense<0.000000e+00> : vector<8xf32>
    %82 = vector.multi_reduction <add>, %81, %cst_30 [1] : vector<8x8xf32> to vector<8xf32>
    %83 = vector.shape_cast %82 : vector<8xf32> to vector<8x1xf32>
    %84 = tpu.reciprocal %83 {approx = true} : vector<8x1xf32> -> vector<8x1xf32>
    %85 = vector.broadcast %84 : vector<8x1xf32> to vector<8x8xf32>
    %86 = arith.mulf %81, %85 : vector<8x8xf32>
    %87 = vector.extract_strided_slice %9 {offsets = [0, 24], sizes = [8, 8], strides = [1, 1]} : vector<8x32xf32> to vector<8x8xf32>
    %cst_31 = arith.constant dense<0.000000e+00> : vector<8x8xf32>
    %88 = tpu.matmul %86, %87, %cst_31 {dimension_numbers = #tpu.dot_dimension_numbers<[1], [0], [0], [1], [0, 0, 1, 1], [], []>} : vector<8x8xf32>, vector<8x8xf32>, vector<8x8xf32> -> vector<8x8xf32>
    %89 = vector.extract_strided_slice %10 {offsets = [24, 0], sizes = [8, 32], strides = [1, 1]} : vector<32x32xf32> to vector<8x32xf32>
    %cst_32 = arith.constant dense<0.000000e+00> : vector<8x32xf32>
    %90 = tpu.matmul %88, %89, %cst_32 {dimension_numbers = #tpu.dot_dimension_numbers<[1], [0], [0], [1], [0, 0, 1, 1], [], []>} : vector<8x8xf32>, vector<8x32xf32>, vector<8x32xf32> -> vector<8x32xf32>
    %91 = arith.addf %72, %90 : vector<8x32xf32>
    %92 = arith.addf %1, %91 : vector<8x32xf32>
    %c0_33 = arith.constant 0 : index
    %c0_34 = arith.constant 0 : index
    %93 = vector.load %arg10[%c0_33, %c0_34] : memref<1x32xf32, #tpu.memory_space<vmem>>, vector<1x32xf32>
    %c0_35 = arith.constant 0 : index
    %c0_36 = arith.constant 0 : index
    %94 = vector.load %arg11[%c0_35, %c0_36] : memref<1x32xf32, #tpu.memory_space<vmem>>, vector<1x32xf32>
    %cst_37 = arith.constant dense<0.000000e+00> : vector<8xf32>
    %95 = vector.multi_reduction <add>, %92, %cst_37 [1] : vector<8x32xf32> to vector<8xf32>
    %96 = vector.shape_cast %95 : vector<8xf32> to vector<8x1xf32>
    %cst_38 = arith.constant 3.200000e+01 : f32
    %97 = vector.broadcast %cst_38 : f32 to vector<8x1xf32>
    %98 = arith.divf %96, %97 : vector<8x1xf32>
    %99 = vector.broadcast %98 : vector<8x1xf32> to vector<8x32xf32>
    %100 = arith.subf %92, %99 : vector<8x32xf32>
    %101 = arith.mulf %100, %100 : vector<8x32xf32>
    %cst_39 = arith.constant dense<0.000000e+00> : vector<8xf32>
    %102 = vector.multi_reduction <add>, %101, %cst_39 [1] : vector<8x32xf32> to vector<8xf32>
    %103 = vector.shape_cast %102 : vector<8xf32> to vector<8x1xf32>
    %cst_40 = arith.constant 3.200000e+01 : f32
    %104 = vector.broadcast %cst_40 : f32 to vector<8x1xf32>
    %105 = arith.divf %103, %104 : vector<8x1xf32>
    %cst_41 = arith.constant 9.99999974E-6 : f32
    %106 = vector.broadcast %cst_41 : f32 to vector<8x1xf32>
    %107 = arith.addf %105, %106 : vector<8x1xf32>
    %108 = math.rsqrt %107 : vector<8x1xf32>
    %109 = vector.broadcast %108 : vector<8x1xf32> to vector<8x32xf32>
    %110 = arith.mulf %100, %109 : vector<8x32xf32>
    %111 = vector.broadcast %93 : vector<1x32xf32> to vector<8x32xf32>
    %112 = arith.mulf %110, %111 : vector<8x32xf32>
    %113 = vector.broadcast %94 : vector<1x32xf32> to vector<8x32xf32>
    %114 = arith.addf %112, %113 : vector<8x32xf32>
    %c0_42 = arith.constant 0 : index
    %c0_43 = arith.constant 0 : index
    %115 = vector.load %arg6[%c0_42, %c0_43] : memref<32x64xf32, #tpu.memory_space<vmem>>, vector<32x64xf32>
    %cst_44 = arith.constant dense<0.000000e+00> : vector<8x64xf32>
    %116 = tpu.matmul %114, %115, %cst_44 {dimension_numbers = #tpu.dot_dimension_numbers<[1], [0], [0], [1], [0, 0, 1, 1], [], []>} : vector<8x32xf32>, vector<32x64xf32>, vector<8x64xf32> -> vector<8x64xf32>
    %c0_45 = arith.constant 0 : index
    %c0_46 = arith.constant 0 : index
    %117 = vector.load %arg7[%c0_45, %c0_46] : memref<1x64xf32, #tpu.memory_space<vmem>>, vector<1x64xf32>
    %118 = vector.broadcast %117 : vector<1x64xf32> to vector<8x64xf32>
    %119 = arith.addf %116, %118 : vector<8x64xf32>
    %cst_47 = arith.constant 0.000000e+00 : f32
    %120 = vector.broadcast %cst_47 : f32 to vector<8x64xf32>
    %121 = arith.maximumf %119, %120 : vector<8x64xf32>
    %c0_48 = arith.constant 0 : index
    %c0_49 = arith.constant 0 : index
    %122 = vector.load %arg8[%c0_48, %c0_49] : memref<64x32xf32, #tpu.memory_space<vmem>>, vector<64x32xf32>
    %cst_50 = arith.constant dense<0.000000e+00> : vector<8x32xf32>
    %123 = tpu.matmul %121, %122, %cst_50 {dimension_numbers = #tpu.dot_dimension_numbers<[1], [0], [0], [1], [0, 0, 1, 1], [], []>} : vector<8x64xf32>, vector<64x32xf32>, vector<8x32xf32> -> vector<8x32xf32>
    %c0_51 = arith.constant 0 : index
    %c0_52 = arith.constant 0 : index
    %124 = vector.load %arg9[%c0_51, %c0_52] : memref<1x32xf32, #tpu.memory_space<vmem>>, vector<1x32xf32>
    %125 = vector.broadcast %124 : vector<1x32xf32> to vector<8x32xf32>
    %126 = arith.addf %123, %125 : vector<8x32xf32>
    %127 = arith.addf %114, %126 : vector<8x32xf32>
    %c0_53 = arith.constant 0 : index
    %c0_54 = arith.constant 0 : index
    %128 = vector.load %arg12[%c0_53, %c0_54] : memref<1x32xf32, #tpu.memory_space<vmem>>, vector<1x32xf32>
    %c0_55 = arith.constant 0 : index
    %c0_56 = arith.constant 0 : index
    %129 = vector.load %arg13[%c0_55, %c0_56] : memref<1x32xf32, #tpu.memory_space<vmem>>, vector<1x32xf32>
    %cst_57 = arith.constant dense<0.000000e+00> : vector<8xf32>
    %130 = vector.multi_reduction <add>, %127, %cst_57 [1] : vector<8x32xf32> to vector<8xf32>
    %131 = vector.shape_cast %130 : vector<8xf32> to vector<8x1xf32>
    %cst_58 = arith.constant 3.200000e+01 : f32
    %132 = vector.broadcast %cst_58 : f32 to vector<8x1xf32>
    %133 = arith.divf %131, %132 : vector<8x1xf32>
    %134 = vector.broadcast %133 : vector<8x1xf32> to vector<8x32xf32>
    %135 = arith.subf %127, %134 : vector<8x32xf32>
    %136 = arith.mulf %135, %135 : vector<8x32xf32>
    %cst_59 = arith.constant dense<0.000000e+00> : vector<8xf32>
    %137 = vector.multi_reduction <add>, %136, %cst_59 [1] : vector<8x32xf32> to vector<8xf32>
    %138 = vector.shape_cast %137 : vector<8xf32> to vector<8x1xf32>
    %cst_60 = arith.constant 3.200000e+01 : f32
    %139 = vector.broadcast %cst_60 : f32 to vector<8x1xf32>
    %140 = arith.divf %138, %139 : vector<8x1xf32>
    %cst_61 = arith.constant 9.99999974E-6 : f32
    %141 = vector.broadcast %cst_61 : f32 to vector<8x1xf32>
    %142 = arith.addf %140, %141 : vector<8x1xf32>
    %143 = math.rsqrt %142 : vector<8x1xf32>
    %144 = vector.broadcast %143 : vector<8x1xf32> to vector<8x32xf32>
    %145 = arith.mulf %135, %144 : vector<8x32xf32>
    %146 = vector.broadcast %128 : vector<1x32xf32> to vector<8x32xf32>
    %147 = arith.mulf %145, %146 : vector<8x32xf32>
    %148 = vector.broadcast %129 : vector<1x32xf32> to vector<8x32xf32>
    %149 = arith.addf %147, %148 : vector<8x32xf32>
    %c0_62 = arith.constant 0 : index
    %c0_63 = arith.constant 0 : index
    %c0_64 = arith.constant 0 : index
    %150 = vector.load %arg15[%c0_62, %c0_63, %c0_64] : memref<1x8x32xf32, #tpu.memory_space<vmem>>, vector<1x8x32xf32>
    %151 = vector.shape_cast %150 : vector<1x8x32xf32> to vector<8x32xf32>
    %152 = vector.shape_cast %149 : vector<8x32xf32> to vector<1x8x32xf32>
    tpu.vector_store %arg15[%c0_62, %c0_63, %c0_64], %152 {strides = array<i32>} : memref<1x8x32xf32, #tpu.memory_space<vmem>>, vector<1x8x32xf32>,
    return
  }
  func.func @transform_0(%arg0: i32) -> (i32, i32, i32) {
    %c0_i32 = arith.constant 0 : i32
    %c0_i32_0 = arith.constant 0 : i32
    %c0_i32_1 = arith.constant 0 : i32
    return %arg0, %c0_i32, %c0_i32_0 : i32, i32, i32
  }
  func.func @transform_1(%arg0: i32) -> (i32, i32) {
    %c0_i32 = arith.constant 0 : i32
    %c0_i32_0 = arith.constant 0 : i32
    %c0_i32_1 = arith.constant 0 : i32
    return %c0_i32, %c0_i32_0 : i32, i32
  }
  func.func @transform_2(%arg0: i32) -> (i32, i32) {
    %c0_i32 = arith.constant 0 : i32
    %c0_i32_0 = arith.constant 0 : i32
    %c0_i32_1 = arith.constant 0 : i32
    return %c0_i32, %c0_i32_0 : i32, i32
  }
  func.func @transform_3(%arg0: i32) -> (i32, i32) {
    %c0_i32 = arith.constant 0 : i32
    %c0_i32_0 = arith.constant 0 : i32
    %c0_i32_1 = arith.constant 0 : i32
    return %c0_i32, %c0_i32_0 : i32, i32
  }
  func.func @transform_4(%arg0: i32) -> (i32, i32) {
    %c0_i32 = arith.constant 0 : i32
    %c0_i32_0 = arith.constant 0 : i32
    %c0_i32_1 = arith.constant 0 : i32
    return %c0_i32, %c0_i32_0 : i32, i32
  }
  func.func @transform_5(%arg0: i32) -> (i32, i32) {
    %c0_i32 = arith.constant 0 : i32
    %c0_i32_0 = arith.constant 0 : i32
    %c0_i32_1 = arith.constant 0 : i32
    return %c0_i32, %c0_i32_0 : i32, i32
  }
  func.func @transform_6(%arg0: i32) -> (i32, i32) {
    %c0_i32 = arith.constant 0 : i32
    %c0_i32_0 = arith.constant 0 : i32
    %c0_i32_1 = arith.constant 0 : i32
    return %c0_i32, %c0_i32_0 : i32, i32
  }
  func.func @transform_7(%arg0: i32) -> (i32, i32) {
    %c0_i32 = arith.constant 0 : i32
    %c0_i32_0 = arith.constant 0 : i32
    %c0_i32_1 = arith.constant 0 : i32
    return %c0_i32, %c0_i32_0 : i32, i32
  }
  func.func @transform_8(%arg0: i32) -> (i32, i32) {
    %c0_i32 = arith.constant 0 : i32
    %c0_i32_0 = arith.constant 0 : i32
    %c0_i32_1 = arith.constant 0 : i32
    return %c0_i32, %c0_i32_0 : i32, i32
  }
  func.func @transform_9(%arg0: i32) -> (i32, i32) {
    %c0_i32 = arith.constant 0 : i32
    %c0_i32_0 = arith.constant 0 : i32
    %c0_i32_1 = arith.constant 0 : i32
    return %c0_i32, %c0_i32_0 : i32, i32
  }
  func.func @transform_10(%arg0: i32) -> (i32, i32) {
    %c0_i32 = arith.constant 0 : i32
    %c0_i32_0 = arith.constant 0 : i32
    %c0_i32_1 = arith.constant 0 : i32
    return %c0_i32, %c0_i32_0 : i32, i32
  }
  func.func @transform_11(%arg0: i32) -> (i32, i32) {
    %c0_i32 = arith.constant 0 : i32
    %c0_i32_0 = arith.constant 0 : i32
    %c0_i32_1 = arith.constant 0 : i32
    return %c0_i32, %c0_i32_0 : i32, i32
  }
  func.func @transform_12(%arg0: i32) -> (i32, i32) {
    %c0_i32 = arith.constant 0 : i32
    %c0_i32_0 = arith.constant 0 : i32
    %c0_i32_1 = arith.constant 0 : i32
    return %c0_i32, %c0_i32_0 : i32, i32
  }
  func.func @transform_13(%arg0: i32) -> (i32, i32) {
    %c0_i32 = arith.constant 0 : i32
    %c0_i32_0 = arith.constant 0 : i32
    %c0_i32_1 = arith.constant 0 : i32
    return %c0_i32, %c0_i32_0 : i32, i32
  }
  func.func @transform_14(%arg0: i32) -> (i32, i32, i32) {
    %c0_i32 = arith.constant 0 : i32
    %c0_i32_0 = arith.constant 0 : i32
    %c0_i32_1 = arith.constant 0 : i32
    return %arg0, %c0_i32, %c0_i32_0 : i32, i32, i32
  }
}

module attributes {stable_mosaic.version = 11 : i64} {
  func.func @_ln_kernel(%arg0: i32, %arg1: memref<1x8x32xf32, #tpu.memory_space<vmem>>, %arg2: memref<1x32xf32, #tpu.memory_space<vmem>>, %arg3: memref<1x32xf32, #tpu.memory_space<vmem>>, %arg4: memref<1x8x32xf32, #tpu.memory_space<vmem>>) attributes {dimension_semantics = [#tpu.dimension_semantics<parallel>], iteration_bounds = array<i64: 2>, scalar_prefetch = 0 : i64, scratch_operands = 0 : i64, tpu.core_type = #tpu.core_type<tc>, window_params = [{transform_indices = @transform_0, window_bounds = array<i64: 1, 8, 32>}, {pipeline_mode = #tpu.pipeline_mode<synchronous>, transform_indices = @transform_1, window_bounds = array<i64: 1, 32>}, {pipeline_mode = #tpu.pipeline_mode<synchronous>, transform_indices = @transform_2, window_bounds = array<i64: 1, 32>}, {transform_indices = @transform_3, window_bounds = array<i64: 1, 8, 32>}]} {
    %c0 = arith.constant 0 : index
    %c0_0 = arith.constant 0 : index
    %c0_1 = arith.constant 0 : index
    %0 = vector.load %arg1[%c0, %c0_0, %c0_1] : memref<1x8x32xf32, #tpu.memory_space<vmem>>, vector<1x8x32xf32>
    %1 = vector.shape_cast %0 : vector<1x8x32xf32> to vector<8x32xf32>
    %c0_2 = arith.constant 0 : index
    %c0_3 = arith.constant 0 : index
    %2 = vector.load %arg2[%c0_2, %c0_3] : memref<1x32xf32, #tpu.memory_space<vmem>>, vector<1x32xf32>
    %c0_4 = arith.constant 0 : index
    %c0_5 = arith.constant 0 : index
    %3 = vector.load %arg3[%c0_4, %c0_5] : memref<1x32xf32, #tpu.memory_space<vmem>>, vector<1x32xf32>
    %cst = arith.constant dense<0.000000e+00> : vector<8xf32>
    %4 = vector.multi_reduction <add>, %1, %cst [1] : vector<8x32xf32> to vector<8xf32>
    %5 = vector.shape_cast %4 : vector<8xf32> to vector<8x1xf32>
    %cst_6 = arith.constant 3.200000e+01 : f32
    %6 = vector.broadcast %cst_6 : f32 to vector<8x1xf32>
    %7 = arith.divf %5, %6 : vector<8x1xf32>
    %8 = vector.broadcast %7 : vector<8x1xf32> to vector<8x32xf32>
    %9 = arith.subf %1, %8 : vector<8x32xf32>
    %10 = arith.mulf %9, %9 : vector<8x32xf32>
    %cst_7 = arith.constant dense<0.000000e+00> : vector<8xf32>
    %11 = vector.multi_reduction <add>, %10, %cst_7 [1] : vector<8x32xf32> to vector<8xf32>
    %12 = vector.shape_cast %11 : vector<8xf32> to vector<8x1xf32>
    %cst_8 = arith.constant 3.200000e+01 : f32
    %13 = vector.broadcast %cst_8 : f32 to vector<8x1xf32>
    %14 = arith.divf %12, %13 : vector<8x1xf32>
    %cst_9 = arith.constant 9.99999974E-6 : f32
    %15 = vector.broadcast %cst_9 : f32 to vector<8x1xf32>
    %16 = arith.addf %14, %15 : vector<8x1xf32>
    %17 = math.rsqrt %16 : vector<8x1xf32>
    %18 = vector.broadcast %17 : vector<8x1xf32> to vector<8x32xf32>
    %19 = arith.mulf %9, %18 : vector<8x32xf32>
    %20 = vector.broadcast %2 : vector<1x32xf32> to vector<8x32xf32>
    %21 = arith.mulf %19, %20 : vector<8x32xf32>
    %22 = vector.broadcast %3 : vector<1x32xf32> to vector<8x32xf32>
    %23 = arith.addf %21, %22 : vector<8x32xf32>
    %c0_10 = arith.constant 0 : index
    %c0_11 = arith.constant 0 : index
    %c0_12 = arith.constant 0 : index
    %24 = vector.load %arg4[%c0_10, %c0_11, %c0_12] : memref<1x8x32xf32, #tpu.memory_space<vmem>>, vector<1x8x32xf32>
    %25 = vector.shape_cast %24 : vector<1x8x32xf32> to vector<8x32xf32>
    %26 = vector.shape_cast %23 : vector<8x32xf32> to vector<1x8x32xf32>
    tpu.vector_store %arg4[%c0_10, %c0_11, %c0_12], %26 {strides = array<i32>} : memref<1x8x32xf32, #tpu.memory_space<vmem>>, vector<1x8x32xf32>,
    return
  }
  func.func @transform_0(%arg0: i32) -> (i32, i32, i32) {
    %c0_i32 = arith.constant 0 : i32
    %c0_i32_0 = arith.constant 0 : i32
    %c0_i32_1 = arith.constant 0 : i32
    return %arg0, %c0_i32, %c0_i32_0 : i32, i32, i32
  }
  func.func @transform_1(%arg0: i32) -> (i32, i32) {
    %c0_i32 = arith.constant 0 : i32
    %c0_i32_0 = arith.constant 0 : i32
    %c0_i32_1 = arith.constant 0 : i32
    return %c0_i32, %c0_i32_0 : i32, i32
  }
  func.func @transform_2(%arg0: i32) -> (i32, i32) {
    %c0_i32 = arith.constant 0 : i32
    %c0_i32_0 = arith.constant 0 : i32
    %c0_i32_1 = arith.constant 0 : i32
    return %c0_i32, %c0_i32_0 : i32, i32
  }
  func.func @transform_3(%arg0: i32) -> (i32, i32, i32) {
    %c0_i32 = arith.constant 0 : i32
    %c0_i32_0 = arith.constant 0 : i32
    %c0_i32_1 = arith.constant 0 : i32
    return %arg0, %c0_i32, %c0_i32_0 : i32, i32, i32
  }
}

module attributes {stable_mosaic.version = 11 : i64} {
  func.func @_dec_layer_kernel(%arg0: i32, %arg1: memref<1x8x32xf32, #tpu.memory_space<vmem>>, %arg2: memref<1x8x32xf32, #tpu.memory_space<vmem>>, %arg3: memref<32x96xf32, #tpu.memory_space<vmem>>, %arg4: memref<1x96xf32, #tpu.memory_space<vmem>>, %arg5: memref<32x32xf32, #tpu.memory_space<vmem>>, %arg6: memref<1x32xf32, #tpu.memory_space<vmem>>, %arg7: memref<32x32xf32, #tpu.memory_space<vmem>>, %arg8: memref<1x32xf32, #tpu.memory_space<vmem>>, %arg9: memref<32x64xf32, #tpu.memory_space<vmem>>, %arg10: memref<1x64xf32, #tpu.memory_space<vmem>>, %arg11: memref<32x32xf32, #tpu.memory_space<vmem>>, %arg12: memref<1x32xf32, #tpu.memory_space<vmem>>, %arg13: memref<32x64xf32, #tpu.memory_space<vmem>>, %arg14: memref<1x64xf32, #tpu.memory_space<vmem>>, %arg15: memref<64x32xf32, #tpu.memory_space<vmem>>, %arg16: memref<1x32xf32, #tpu.memory_space<vmem>>, %arg17: memref<1x32xf32, #tpu.memory_space<vmem>>, %arg18: memref<1x32xf32, #tpu.memory_space<vmem>>, %arg19: memref<1x32xf32, #tpu.memory_space<vmem>>, %arg20: memref<1x32xf32, #tpu.memory_space<vmem>>, %arg21: memref<1x32xf32, #tpu.memory_space<vmem>>, %arg22: memref<1x32xf32, #tpu.memory_space<vmem>>, %arg23: memref<8x8xf32, #tpu.memory_space<vmem>>, %arg24: memref<8x8xf32, #tpu.memory_space<vmem>>, %arg25: memref<1x8x32xf32, #tpu.memory_space<vmem>>) attributes {dimension_semantics = [#tpu.dimension_semantics<parallel>], iteration_bounds = array<i64: 2>, scalar_prefetch = 0 : i64, scratch_operands = 0 : i64, tpu.core_type = #tpu.core_type<tc>, window_params = [{transform_indices = @transform_0, window_bounds = array<i64: 1, 8, 32>}, {transform_indices = @transform_1, window_bounds = array<i64: 1, 8, 32>}, {pipeline_mode = #tpu.pipeline_mode<synchronous>, transform_indices = @transform_2, window_bounds = array<i64: 32, 96>}, {pipeline_mode = #tpu.pipeline_mode<synchronous>, transform_indices = @transform_3, window_bounds = array<i64: 1, 96>}, {pipeline_mode = #tpu.pipeline_mode<synchronous>, transform_indices = @transform_4, window_bounds = array<i64: 32, 32>}, {pipeline_mode = #tpu.pipeline_mode<synchronous>, transform_indices = @transform_5, window_bounds = array<i64: 1, 32>}, {pipeline_mode = #tpu.pipeline_mode<synchronous>, transform_indices = @transform_6, window_bounds = array<i64: 32, 32>}, {pipeline_mode = #tpu.pipeline_mode<synchronous>, transform_indices = @transform_7, window_bounds = array<i64: 1, 32>}, {pipeline_mode = #tpu.pipeline_mode<synchronous>, transform_indices = @transform_8, window_bounds = array<i64: 32, 64>}, {pipeline_mode = #tpu.pipeline_mode<synchronous>, transform_indices = @transform_9, window_bounds = array<i64: 1, 64>}, {pipeline_mode = #tpu.pipeline_mode<synchronous>, transform_indices = @transform_10, window_bounds = array<i64: 32, 32>}, {pipeline_mode = #tpu.pipeline_mode<synchronous>, transform_indices = @transform_11, window_bounds = array<i64: 1, 32>}, {pipeline_mode = #tpu.pipeline_mode<synchronous>, transform_indices = @transform_12, window_bounds = array<i64: 32, 64>}, {pipeline_mode = #tpu.pipeline_mode<synchronous>, transform_indices = @transform_13, window_bounds = array<i64: 1, 64>}, {pipeline_mode = #tpu.pipeline_mode<synchronous>, transform_indices = @transform_14, window_bounds = array<i64: 64, 32>}, {pipeline_mode = #tpu.pipeline_mode<synchronous>, transform_indices = @transform_15, window_bounds = array<i64: 1, 32>}, {pipeline_mode = #tpu.pipeline_mode<synchronous>, transform_indices = @transform_16, window_bounds = array<i64: 1, 32>}, {pipeline_mode = #tpu.pipeline_mode<synchronous>, transform_indices = @transform_17, window_bounds = array<i64: 1, 32>}, {pipeline_mode = #tpu.pipeline_mode<synchronous>, transform_indices = @transform_18, window_bounds = array<i64: 1, 32>}, {pipeline_mode = #tpu.pipeline_mode<synchronous>, transform_indices = @transform_19, window_bounds = array<i64: 1, 32>}, {pipeline_mode = #tpu.pipeline_mode<synchronous>, transform_indices = @transform_20, window_bounds = array<i64: 1, 32>}, {pipeline_mode = #tpu.pipeline_mode<synchronous>, transform_indices = @transform_21, window_bounds = array<i64: 1, 32>}, {pipeline_mode = #tpu.pipeline_mode<synchronous>, transform_indices = @transform_22, window_bounds = array<i64: 8, 8>}, {pipeline_mode = #tpu.pipeline_mode<synchronous>, transform_indices = @transform_23, window_bounds = array<i64: 8, 8>}, {transform_indices = @transform_24, window_bounds = array<i64: 1, 8, 32>}]} {
    %c0 = arith.constant 0 : index
    %c0_0 = arith.constant 0 : index
    %c0_1 = arith.constant 0 : index
    %0 = vector.load %arg1[%c0, %c0_0, %c0_1] : memref<1x8x32xf32, #tpu.memory_space<vmem>>, vector<1x8x32xf32>
    %1 = vector.shape_cast %0 : vector<1x8x32xf32> to vector<8x32xf32>
    %c0_2 = arith.constant 0 : index
    %c0_3 = arith.constant 0 : index
    %c0_4 = arith.constant 0 : index
    %2 = vector.load %arg2[%c0_2, %c0_3, %c0_4] : memref<1x8x32xf32, #tpu.memory_space<vmem>>, vector<1x8x32xf32>
    %3 = vector.shape_cast %2 : vector<1x8x32xf32> to vector<8x32xf32>
    %c0_5 = arith.constant 0 : index
    %c0_6 = arith.constant 0 : index
    %4 = vector.load %arg3[%c0_5, %c0_6] : memref<32x96xf32, #tpu.memory_space<vmem>>, vector<32x96xf32>
    %cst = arith.constant dense<0.000000e+00> : vector<8x96xf32>
    %5 = tpu.matmul %1, %4, %cst {dimension_numbers = #tpu.dot_dimension_numbers<[1], [0], [0], [1], [0, 0, 1, 1], [], []>} : vector<8x32xf32>, vector<32x96xf32>, vector<8x96xf32> -> vector<8x96xf32>
    %c0_7 = arith.constant 0 : index
    %c0_8 = arith.constant 0 : index
    %6 = vector.load %arg4[%c0_7, %c0_8] : memref<1x96xf32, #tpu.memory_space<vmem>>, vector<1x96xf32>
    %7 = vector.broadcast %6 : vector<1x96xf32> to vector<8x96xf32>
    %8 = arith.addf %5, %7 : vector<8x96xf32>
    %9 = vector.extract_strided_slice %8 {offsets = [0, 0], sizes = [8, 32], strides = [1, 1]} : vector<8x96xf32> to vector<8x32xf32>
    %10 = vector.extract_strided_slice %8 {offsets = [0, 32], sizes = [8, 32], strides = [1, 1]} : vector<8x96xf32> to vector<8x32xf32>
    %11 = vector.extract_strided_slice %8 {offsets = [0, 64], sizes = [8, 32], strides = [1, 1]} : vector<8x96xf32> to vector<8x32xf32>
    %c0_9 = arith.constant 0 : index
    %c0_10 = arith.constant 0 : index
    %12 = vector.load %arg5[%c0_9, %c0_10] : memref<32x32xf32, #tpu.memory_space<vmem>>, vector<32x32xf32>
    %c0_11 = arith.constant 0 : index
    %c0_12 = arith.constant 0 : index
    %13 = vector.load %arg6[%c0_11, %c0_12] : memref<1x32xf32, #tpu.memory_space<vmem>>, vector<1x32xf32>
    %c0_13 = arith.constant 0 : index
    %c0_14 = arith.constant 0 : index
    %14 = vector.load %arg23[%c0_13, %c0_14] : memref<8x8xf32, #tpu.memory_space<vmem>>, vector<8x8xf32>
    %cst_15 = arith.constant 0.353553385 : f32
    %15 = vector.broadcast %cst_15 : f32 to vector<8x32xf32>
    %16 = arith.mulf %9, %15 : vector<8x32xf32>
    %17 = vector.extract_strided_slice %16 {offsets = [0, 0], sizes = [8, 8], strides = [1, 1]} : vector<8x32xf32> to vector<8x8xf32>
    %18 = vector.extract_strided_slice %10 {offsets = [0, 0], sizes = [8, 8], strides = [1, 1]} : vector<8x32xf32> to vector<8x8xf32>
    %cst_16 = arith.constant dense<0.000000e+00> : vector<8x8xf32>
    %19 = tpu.matmul %17, %18, %cst_16 {dimension_numbers = #tpu.dot_dimension_numbers<[1], [1], [0], [0], [0, 0, 1, 0], [], []>} : vector<8x8xf32>, vector<8x8xf32>, vector<8x8xf32> -> vector<8x8xf32>
    %20 = arith.addf %19, %14 : vector<8x8xf32>
    %cst_17 = arith.constant dense<0xFF800000> : vector<8xf32>
    %21 = vector.multi_reduction <maximumf>, %20, %cst_17 [1] : vector<8x8xf32> to vector<8xf32>
    %22 = vector.shape_cast %21 : vector<8xf32> to vector<8x1xf32>
    %23 = vector.broadcast %22 : vector<8x1xf32> to vector<8x8xf32>
    %24 = arith.subf %20, %23 : vector<8x8xf32>
    %25 = math.exp %24 : vector<8x8xf32>
    %cst_18 = arith.constant dense<0.000000e+00> : vector<8xf32>
    %26 = vector.multi_reduction <add>, %25, %cst_18 [1] : vector<8x8xf32> to vector<8xf32>
    %27 = vector.shape_cast %26 : vector<8xf32> to vector<8x1xf32>
    %28 = tpu.reciprocal %27 {approx = true} : vector<8x1xf32> -> vector<8x1xf32>
    %29 = vector.broadcast %28 : vector<8x1xf32> to vector<8x8xf32>
    %30 = arith.mulf %25, %29 : vector<8x8xf32>
    %31 = vector.extract_strided_slice %11 {offsets = [0, 0], sizes = [8, 8], strides = [1, 1]} : vector<8x32xf32> to vector<8x8xf32>
    %cst_19 = arith.constant dense<0.000000e+00> : vector<8x8xf32>
    %32 = tpu.matmul %30, %31, %cst_19 {dimension_numbers = #tpu.dot_dimension_numbers<[1], [0], [0], [1], [0, 0, 1, 1], [], []>} : vector<8x8xf32>, vector<8x8xf32>, vector<8x8xf32> -> vector<8x8xf32>
    %33 = vector.extract_strided_slice %12 {offsets = [0, 0], sizes = [8, 32], strides = [1, 1]} : vector<32x32xf32> to vector<8x32xf32>
    %cst_20 = arith.constant dense<0.000000e+00> : vector<8x32xf32>
    %34 = tpu.matmul %32, %33, %cst_20 {dimension_numbers = #tpu.dot_dimension_numbers<[1], [0], [0], [1], [0, 0, 1, 1], [], []>} : vector<8x8xf32>, vector<8x32xf32>, vector<8x32xf32> -> vector<8x32xf32>
    %35 = vector.broadcast %13 : vector<1x32xf32> to vector<8x32xf32>
    %36 = arith.addf %35, %34 : vector<8x32xf32>
    %37 = vector.extract_strided_slice %16 {offsets = [0, 8], sizes = [8, 8], strides = [1, 1]} : vector<8x32xf32> to vector<8x8xf32>
    %38 = vector.extract_strided_slice %10 {offsets = [0, 8], sizes = [8, 8], strides = [1, 1]} : vector<8x32xf32> to vector<8x8xf32>
    %cst_21 = arith.constant dense<0.000000e+00> : vector<8x8xf32>
    %39 = tpu.matmul %37, %38, %cst_21 {dimension_numbers = #tpu.dot_dimension_numbers<[1], [1], [0], [0], [0, 0, 1, 0], [], []>} : vector<8x8xf32>, vector<8x8xf32>, vector<8x8xf32> -> vector<8x8xf32>
    %40 = arith.addf %39, %14 : vector<8x8xf32>
    %cst_22 = arith.constant dense<0xFF800000> : vector<8xf32>
    %41 = vector.multi_reduction <maximumf>, %40, %cst_22 [1] : vector<8x8xf32> to vector<8xf32>
    %42 = vector.shape_cast %41 : vector<8xf32> to vector<8x1xf32>
    %43 = vector.broadcast %42 : vector<8x1xf32> to vector<8x8xf32>
    %44 = arith.subf %40, %43 : vector<8x8xf32>
    %45 = math.exp %44 : vector<8x8xf32>
    %cst_23 = arith.constant dense<0.000000e+00> : vector<8xf32>
    %46 = vector.multi_reduction <add>, %45, %cst_23 [1] : vector<8x8xf32> to vector<8xf32>
    %47 = vector.shape_cast %46 : vector<8xf32> to vector<8x1xf32>
    %48 = tpu.reciprocal %47 {approx = true} : vector<8x1xf32> -> vector<8x1xf32>
    %49 = vector.broadcast %48 : vector<8x1xf32> to vector<8x8xf32>
    %50 = arith.mulf %45, %49 : vector<8x8xf32>
    %51 = vector.extract_strided_slice %11 {offsets = [0, 8], sizes = [8, 8], strides = [1, 1]} : vector<8x32xf32> to vector<8x8xf32>
    %cst_24 = arith.constant dense<0.000000e+00> : vector<8x8xf32>
    %52 = tpu.matmul %50, %51, %cst_24 {dimension_numbers = #tpu.dot_dimension_numbers<[1], [0], [0], [1], [0, 0, 1, 1], [], []>} : vector<8x8xf32>, vector<8x8xf32>, vector<8x8xf32> -> vector<8x8xf32>
    %53 = vector.extract_strided_slice %12 {offsets = [8, 0], sizes = [8, 32], strides = [1, 1]} : vector<32x32xf32> to vector<8x32xf32>
    %cst_25 = arith.constant dense<0.000000e+00> : vector<8x32xf32>
    %54 = tpu.matmul %52, %53, %cst_25 {dimension_numbers = #tpu.dot_dimension_numbers<[1], [0], [0], [1], [0, 0, 1, 1], [], []>} : vector<8x8xf32>, vector<8x32xf32>, vector<8x32xf32> -> vector<8x32xf32>
    %55 = arith.addf %36, %54 : vector<8x32xf32>
    %56 = vector.extract_strided_slice %16 {offsets = [0, 16], sizes = [8, 8], strides = [1, 1]} : vector<8x32xf32> to vector<8x8xf32>
    %57 = vector.extract_strided_slice %10 {offsets = [0, 16], sizes = [8, 8], strides = [1, 1]} : vector<8x32xf32> to vector<8x8xf32>
    %cst_26 = arith.constant dense<0.000000e+00> : vector<8x8xf32>
    %58 = tpu.matmul %56, %57, %cst_26 {dimension_numbers = #tpu.dot_dimension_numbers<[1], [1], [0], [0], [0, 0, 1, 0], [], []>} : vector<8x8xf32>, vector<8x8xf32>, vector<8x8xf32> -> vector<8x8xf32>
    %59 = arith.addf %58, %14 : vector<8x8xf32>
    %cst_27 = arith.constant dense<0xFF800000> : vector<8xf32>
    %60 = vector.multi_reduction <maximumf>, %59, %cst_27 [1] : vector<8x8xf32> to vector<8xf32>
    %61 = vector.shape_cast %60 : vector<8xf32> to vector<8x1xf32>
    %62 = vector.broadcast %61 : vector<8x1xf32> to vector<8x8xf32>
    %63 = arith.subf %59, %62 : vector<8x8xf32>
    %64 = math.exp %63 : vector<8x8xf32>
    %cst_28 = arith.constant dense<0.000000e+00> : vector<8xf32>
    %65 = vector.multi_reduction <add>, %64, %cst_28 [1] : vector<8x8xf32> to vector<8xf32>
    %66 = vector.shape_cast %65 : vector<8xf32> to vector<8x1xf32>
    %67 = tpu.reciprocal %66 {approx = true} : vector<8x1xf32> -> vector<8x1xf32>
    %68 = vector.broadcast %67 : vector<8x1xf32> to vector<8x8xf32>
    %69 = arith.mulf %64, %68 : vector<8x8xf32>
    %70 = vector.extract_strided_slice %11 {offsets = [0, 16], sizes = [8, 8], strides = [1, 1]} : vector<8x32xf32> to vector<8x8xf32>
    %cst_29 = arith.constant dense<0.000000e+00> : vector<8x8xf32>
    %71 = tpu.matmul %69, %70, %cst_29 {dimension_numbers = #tpu.dot_dimension_numbers<[1], [0], [0], [1], [0, 0, 1, 1], [], []>} : vector<8x8xf32>, vector<8x8xf32>, vector<8x8xf32> -> vector<8x8xf32>
    %72 = vector.extract_strided_slice %12 {offsets = [16, 0], sizes = [8, 32], strides = [1, 1]} : vector<32x32xf32> to vector<8x32xf32>
    %cst_30 = arith.constant dense<0.000000e+00> : vector<8x32xf32>
    %73 = tpu.matmul %71, %72, %cst_30 {dimension_numbers = #tpu.dot_dimension_numbers<[1], [0], [0], [1], [0, 0, 1, 1], [], []>} : vector<8x8xf32>, vector<8x32xf32>, vector<8x32xf32> -> vector<8x32xf32>
    %74 = arith.addf %55, %73 : vector<8x32xf32>
    %75 = vector.extract_strided_slice %16 {offsets = [0, 24], sizes = [8, 8], strides = [1, 1]} : vector<8x32xf32> to vector<8x8xf32>
    %76 = vector.extract_strided_slice %10 {offsets = [0, 24], sizes = [8, 8], strides = [1, 1]} : vector<8x32xf32> to vector<8x8xf32>
    %cst_31 = arith.constant dense<0.000000e+00> : vector<8x8xf32>
    %77 = tpu.matmul %75, %76, %cst_31 {dimension_numbers = #tpu.dot_dimension_numbers<[1], [1], [0], [0], [0, 0, 1, 0], [], []>} : vector<8x8xf32>, vector<8x8xf32>, vector<8x8xf32> -> vector<8x8xf32>
    %78 = arith.addf %77, %14 : vector<8x8xf32>
    %cst_32 = arith.constant dense<0xFF800000> : vector<8xf32>
    %79 = vector.multi_reduction <maximumf>, %78, %cst_32 [1] : vector<8x8xf32> to vector<8xf32>
    %80 = vector.shape_cast %79 : vector<8xf32> to vector<8x1xf32>
    %81 = vector.broadcast %80 : vector<8x1xf32> to vector<8x8xf32>
    %82 = arith.subf %78, %81 : vector<8x8xf32>
    %83 = math.exp %82 : vector<8x8xf32>
    %cst_33 = arith.constant dense<0.000000e+00> : vector<8xf32>
    %84 = vector.multi_reduction <add>, %83, %cst_33 [1] : vector<8x8xf32> to vector<8xf32>
    %85 = vector.shape_cast %84 : vector<8xf32> to vector<8x1xf32>
    %86 = tpu.reciprocal %85 {approx = true} : vector<8x1xf32> -> vector<8x1xf32>
    %87 = vector.broadcast %86 : vector<8x1xf32> to vector<8x8xf32>
    %88 = arith.mulf %83, %87 : vector<8x8xf32>
    %89 = vector.extract_strided_slice %11 {offsets = [0, 24], sizes = [8, 8], strides = [1, 1]} : vector<8x32xf32> to vector<8x8xf32>
    %cst_34 = arith.constant dense<0.000000e+00> : vector<8x8xf32>
    %90 = tpu.matmul %88, %89, %cst_34 {dimension_numbers = #tpu.dot_dimension_numbers<[1], [0], [0], [1], [0, 0, 1, 1], [], []>} : vector<8x8xf32>, vector<8x8xf32>, vector<8x8xf32> -> vector<8x8xf32>
    %91 = vector.extract_strided_slice %12 {offsets = [24, 0], sizes = [8, 32], strides = [1, 1]} : vector<32x32xf32> to vector<8x32xf32>
    %cst_35 = arith.constant dense<0.000000e+00> : vector<8x32xf32>
    %92 = tpu.matmul %90, %91, %cst_35 {dimension_numbers = #tpu.dot_dimension_numbers<[1], [0], [0], [1], [0, 0, 1, 1], [], []>} : vector<8x8xf32>, vector<8x32xf32>, vector<8x32xf32> -> vector<8x32xf32>
    %93 = arith.addf %74, %92 : vector<8x32xf32>
    %94 = arith.addf %1, %93 : vector<8x32xf32>
    %c0_36 = arith.constant 0 : index
    %c0_37 = arith.constant 0 : index
    %95 = vector.load %arg17[%c0_36, %c0_37] : memref<1x32xf32, #tpu.memory_space<vmem>>, vector<1x32xf32>
    %c0_38 = arith.constant 0 : index
    %c0_39 = arith.constant 0 : index
    %96 = vector.load %arg18[%c0_38, %c0_39] : memref<1x32xf32, #tpu.memory_space<vmem>>, vector<1x32xf32>
    %cst_40 = arith.constant dense<0.000000e+00> : vector<8xf32>
    %97 = vector.multi_reduction <add>, %94, %cst_40 [1] : vector<8x32xf32> to vector<8xf32>
    %98 = vector.shape_cast %97 : vector<8xf32> to vector<8x1xf32>
    %cst_41 = arith.constant 3.200000e+01 : f32
    %99 = vector.broadcast %cst_41 : f32 to vector<8x1xf32>
    %100 = arith.divf %98, %99 : vector<8x1xf32>
    %101 = vector.broadcast %100 : vector<8x1xf32> to vector<8x32xf32>
    %102 = arith.subf %94, %101 : vector<8x32xf32>
    %103 = arith.mulf %102, %102 : vector<8x32xf32>
    %cst_42 = arith.constant dense<0.000000e+00> : vector<8xf32>
    %104 = vector.multi_reduction <add>, %103, %cst_42 [1] : vector<8x32xf32> to vector<8xf32>
    %105 = vector.shape_cast %104 : vector<8xf32> to vector<8x1xf32>
    %cst_43 = arith.constant 3.200000e+01 : f32
    %106 = vector.broadcast %cst_43 : f32 to vector<8x1xf32>
    %107 = arith.divf %105, %106 : vector<8x1xf32>
    %cst_44 = arith.constant 9.99999974E-6 : f32
    %108 = vector.broadcast %cst_44 : f32 to vector<8x1xf32>
    %109 = arith.addf %107, %108 : vector<8x1xf32>
    %110 = math.rsqrt %109 : vector<8x1xf32>
    %111 = vector.broadcast %110 : vector<8x1xf32> to vector<8x32xf32>
    %112 = arith.mulf %102, %111 : vector<8x32xf32>
    %113 = vector.broadcast %95 : vector<1x32xf32> to vector<8x32xf32>
    %114 = arith.mulf %112, %113 : vector<8x32xf32>
    %115 = vector.broadcast %96 : vector<1x32xf32> to vector<8x32xf32>
    %116 = arith.addf %114, %115 : vector<8x32xf32>
    %c0_45 = arith.constant 0 : index
    %c0_46 = arith.constant 0 : index
    %117 = vector.load %arg7[%c0_45, %c0_46] : memref<32x32xf32, #tpu.memory_space<vmem>>, vector<32x32xf32>
    %cst_47 = arith.constant dense<0.000000e+00> : vector<8x32xf32>
    %118 = tpu.matmul %116, %117, %cst_47 {dimension_numbers = #tpu.dot_dimension_numbers<[1], [0], [0], [1], [0, 0, 1, 1], [], []>} : vector<8x32xf32>, vector<32x32xf32>, vector<8x32xf32> -> vector<8x32xf32>
    %c0_48 = arith.constant 0 : index
    %c0_49 = arith.constant 0 : index
    %119 = vector.load %arg8[%c0_48, %c0_49] : memref<1x32xf32, #tpu.memory_space<vmem>>, vector<1x32xf32>
    %120 = vector.broadcast %119 : vector<1x32xf32> to vector<8x32xf32>
    %121 = arith.addf %118, %120 : vector<8x32xf32>
    %c0_50 = arith.constant 0 : index
    %c0_51 = arith.constant 0 : index
    %122 = vector.load %arg9[%c0_50, %c0_51] : memref<32x64xf32, #tpu.memory_space<vmem>>, vector<32x64xf32>
    %cst_52 = arith.constant dense<0.000000e+00> : vector<8x64xf32>
    %123 = tpu.matmul %3, %122, %cst_52 {dimension_numbers = #tpu.dot_dimension_numbers<[1], [0], [0], [1], [0, 0, 1, 1], [], []>} : vector<8x32xf32>, vector<32x64xf32>, vector<8x64xf32> -> vector<8x64xf32>
    %c0_53 = arith.constant 0 : index
    %c0_54 = arith.constant 0 : index
    %124 = vector.load %arg10[%c0_53, %c0_54] : memref<1x64xf32, #tpu.memory_space<vmem>>, vector<1x64xf32>
    %125 = vector.broadcast %124 : vector<1x64xf32> to vector<8x64xf32>
    %126 = arith.addf %123, %125 : vector<8x64xf32>
    %127 = vector.extract_strided_slice %126 {offsets = [0, 0], sizes = [8, 32], strides = [1, 1]} : vector<8x64xf32> to vector<8x32xf32>
    %128 = vector.extract_strided_slice %126 {offsets = [0, 32], sizes = [8, 32], strides = [1, 1]} : vector<8x64xf32> to vector<8x32xf32>
    %c0_55 = arith.constant 0 : index
    %c0_56 = arith.constant 0 : index
    %129 = vector.load %arg11[%c0_55, %c0_56] : memref<32x32xf32, #tpu.memory_space<vmem>>, vector<32x32xf32>
    %c0_57 = arith.constant 0 : index
    %c0_58 = arith.constant 0 : index
    %130 = vector.load %arg12[%c0_57, %c0_58] : memref<1x32xf32, #tpu.memory_space<vmem>>, vector<1x32xf32>
    %c0_59 = arith.constant 0 : index
    %c0_60 = arith.constant 0 : index
    %131 = vector.load %arg24[%c0_59, %c0_60] : memref<8x8xf32, #tpu.memory_space<vmem>>, vector<8x8xf32>
    %cst_61 = arith.constant 0.353553385 : f32
    %132 = vector.broadcast %cst_61 : f32 to vector<8x32xf32>
    %133 = arith.mulf %121, %132 : vector<8x32xf32>
    %134 = vector.extract_strided_slice %133 {offsets = [0, 0], sizes = [8, 8], strides = [1, 1]} : vector<8x32xf32> to vector<8x8xf32>
    %135 = vector.extract_strided_slice %127 {offsets = [0, 0], sizes = [8, 8], strides = [1, 1]} : vector<8x32xf32> to vector<8x8xf32>
    %cst_62 = arith.constant dense<0.000000e+00> : vector<8x8xf32>
    %136 = tpu.matmul %134, %135, %cst_62 {dimension_numbers = #tpu.dot_dimension_numbers<[1], [1], [0], [0], [0, 0, 1, 0], [], []>} : vector<8x8xf32>, vector<8x8xf32>, vector<8x8xf32> -> vector<8x8xf32>
    %137 = arith.addf %136, %131 : vector<8x8xf32>
    %cst_63 = arith.constant dense<0xFF800000> : vector<8xf32>
    %138 = vector.multi_reduction <maximumf>, %137, %cst_63 [1] : vector<8x8xf32> to vector<8xf32>
    %139 = vector.shape_cast %138 : vector<8xf32> to vector<8x1xf32>
    %140 = vector.broadcast %139 : vector<8x1xf32> to vector<8x8xf32>
    %141 = arith.subf %137, %140 : vector<8x8xf32>
    %142 = math.exp %141 : vector<8x8xf32>
    %cst_64 = arith.constant dense<0.000000e+00> : vector<8xf32>
    %143 = vector.multi_reduction <add>, %142, %cst_64 [1] : vector<8x8xf32> to vector<8xf32>
    %144 = vector.shape_cast %143 : vector<8xf32> to vector<8x1xf32>
    %145 = tpu.reciprocal %144 {approx = true} : vector<8x1xf32> -> vector<8x1xf32>
    %146 = vector.broadcast %145 : vector<8x1xf32> to vector<8x8xf32>
    %147 = arith.mulf %142, %146 : vector<8x8xf32>
    %148 = vector.extract_strided_slice %128 {offsets = [0, 0], sizes = [8, 8], strides = [1, 1]} : vector<8x32xf32> to vector<8x8xf32>
    %cst_65 = arith.constant dense<0.000000e+00> : vector<8x8xf32>
    %149 = tpu.matmul %147, %148, %cst_65 {dimension_numbers = #tpu.dot_dimension_numbers<[1], [0], [0], [1], [0, 0, 1, 1], [], []>} : vector<8x8xf32>, vector<8x8xf32>, vector<8x8xf32> -> vector<8x8xf32>
    %150 = vector.extract_strided_slice %129 {offsets = [0, 0], sizes = [8, 32], strides = [1, 1]} : vector<32x32xf32> to vector<8x32xf32>
    %cst_66 = arith.constant dense<0.000000e+00> : vector<8x32xf32>
    %151 = tpu.matmul %149, %150, %cst_66 {dimension_numbers = #tpu.dot_dimension_numbers<[1], [0], [0], [1], [0, 0, 1, 1], [], []>} : vector<8x8xf32>, vector<8x32xf32>, vector<8x32xf32> -> vector<8x32xf32>
    %152 = vector.broadcast %130 : vector<1x32xf32> to vector<8x32xf32>
    %153 = arith.addf %152, %151 : vector<8x32xf32>
    %154 = vector.extract_strided_slice %133 {offsets = [0, 8], sizes = [8, 8], strides = [1, 1]} : vector<8x32xf32> to vector<8x8xf32>
    %155 = vector.extract_strided_slice %127 {offsets = [0, 8], sizes = [8, 8], strides = [1, 1]} : vector<8x32xf32> to vector<8x8xf32>
    %cst_67 = arith.constant dense<0.000000e+00> : vector<8x8xf32>
    %156 = tpu.matmul %154, %155, %cst_67 {dimension_numbers = #tpu.dot_dimension_numbers<[1], [1], [0], [0], [0, 0, 1, 0], [], []>} : vector<8x8xf32>, vector<8x8xf32>, vector<8x8xf32> -> vector<8x8xf32>
    %157 = arith.addf %156, %131 : vector<8x8xf32>
    %cst_68 = arith.constant dense<0xFF800000> : vector<8xf32>
    %158 = vector.multi_reduction <maximumf>, %157, %cst_68 [1] : vector<8x8xf32> to vector<8xf32>
    %159 = vector.shape_cast %158 : vector<8xf32> to vector<8x1xf32>
    %160 = vector.broadcast %159 : vector<8x1xf32> to vector<8x8xf32>
    %161 = arith.subf %157, %160 : vector<8x8xf32>
    %162 = math.exp %161 : vector<8x8xf32>
    %cst_69 = arith.constant dense<0.000000e+00> : vector<8xf32>
    %163 = vector.multi_reduction <add>, %162, %cst_69 [1] : vector<8x8xf32> to vector<8xf32>
    %164 = vector.shape_cast %163 : vector<8xf32> to vector<8x1xf32>
    %165 = tpu.reciprocal %164 {approx = true} : vector<8x1xf32> -> vector<8x1xf32>
    %166 = vector.broadcast %165 : vector<8x1xf32> to vector<8x8xf32>
    %167 = arith.mulf %162, %166 : vector<8x8xf32>
    %168 = vector.extract_strided_slice %128 {offsets = [0, 8], sizes = [8, 8], strides = [1, 1]} : vector<8x32xf32> to vector<8x8xf32>
    %cst_70 = arith.constant dense<0.000000e+00> : vector<8x8xf32>
    %169 = tpu.matmul %167, %168, %cst_70 {dimension_numbers = #tpu.dot_dimension_numbers<[1], [0], [0], [1], [0, 0, 1, 1], [], []>} : vector<8x8xf32>, vector<8x8xf32>, vector<8x8xf32> -> vector<8x8xf32>
    %170 = vector.extract_strided_slice %129 {offsets = [8, 0], sizes = [8, 32], strides = [1, 1]} : vector<32x32xf32> to vector<8x32xf32>
    %cst_71 = arith.constant dense<0.000000e+00> : vector<8x32xf32>
    %171 = tpu.matmul %169, %170, %cst_71 {dimension_numbers = #tpu.dot_dimension_numbers<[1], [0], [0], [1], [0, 0, 1, 1], [], []>} : vector<8x8xf32>, vector<8x32xf32>, vector<8x32xf32> -> vector<8x32xf32>
    %172 = arith.addf %153, %171 : vector<8x32xf32>
    %173 = vector.extract_strided_slice %133 {offsets = [0, 16], sizes = [8, 8], strides = [1, 1]} : vector<8x32xf32> to vector<8x8xf32>
    %174 = vector.extract_strided_slice %127 {offsets = [0, 16], sizes = [8, 8], strides = [1, 1]} : vector<8x32xf32> to vector<8x8xf32>
    %cst_72 = arith.constant dense<0.000000e+00> : vector<8x8xf32>
    %175 = tpu.matmul %173, %174, %cst_72 {dimension_numbers = #tpu.dot_dimension_numbers<[1], [1], [0], [0], [0, 0, 1, 0], [], []>} : vector<8x8xf32>, vector<8x8xf32>, vector<8x8xf32> -> vector<8x8xf32>
    %176 = arith.addf %175, %131 : vector<8x8xf32>
    %cst_73 = arith.constant dense<0xFF800000> : vector<8xf32>
    %177 = vector.multi_reduction <maximumf>, %176, %cst_73 [1] : vector<8x8xf32> to vector<8xf32>
    %178 = vector.shape_cast %177 : vector<8xf32> to vector<8x1xf32>
    %179 = vector.broadcast %178 : vector<8x1xf32> to vector<8x8xf32>
    %180 = arith.subf %176, %179 : vector<8x8xf32>
    %181 = math.exp %180 : vector<8x8xf32>
    %cst_74 = arith.constant dense<0.000000e+00> : vector<8xf32>
    %182 = vector.multi_reduction <add>, %181, %cst_74 [1] : vector<8x8xf32> to vector<8xf32>
    %183 = vector.shape_cast %182 : vector<8xf32> to vector<8x1xf32>
    %184 = tpu.reciprocal %183 {approx = true} : vector<8x1xf32> -> vector<8x1xf32>
    %185 = vector.broadcast %184 : vector<8x1xf32> to vector<8x8xf32>
    %186 = arith.mulf %181, %185 : vector<8x8xf32>
    %187 = vector.extract_strided_slice %128 {offsets = [0, 16], sizes = [8, 8], strides = [1, 1]} : vector<8x32xf32> to vector<8x8xf32>
    %cst_75 = arith.constant dense<0.000000e+00> : vector<8x8xf32>
    %188 = tpu.matmul %186, %187, %cst_75 {dimension_numbers = #tpu.dot_dimension_numbers<[1], [0], [0], [1], [0, 0, 1, 1], [], []>} : vector<8x8xf32>, vector<8x8xf32>, vector<8x8xf32> -> vector<8x8xf32>
    %189 = vector.extract_strided_slice %129 {offsets = [16, 0], sizes = [8, 32], strides = [1, 1]} : vector<32x32xf32> to vector<8x32xf32>
    %cst_76 = arith.constant dense<0.000000e+00> : vector<8x32xf32>
    %190 = tpu.matmul %188, %189, %cst_76 {dimension_numbers = #tpu.dot_dimension_numbers<[1], [0], [0], [1], [0, 0, 1, 1], [], []>} : vector<8x8xf32>, vector<8x32xf32>, vector<8x32xf32> -> vector<8x32xf32>
    %191 = arith.addf %172, %190 : vector<8x32xf32>
    %192 = vector.extract_strided_slice %133 {offsets = [0, 24], sizes = [8, 8], strides = [1, 1]} : vector<8x32xf32> to vector<8x8xf32>
    %193 = vector.extract_strided_slice %127 {offsets = [0, 24], sizes = [8, 8], strides = [1, 1]} : vector<8x32xf32> to vector<8x8xf32>
    %cst_77 = arith.constant dense<0.000000e+00> : vector<8x8xf32>
    %194 = tpu.matmul %192, %193, %cst_77 {dimension_numbers = #tpu.dot_dimension_numbers<[1], [1], [0], [0], [0, 0, 1, 0], [], []>} : vector<8x8xf32>, vector<8x8xf32>, vector<8x8xf32> -> vector<8x8xf32>
    %195 = arith.addf %194, %131 : vector<8x8xf32>
    %cst_78 = arith.constant dense<0xFF800000> : vector<8xf32>
    %196 = vector.multi_reduction <maximumf>, %195, %cst_78 [1] : vector<8x8xf32> to vector<8xf32>
    %197 = vector.shape_cast %196 : vector<8xf32> to vector<8x1xf32>
    %198 = vector.broadcast %197 : vector<8x1xf32> to vector<8x8xf32>
    %199 = arith.subf %195, %198 : vector<8x8xf32>
    %200 = math.exp %199 : vector<8x8xf32>
    %cst_79 = arith.constant dense<0.000000e+00> : vector<8xf32>
    %201 = vector.multi_reduction <add>, %200, %cst_79 [1] : vector<8x8xf32> to vector<8xf32>
    %202 = vector.shape_cast %201 : vector<8xf32> to vector<8x1xf32>
    %203 = tpu.reciprocal %202 {approx = true} : vector<8x1xf32> -> vector<8x1xf32>
    %204 = vector.broadcast %203 : vector<8x1xf32> to vector<8x8xf32>
    %205 = arith.mulf %200, %204 : vector<8x8xf32>
    %206 = vector.extract_strided_slice %128 {offsets = [0, 24], sizes = [8, 8], strides = [1, 1]} : vector<8x32xf32> to vector<8x8xf32>
    %cst_80 = arith.constant dense<0.000000e+00> : vector<8x8xf32>
    %207 = tpu.matmul %205, %206, %cst_80 {dimension_numbers = #tpu.dot_dimension_numbers<[1], [0], [0], [1], [0, 0, 1, 1], [], []>} : vector<8x8xf32>, vector<8x8xf32>, vector<8x8xf32> -> vector<8x8xf32>
    %208 = vector.extract_strided_slice %129 {offsets = [24, 0], sizes = [8, 32], strides = [1, 1]} : vector<32x32xf32> to vector<8x32xf32>
    %cst_81 = arith.constant dense<0.000000e+00> : vector<8x32xf32>
    %209 = tpu.matmul %207, %208, %cst_81 {dimension_numbers = #tpu.dot_dimension_numbers<[1], [0], [0], [1], [0, 0, 1, 1], [], []>} : vector<8x8xf32>, vector<8x32xf32>, vector<8x32xf32> -> vector<8x32xf32>
    %210 = arith.addf %191, %209 : vector<8x32xf32>
    %211 = arith.addf %116, %210 : vector<8x32xf32>
    %c0_82 = arith.constant 0 : index
    %c0_83 = arith.constant 0 : index
    %212 = vector.load %arg19[%c0_82, %c0_83] : memref<1x32xf32, #tpu.memory_space<vmem>>, vector<1x32xf32>
    %c0_84 = arith.constant 0 : index
    %c0_85 = arith.constant 0 : index
    %213 = vector.load %arg20[%c0_84, %c0_85] : memref<1x32xf32, #tpu.memory_space<vmem>>, vector<1x32xf32>
    %cst_86 = arith.constant dense<0.000000e+00> : vector<8xf32>
    %214 = vector.multi_reduction <add>, %211, %cst_86 [1] : vector<8x32xf32> to vector<8xf32>
    %215 = vector.shape_cast %214 : vector<8xf32> to vector<8x1xf32>
    %cst_87 = arith.constant 3.200000e+01 : f32
    %216 = vector.broadcast %cst_87 : f32 to vector<8x1xf32>
    %217 = arith.divf %215, %216 : vector<8x1xf32>
    %218 = vector.broadcast %217 : vector<8x1xf32> to vector<8x32xf32>
    %219 = arith.subf %211, %218 : vector<8x32xf32>
    %220 = arith.mulf %219, %219 : vector<8x32xf32>
    %cst_88 = arith.constant dense<0.000000e+00> : vector<8xf32>
    %221 = vector.multi_reduction <add>, %220, %cst_88 [1] : vector<8x32xf32> to vector<8xf32>
    %222 = vector.shape_cast %221 : vector<8xf32> to vector<8x1xf32>
    %cst_89 = arith.constant 3.200000e+01 : f32
    %223 = vector.broadcast %cst_89 : f32 to vector<8x1xf32>
    %224 = arith.divf %222, %223 : vector<8x1xf32>
    %cst_90 = arith.constant 9.99999974E-6 : f32
    %225 = vector.broadcast %cst_90 : f32 to vector<8x1xf32>
    %226 = arith.addf %224, %225 : vector<8x1xf32>
    %227 = math.rsqrt %226 : vector<8x1xf32>
    %228 = vector.broadcast %227 : vector<8x1xf32> to vector<8x32xf32>
    %229 = arith.mulf %219, %228 : vector<8x32xf32>
    %230 = vector.broadcast %212 : vector<1x32xf32> to vector<8x32xf32>
    %231 = arith.mulf %229, %230 : vector<8x32xf32>
    %232 = vector.broadcast %213 : vector<1x32xf32> to vector<8x32xf32>
    %233 = arith.addf %231, %232 : vector<8x32xf32>
    %c0_91 = arith.constant 0 : index
    %c0_92 = arith.constant 0 : index
    %234 = vector.load %arg13[%c0_91, %c0_92] : memref<32x64xf32, #tpu.memory_space<vmem>>, vector<32x64xf32>
    %cst_93 = arith.constant dense<0.000000e+00> : vector<8x64xf32>
    %235 = tpu.matmul %233, %234, %cst_93 {dimension_numbers = #tpu.dot_dimension_numbers<[1], [0], [0], [1], [0, 0, 1, 1], [], []>} : vector<8x32xf32>, vector<32x64xf32>, vector<8x64xf32> -> vector<8x64xf32>
    %c0_94 = arith.constant 0 : index
    %c0_95 = arith.constant 0 : index
    %236 = vector.load %arg14[%c0_94, %c0_95] : memref<1x64xf32, #tpu.memory_space<vmem>>, vector<1x64xf32>
    %237 = vector.broadcast %236 : vector<1x64xf32> to vector<8x64xf32>
    %238 = arith.addf %235, %237 : vector<8x64xf32>
    %cst_96 = arith.constant 0.000000e+00 : f32
    %239 = vector.broadcast %cst_96 : f32 to vector<8x64xf32>
    %240 = arith.maximumf %238, %239 : vector<8x64xf32>
    %c0_97 = arith.constant 0 : index
    %c0_98 = arith.constant 0 : index
    %241 = vector.load %arg15[%c0_97, %c0_98] : memref<64x32xf32, #tpu.memory_space<vmem>>, vector<64x32xf32>
    %cst_99 = arith.constant dense<0.000000e+00> : vector<8x32xf32>
    %242 = tpu.matmul %240, %241, %cst_99 {dimension_numbers = #tpu.dot_dimension_numbers<[1], [0], [0], [1], [0, 0, 1, 1], [], []>} : vector<8x64xf32>, vector<64x32xf32>, vector<8x32xf32> -> vector<8x32xf32>
    %c0_100 = arith.constant 0 : index
    %c0_101 = arith.constant 0 : index
    %243 = vector.load %arg16[%c0_100, %c0_101] : memref<1x32xf32, #tpu.memory_space<vmem>>, vector<1x32xf32>
    %244 = vector.broadcast %243 : vector<1x32xf32> to vector<8x32xf32>
    %245 = arith.addf %242, %244 : vector<8x32xf32>
    %246 = arith.addf %233, %245 : vector<8x32xf32>
    %c0_102 = arith.constant 0 : index
    %c0_103 = arith.constant 0 : index
    %247 = vector.load %arg21[%c0_102, %c0_103] : memref<1x32xf32, #tpu.memory_space<vmem>>, vector<1x32xf32>
    %c0_104 = arith.constant 0 : index
    %c0_105 = arith.constant 0 : index
    %248 = vector.load %arg22[%c0_104, %c0_105] : memref<1x32xf32, #tpu.memory_space<vmem>>, vector<1x32xf32>
    %cst_106 = arith.constant dense<0.000000e+00> : vector<8xf32>
    %249 = vector.multi_reduction <add>, %246, %cst_106 [1] : vector<8x32xf32> to vector<8xf32>
    %250 = vector.shape_cast %249 : vector<8xf32> to vector<8x1xf32>
    %cst_107 = arith.constant 3.200000e+01 : f32
    %251 = vector.broadcast %cst_107 : f32 to vector<8x1xf32>
    %252 = arith.divf %250, %251 : vector<8x1xf32>
    %253 = vector.broadcast %252 : vector<8x1xf32> to vector<8x32xf32>
    %254 = arith.subf %246, %253 : vector<8x32xf32>
    %255 = arith.mulf %254, %254 : vector<8x32xf32>
    %cst_108 = arith.constant dense<0.000000e+00> : vector<8xf32>
    %256 = vector.multi_reduction <add>, %255, %cst_108 [1] : vector<8x32xf32> to vector<8xf32>
    %257 = vector.shape_cast %256 : vector<8xf32> to vector<8x1xf32>
    %cst_109 = arith.constant 3.200000e+01 : f32
    %258 = vector.broadcast %cst_109 : f32 to vector<8x1xf32>
    %259 = arith.divf %257, %258 : vector<8x1xf32>
    %cst_110 = arith.constant 9.99999974E-6 : f32
    %260 = vector.broadcast %cst_110 : f32 to vector<8x1xf32>
    %261 = arith.addf %259, %260 : vector<8x1xf32>
    %262 = math.rsqrt %261 : vector<8x1xf32>
    %263 = vector.broadcast %262 : vector<8x1xf32> to vector<8x32xf32>
    %264 = arith.mulf %254, %263 : vector<8x32xf32>
    %265 = vector.broadcast %247 : vector<1x32xf32> to vector<8x32xf32>
    %266 = arith.mulf %264, %265 : vector<8x32xf32>
    %267 = vector.broadcast %248 : vector<1x32xf32> to vector<8x32xf32>
    %268 = arith.addf %266, %267 : vector<8x32xf32>
    %c0_111 = arith.constant 0 : index
    %c0_112 = arith.constant 0 : index
    %c0_113 = arith.constant 0 : index
    %269 = vector.load %arg25[%c0_111, %c0_112, %c0_113] : memref<1x8x32xf32, #tpu.memory_space<vmem>>, vector<1x8x32xf32>
    %270 = vector.shape_cast %269 : vector<1x8x32xf32> to vector<8x32xf32>
    %271 = vector.shape_cast %268 : vector<8x32xf32> to vector<1x8x32xf32>
    tpu.vector_store %arg25[%c0_111, %c0_112, %c0_113], %271 {strides = array<i32>} : memref<1x8x32xf32, #tpu.memory_space<vmem>>, vector<1x8x32xf32>,
    return
  }
  func.func @transform_0(%arg0: i32) -> (i32, i32, i32) {
    %c0_i32 = arith.constant 0 : i32
    %c0_i32_0 = arith.constant 0 : i32
    %c0_i32_1 = arith.constant 0 : i32
    return %arg0, %c0_i32, %c0_i32_0 : i32, i32, i32
  }
  func.func @transform_1(%arg0: i32) -> (i32, i32, i32) {
    %c0_i32 = arith.constant 0 : i32
    %c0_i32_0 = arith.constant 0 : i32
    %c0_i32_1 = arith.constant 0 : i32
    return %arg0, %c0_i32, %c0_i32_0 : i32, i32, i32
  }
  func.func @transform_2(%arg0: i32) -> (i32, i32) {
    %c0_i32 = arith.constant 0 : i32
    %c0_i32_0 = arith.constant 0 : i32
    %c0_i32_1 = arith.constant 0 : i32
    return %c0_i32, %c0_i32_0 : i32, i32
  }
  func.func @transform_3(%arg0: i32) -> (i32, i32) {
    %c0_i32 = arith.constant 0 : i32
    %c0_i32_0 = arith.constant 0 : i32
    %c0_i32_1 = arith.constant 0 : i32
    return %c0_i32, %c0_i32_0 : i32, i32
  }
  func.func @transform_4(%arg0: i32) -> (i32, i32) {
    %c0_i32 = arith.constant 0 : i32
    %c0_i32_0 = arith.constant 0 : i32
    %c0_i32_1 = arith.constant 0 : i32
    return %c0_i32, %c0_i32_0 : i32, i32
  }
  func.func @transform_5(%arg0: i32) -> (i32, i32) {
    %c0_i32 = arith.constant 0 : i32
    %c0_i32_0 = arith.constant 0 : i32
    %c0_i32_1 = arith.constant 0 : i32
    return %c0_i32, %c0_i32_0 : i32, i32
  }
  func.func @transform_6(%arg0: i32) -> (i32, i32) {
    %c0_i32 = arith.constant 0 : i32
    %c0_i32_0 = arith.constant 0 : i32
    %c0_i32_1 = arith.constant 0 : i32
    return %c0_i32, %c0_i32_0 : i32, i32
  }
  func.func @transform_7(%arg0: i32) -> (i32, i32) {
    %c0_i32 = arith.constant 0 : i32
    %c0_i32_0 = arith.constant 0 : i32
    %c0_i32_1 = arith.constant 0 : i32
    return %c0_i32, %c0_i32_0 : i32, i32
  }
  func.func @transform_8(%arg0: i32) -> (i32, i32) {
    %c0_i32 = arith.constant 0 : i32
    %c0_i32_0 = arith.constant 0 : i32
    %c0_i32_1 = arith.constant 0 : i32
    return %c0_i32, %c0_i32_0 : i32, i32
  }
  func.func @transform_9(%arg0: i32) -> (i32, i32) {
    %c0_i32 = arith.constant 0 : i32
    %c0_i32_0 = arith.constant 0 : i32
    %c0_i32_1 = arith.constant 0 : i32
    return %c0_i32, %c0_i32_0 : i32, i32
  }
  func.func @transform_10(%arg0: i32) -> (i32, i32) {
    %c0_i32 = arith.constant 0 : i32
    %c0_i32_0 = arith.constant 0 : i32
    %c0_i32_1 = arith.constant 0 : i32
    return %c0_i32, %c0_i32_0 : i32, i32
  }
  func.func @transform_11(%arg0: i32) -> (i32, i32) {
    %c0_i32 = arith.constant 0 : i32
    %c0_i32_0 = arith.constant 0 : i32
    %c0_i32_1 = arith.constant 0 : i32
    return %c0_i32, %c0_i32_0 : i32, i32
  }
  func.func @transform_12(%arg0: i32) -> (i32, i32) {
    %c0_i32 = arith.constant 0 : i32
    %c0_i32_0 = arith.constant 0 : i32
    %c0_i32_1 = arith.constant 0 : i32
    return %c0_i32, %c0_i32_0 : i32, i32
  }
  func.func @transform_13(%arg0: i32) -> (i32, i32) {
    %c0_i32 = arith.constant 0 : i32
    %c0_i32_0 = arith.constant 0 : i32
    %c0_i32_1 = arith.constant 0 : i32
    return %c0_i32, %c0_i32_0 : i32, i32
  }
  func.func @transform_14(%arg0: i32) -> (i32, i32) {
    %c0_i32 = arith.constant 0 : i32
    %c0_i32_0 = arith.constant 0 : i32
    %c0_i32_1 = arith.constant 0 : i32
    return %c0_i32, %c0_i32_0 : i32, i32
  }
  func.func @transform_15(%arg0: i32) -> (i32, i32) {
    %c0_i32 = arith.constant 0 : i32
    %c0_i32_0 = arith.constant 0 : i32
    %c0_i32_1 = arith.constant 0 : i32
    return %c0_i32, %c0_i32_0 : i32, i32
  }
  func.func @transform_16(%arg0: i32) -> (i32, i32) {
    %c0_i32 = arith.constant 0 : i32
    %c0_i32_0 = arith.constant 0 : i32
    %c0_i32_1 = arith.constant 0 : i32
    return %c0_i32, %c0_i32_0 : i32, i32
  }
  func.func @transform_17(%arg0: i32) -> (i32, i32) {
    %c0_i32 = arith.constant 0 : i32
    %c0_i32_0 = arith.constant 0 : i32
    %c0_i32_1 = arith.constant 0 : i32
    return %c0_i32, %c0_i32_0 : i32, i32
  }
  func.func @transform_18(%arg0: i32) -> (i32, i32) {
    %c0_i32 = arith.constant 0 : i32
    %c0_i32_0 = arith.constant 0 : i32
    %c0_i32_1 = arith.constant 0 : i32
    return %c0_i32, %c0_i32_0 : i32, i32
  }
  func.func @transform_19(%arg0: i32) -> (i32, i32) {
    %c0_i32 = arith.constant 0 : i32
    %c0_i32_0 = arith.constant 0 : i32
    %c0_i32_1 = arith.constant 0 : i32
    return %c0_i32, %c0_i32_0 : i32, i32
  }
  func.func @transform_20(%arg0: i32) -> (i32, i32) {
    %c0_i32 = arith.constant 0 : i32
    %c0_i32_0 = arith.constant 0 : i32
    %c0_i32_1 = arith.constant 0 : i32
    return %c0_i32, %c0_i32_0 : i32, i32
  }
  func.func @transform_21(%arg0: i32) -> (i32, i32) {
    %c0_i32 = arith.constant 0 : i32
    %c0_i32_0 = arith.constant 0 : i32
    %c0_i32_1 = arith.constant 0 : i32
    return %c0_i32, %c0_i32_0 : i32, i32
  }
  func.func @transform_22(%arg0: i32) -> (i32, i32) {
    %c0_i32 = arith.constant 0 : i32
    %c0_i32_0 = arith.constant 0 : i32
    %c0_i32_1 = arith.constant 0 : i32
    return %c0_i32, %c0_i32_0 : i32, i32
  }
  func.func @transform_23(%arg0: i32) -> (i32, i32) {
    %c0_i32 = arith.constant 0 : i32
    %c0_i32_0 = arith.constant 0 : i32
    %c0_i32_1 = arith.constant 0 : i32
    return %c0_i32, %c0_i32_0 : i32, i32
  }
  func.func @transform_24(%arg0: i32) -> (i32, i32, i32) {
    %c0_i32 = arith.constant 0 : i32
    %c0_i32_0 = arith.constant 0 : i32
    %c0_i32_1 = arith.constant 0 : i32
    return %arg0, %c0_i32, %c0_i32_0 : i32, i32, i32
  }
}

module attributes {stable_mosaic.version = 11 : i64} {
  func.func @_norm_proj_kernel(%arg0: i32, %arg1: memref<1x8x32xf32, #tpu.memory_space<vmem>>, %arg2: memref<1x32xf32, #tpu.memory_space<vmem>>, %arg3: memref<1x32xf32, #tpu.memory_space<vmem>>, %arg4: memref<32x4xf32, #tpu.memory_space<vmem>>, %arg5: memref<1x4xf32, #tpu.memory_space<vmem>>, %arg6: memref<1x8x4xf32, #tpu.memory_space<vmem>>) attributes {dimension_semantics = [#tpu.dimension_semantics<parallel>], iteration_bounds = array<i64: 2>, scalar_prefetch = 0 : i64, scratch_operands = 0 : i64, tpu.core_type = #tpu.core_type<tc>, window_params = [{transform_indices = @transform_0, window_bounds = array<i64: 1, 8, 32>}, {pipeline_mode = #tpu.pipeline_mode<synchronous>, transform_indices = @transform_1, window_bounds = array<i64: 1, 32>}, {pipeline_mode = #tpu.pipeline_mode<synchronous>, transform_indices = @transform_2, window_bounds = array<i64: 1, 32>}, {pipeline_mode = #tpu.pipeline_mode<synchronous>, transform_indices = @transform_3, window_bounds = array<i64: 32, 4>}, {pipeline_mode = #tpu.pipeline_mode<synchronous>, transform_indices = @transform_4, window_bounds = array<i64: 1, 4>}, {transform_indices = @transform_5, window_bounds = array<i64: 1, 8, 4>}]} {
    %c0 = arith.constant 0 : index
    %c0_0 = arith.constant 0 : index
    %c0_1 = arith.constant 0 : index
    %0 = vector.load %arg1[%c0, %c0_0, %c0_1] : memref<1x8x32xf32, #tpu.memory_space<vmem>>, vector<1x8x32xf32>
    %1 = vector.shape_cast %0 : vector<1x8x32xf32> to vector<8x32xf32>
    %c0_2 = arith.constant 0 : index
    %c0_3 = arith.constant 0 : index
    %2 = vector.load %arg2[%c0_2, %c0_3] : memref<1x32xf32, #tpu.memory_space<vmem>>, vector<1x32xf32>
    %c0_4 = arith.constant 0 : index
    %c0_5 = arith.constant 0 : index
    %3 = vector.load %arg3[%c0_4, %c0_5] : memref<1x32xf32, #tpu.memory_space<vmem>>, vector<1x32xf32>
    %cst = arith.constant dense<0.000000e+00> : vector<8xf32>
    %4 = vector.multi_reduction <add>, %1, %cst [1] : vector<8x32xf32> to vector<8xf32>
    %5 = vector.shape_cast %4 : vector<8xf32> to vector<8x1xf32>
    %cst_6 = arith.constant 3.200000e+01 : f32
    %6 = vector.broadcast %cst_6 : f32 to vector<8x1xf32>
    %7 = arith.divf %5, %6 : vector<8x1xf32>
    %8 = vector.broadcast %7 : vector<8x1xf32> to vector<8x32xf32>
    %9 = arith.subf %1, %8 : vector<8x32xf32>
    %10 = arith.mulf %9, %9 : vector<8x32xf32>
    %cst_7 = arith.constant dense<0.000000e+00> : vector<8xf32>
    %11 = vector.multi_reduction <add>, %10, %cst_7 [1] : vector<8x32xf32> to vector<8xf32>
    %12 = vector.shape_cast %11 : vector<8xf32> to vector<8x1xf32>
    %cst_8 = arith.constant 3.200000e+01 : f32
    %13 = vector.broadcast %cst_8 : f32 to vector<8x1xf32>
    %14 = arith.divf %12, %13 : vector<8x1xf32>
    %cst_9 = arith.constant 9.99999974E-6 : f32
    %15 = vector.broadcast %cst_9 : f32 to vector<8x1xf32>
    %16 = arith.addf %14, %15 : vector<8x1xf32>
    %17 = math.rsqrt %16 : vector<8x1xf32>
    %18 = vector.broadcast %17 : vector<8x1xf32> to vector<8x32xf32>
    %19 = arith.mulf %9, %18 : vector<8x32xf32>
    %20 = vector.broadcast %2 : vector<1x32xf32> to vector<8x32xf32>
    %21 = arith.mulf %19, %20 : vector<8x32xf32>
    %22 = vector.broadcast %3 : vector<1x32xf32> to vector<8x32xf32>
    %23 = arith.addf %21, %22 : vector<8x32xf32>
    %c0_10 = arith.constant 0 : index
    %c0_11 = arith.constant 0 : index
    %24 = vector.load %arg4[%c0_10, %c0_11] : memref<32x4xf32, #tpu.memory_space<vmem>>, vector<32x4xf32>
    %cst_12 = arith.constant dense<0.000000e+00> : vector<8x4xf32>
    %25 = tpu.matmul %23, %24, %cst_12 {dimension_numbers = #tpu.dot_dimension_numbers<[1], [0], [0], [1], [0, 0, 1, 1], [], []>} : vector<8x32xf32>, vector<32x4xf32>, vector<8x4xf32> -> vector<8x4xf32>
    %c0_13 = arith.constant 0 : index
    %c0_14 = arith.constant 0 : index
    %26 = vector.load %arg5[%c0_13, %c0_14] : memref<1x4xf32, #tpu.memory_space<vmem>>, vector<1x4xf32>
    %27 = vector.broadcast %26 : vector<1x4xf32> to vector<8x4xf32>
    %28 = arith.addf %25, %27 : vector<8x4xf32>
    %c0_15 = arith.constant 0 : index
    %c0_16 = arith.constant 0 : index
    %c0_17 = arith.constant 0 : index
    %29 = vector.load %arg6[%c0_15, %c0_16, %c0_17] : memref<1x8x4xf32, #tpu.memory_space<vmem>>, vector<1x8x4xf32>
    %30 = vector.shape_cast %29 : vector<1x8x4xf32> to vector<8x4xf32>
    %31 = vector.shape_cast %28 : vector<8x4xf32> to vector<1x8x4xf32>
    tpu.vector_store %arg6[%c0_15, %c0_16, %c0_17], %31 {strides = array<i32>} : memref<1x8x4xf32, #tpu.memory_space<vmem>>, vector<1x8x4xf32>,
    return
  }
  func.func @transform_0(%arg0: i32) -> (i32, i32, i32) {
    %c0_i32 = arith.constant 0 : i32
    %c0_i32_0 = arith.constant 0 : i32
    %c0_i32_1 = arith.constant 0 : i32
    return %arg0, %c0_i32, %c0_i32_0 : i32, i32, i32
  }
  func.func @transform_1(%arg0: i32) -> (i32, i32) {
    %c0_i32 = arith.constant 0 : i32
    %c0_i32_0 = arith.constant 0 : i32
    %c0_i32_1 = arith.constant 0 : i32
    return %c0_i32, %c0_i32_0 : i32, i32
  }
  func.func @transform_2(%arg0: i32) -> (i32, i32) {
    %c0_i32 = arith.constant 0 : i32
    %c0_i32_0 = arith.constant 0 : i32
    %c0_i32_1 = arith.constant 0 : i32
    return %c0_i32, %c0_i32_0 : i32, i32
  }
  func.func @transform_3(%arg0: i32) -> (i32, i32) {
    %c0_i32 = arith.constant 0 : i32
    %c0_i32_0 = arith.constant 0 : i32
    %c0_i32_1 = arith.constant 0 : i32
    return %c0_i32, %c0_i32_0 : i32, i32
  }
  func.func @transform_4(%arg0: i32) -> (i32, i32) {
    %c0_i32 = arith.constant 0 : i32
    %c0_i32_0 = arith.constant 0 : i32
    %c0_i32_1 = arith.constant 0 : i32
    return %c0_i32, %c0_i32_0 : i32, i32
  }
  func.func @transform_5(%arg0: i32) -> (i32, i32, i32) {
    %c0_i32 = arith.constant 0 : i32
    %c0_i32_0 = arith.constant 0 : i32
    %c0_i32_1 = arith.constant 0 : i32
    return %arg0, %c0_i32, %c0_i32_0 : i32, i32, i32
  }
}

</mosaic_0001>

<bundles_post_ra>
// kernel: model_forward.10
= control target key start
LH: loop header
LB: loop body
LE: loop exit
PB: predicated region body
PF: predicated region fallthrough
CT: control target
= control target key end

     0   :  { %s301_s12 = smov 0   ;;  %s327_s0 = inlined_call_operand.vmem [shape: f32[2,8,32], index: 0, kind: input, shape index: {}]   ;;  %s328_s1 = inlined_call_operand.vmem [shape: f32[1,32], index: 1, kind: input, shape index: {}]   ;;  %s329_s2 = inlined_call_operand.vmem [shape: f32[1,32], index: 2, kind: input, shape index: {}]   ;;  %s330_s3 = inlined_call_operand.vmem [shape: f32[2,8,32], index: 3, kind: output, shape index: {}]  }
   0x1 LB: > { %s252_s13 = sadd.s32 4294967295, %s279_s12   ;;  %p256_p0 = scmp.ge.s32.totalorder %s279_s12, 1  ;;  %s279_s12 = sphi %s301_s12, %s13_s12  }
   0x2   : > { %p136_p1 = scmp.lt.s32.totalorder %s279_s12, 3 }
   0x4   : > { %p137_p2 = pnand %p256_p0, %p136_p1 }
   0x5   : > { %p158_p3 = scmp.lt.s32.totalorder (!%p137_p2), %s252_s13, 1 }
   0x6   : > { %140 = sbr.rel (%p137_p2) target bundleno = 324 (0x144), region = 32 }
   0xb   : > { %s332_s13 = smov (!%p158_p3, %s252_s13), 1  ;;  %vm169_vm0 = vcmask 261120   ;;  %v259_v11 = vld [vmem:[%s328_s1] ss:$0 sm:$0xff] }
   0xc   : > { %s257_s14 = sshll.u32 %s332_s13, 3  ;;  %v260_v13 = vld [vmem:[%s329_s2] ss:$0 sm:$0xff] }
   0xd   : > { %s161_s17 = scalar_lea.vmem %s327_s0, %s257_s14  ;;  %s165_s24 = scalar_lea.vmem %s330_s3, %s257_s14 }
   0xe   : > { %v166_v0 = vld [vmem:[%s161_s17] sm:$0xff] }
   0xf   : > { %v170_v1 = vsel %vm169_vm0, %v166_v0, 0.0 }
  0x10   : > { %171 = vadd.xlane.f32.xlu0 %v170_v1 }
  0x99   : > { %v172_v2 = vpop.xlane.xlu0 %171 }
  0x9a   : > { %v174_v3 = vmul.f32 0.03125, %v172_v2 }
  0x9c   : > { %v175_v4 = vsub.f32 %v166_v0, %v174_v3 }
  0x9e   : > { %v176_v5 = vmul.f32 %v175_v4, %v175_v4 }
  0xa0   : > { %v177_v6 = vsel %vm169_vm0, %v176_v5, 0.0 }
  0xa1   : > { %178 = vadd.xlane.f32.xlu0 %v177_v6 }
 0x12a   : > { %v179_v7 = vpop.xlane.xlu0 %178 }
 0x12b   : > { %v180_v8 = vmul.f32 0.03125, %v179_v7 }
 0x12d   : > { %v181_v9 = vadd.f32 1e-05, %v180_v8 }
 0x12f   : > { %271 = vrsqrt.f32 %v181_v9 }
 0x13c   : > { %v272_v10 = vpop.eup %271 }
 0x13d   : > { %v183_v12 = vmul.f32 %v272_v10, %v175_v4 }
 0x13f   : > { %v190_v14 = vmul.f32 %v259_v11, %v183_v12 }
 0x141   : > { %v197_v15 = vadd.f32 %v260_v13, %v190_v14 }
 0x143   : > { %198 = vst.msk [vmem:[%s165_s24] sm:$0xff] %vm169_vm0, %v197_v15 }
 0x144 PF: > { %s13_s12 = sadd.s32 1, %s279_s12  }
 0x145   : > { %p10_p4 = scmp.ge.s32.totalorder %s13_s12, 4  }
 0x147   :  { %12 = sbr.rel (!%p10_p4) target bundleno = 1 (0x1), region = 62 }

// kernel: model_forward.11
= control target key start
LH: loop header
LB: loop body
LE: loop exit
PB: predicated region body
PF: predicated region fallthrough
CT: control target
= control target key end

     0   :  { %s1009_s30 = smov 0   ;;  %s1069_s0 = inlined_call_operand.vmem [shape: f32[2,8,4], index: 0, kind: input, shape index: {}]   ;;  %s1070_s1 = inlined_call_operand.vmem [shape: f32[2,8,4], index: 1, kind: input, shape index: {}]   ;;  %s1071_s2 = inlined_call_operand.vmem [shape: f32[4,32], index: 2, kind: input, shape index: {}]   ;;  %s1072_s3 = inlined_call_operand.vmem [shape: f32[4,32], index: 3, kind: input, shape index: {}]   ;;  %s1073_s4 = inlined_call_operand.vmem [shape: f32[4,32], index: 4, kind: input, shape index: {}]   ;;  %s1074_s5 = inlined_call_operand.vmem [shape: f32[4,32], index: 5, kind: input, shape index: {}]   ;;  %s1075_s6 = inlined_call_operand.vmem [shape: f32[8,32], index: 6, kind: input, shape index: {}]   ;;  %s1076_s7 = inlined_call_operand.vmem [shape: f32[8,8], index: 7, kind: input, shape index: {}]   ;;  %s1077_s8 = inlined_call_operand.vmem [shape: f32[8,8], index: 8, kind: input, shape index: {}]   ;;  %s1078_s9 = inlined_call_operand.vmem [shape: f32[2,8,32], index: 9, kind: output, shape index: {}]  }
   0x1 LB: > { %s877_s10 = sadd.s32 4294967295, %s955_s30   ;;  %p881_p0 = scmp.ge.s32.totalorder %s955_s30, 1  ;;  %s955_s30 = sphi %s1009_s30, %s19_s30  }
   0x2   : > { %p295_p1 = scmp.lt.s32.totalorder %s955_s30, 3 }
   0x4   : > { %p296_p2 = pnand %p881_p0, %p295_p1 }
   0x5   : > { %p333_p3 = scmp.lt.s32.totalorder (!%p296_p2), %s877_s10, 1 }
   0x6   : > { %299 = sbr.rel (%p296_p2) target bundleno = 411 (0x19b), region = 56 }
   0xb   : > { %v957_v0 = vmov 0.0   ;;  %s1080_s10 = smov (!%p333_p3, %s877_s10), 1  ;;  %vm958_vm0 = vmmov 0   ;;  %v347_v1 = vld [vmem:[%s1076_s7] sm:$0xff]  ;;  %vm348_vm1 = vcmask 64512   ;;  %vm502_vm2 = vcmask 1043456  }
   0xc   : > { %909 = vmatprep.subr.mxu0 %v957_v0  ;;  %914 = vmatprep.subr.mxu1 %v957_v0  ;;  %s1019_s11 = sshll.u32 %s1080_s10, 3  ;;  %v422_v2 = vld [vmem:[%s1077_s8] sm:$0xff]  ;;  %vm498_vm3 = vcmask 31744   ;;  %vm810_vm4 = vcmask 261120  }
   0xd   : > { %911 = vmatprep.mubr.msk.f32.mxu0 %vm958_vm0, %v957_v0  ;;  %916 = vmatprep.mubr.msk.f32.mxu1 %vm958_vm0, %v957_v0  ;;  %s336_s14 = scalar_lea.vmem %s1069_s0, %s1019_s11  ;;  %v497_v4 = vld [vmem:[%s1072_s3] sm:$0xf]  ;;  %s340_s29 = scalar_lea.vmem %s1070_s1, %s1019_s11 }
   0xe   : > { %v345_v3 = vld [vmem:[%s336_s14] sm:$0xff]  ;;  %s344_s15 = scalar_lea.vmem %s1078_s9, %s1019_s11 }
   0xf   : > { %910 = vmatpush3.msra.mxu0 %v345_v3  ;;  %915 = vmatpush3.msra.mxu1 %v345_v3  ;;  %v496_v5 = vld [vmem:[%s1071_s2] sm:$0xf] }
  0x10   : > { %912 = vmatmul.mubr.msk.f32.vlgmr.msra.gmra.mxu0 %vm348_vm1, %v347_v1  ;;  %917 = vmatmul.mubr.msk.f32.vlgmr.msra.gmra.mxu1 %vm348_vm1, %v422_v2  ;;  %v652_v6 = vld [vmem:[%s1073_s4] sm:$0xf] }
  0x11   : > { %919 = vmatprep.subr.mxu0 %v957_v0  ;;  %921 = vmatprep.mubr.msk.f32.mxu0 %vm958_vm0, %v957_v0  ;;  %v730_v7 = vld [vmem:[%s1074_s5] sm:$0xf] }
  0x12   : > { %920 = vmatpush3.msk.msra.mxu0 %vm502_vm2, %v497_v4  ;;  %924 = vmatprep.subr.mxu1 %v957_v0  ;;  %v346_v12 = vld [vmem:[%s340_s29] sm:$0xff] }
  0x13   : > { %925 = vmatpush3.msk.msra.mxu1 %vm502_vm2, %v496_v5  ;;  %929 = vmatprep.subr.mxu0 %v957_v0  ;;  %v808_v22 = vld [vmem:[%s1075_s6] sm:$0xff] }
  0x14   : > { %922 = vmatmul.mubr.msk.f32.vlgmr.msra.gmra.mxu0 %vm498_vm3, %v345_v3  ;;  %926 = vmatprep.mubr.msk.f32.mxu1 %vm958_vm0, %v957_v0 }
  0x15   : > { %930 = vmatpush3.msk.msra.mxu0 %vm502_vm2, %v652_v6  ;;  %931 = vmatprep.mubr.msk.f32.mxu0 %vm958_vm0, %v957_v0 }
  0x16   : > { %934 = vmatprep.subr.mxu1 %v957_v0 }
  0xd0   : > { %v418_v8 = vpop.f32.mrf.mxu0  ;;  %v492_v9 = vpop.f32.mrf.mxu1 }
  0xd1   : > { %927 = vmatmul.mubr.msk.f32.vlgmr.msra.gmra.mxu1 %vm498_vm3, %v418_v8  ;;  %932 = vmatmul.mubr.msk.f32.vlgmr.msra.gmra.mxu0 %vm498_vm3, %v492_v9 }
  0xd2   : > { %935 = vmatpush3.msk.msra.mxu1 %vm502_vm2, %v730_v7  ;;  %v913_v10 = vpop.f32.mrf.mxu0  ;;  %v918_v11 = vpop.f32.mrf.mxu1  ;;  %936 = vmatprep.mubr.msk.f32.mxu1 %vm958_vm0, %v957_v0 }
  0xd4   : > { %v572_v13 = vpop.f32.mrf.mxu0 }
  0xd5   : > { %937 = vmatmul.mubr.msk.f32.vlgmr.msra.gmra.mxu1 %vm498_vm3, %v346_v12 }
  0xd6   : > { %v923_v14 = vpop.f32.mrf.mxu0 }
 0x191   : > { %v648_v15 = vpop.f32.mrf.mxu1  ;;  %v725_v16 = vpop.f32.mrf.mxu0 }
 0x192   : > { %v649_v17 = vadd.f32 %v648_v15, %v572_v13 }
 0x193   : > { %v928_v18 = vpop.f32.mrf.mxu1  ;;  %v933_v19 = vpop.f32.mrf.mxu0 }
 0x194   : > { %v729_v20 = vadd.f32 %v725_v16, %v649_v17 }
 0x195   : > { %v803_v21 = vpop.f32.mrf.mxu1 }
 0x196   : > { %v807_v23 = vadd.f32 %v803_v21, %v729_v20 }
 0x197   : > { %v938_v24 = vpop.f32.mrf.mxu1 }
 0x198   : > { %v809_v25 = vadd.f32 %v808_v22, %v807_v23 }
 0x19a   : > { %811 = vst.msk [vmem:[%s344_s15] sm:$0xff] %vm810_vm4, %v809_v25 }
 0x19b PF: > { %s19_s30 = sadd.s32 1, %s955_s30  }
 0x19c   : > { %p16_p4 = scmp.ge.s32.totalorder %s19_s30, 4  }
 0x19e   :  { %18 = sbr.rel (!%p16_p4) target bundleno = 1 (0x1), region = 89 }

// kernel: model_forward.8
= control target key start
LH: loop header
LB: loop body
LE: loop exit
PB: predicated region body
PF: predicated region fallthrough
CT: control target
= control target key end

     0   :  { %s2125_s29 = smov 0   ;;  %s2352_s0 = inlined_call_operand.vmem [shape: f32[2,8,32], index: 0, kind: input, shape index: {}]   ;;  %s2353_s1 = inlined_call_operand.vmem [shape: f32[32,96], index: 1, kind: input, shape index: {}]   ;;  %s2354_s2 = inlined_call_operand.vmem [shape: f32[1,96], index: 2, kind: input, shape index: {}]   ;;  %s2355_s3 = inlined_call_operand.vmem [shape: f32[32,32], index: 3, kind: input, shape index: {}]   ;;  %s2356_s4 = inlined_call_operand.vmem [shape: f32[1,32], index: 4, kind: input, shape index: {}]   ;;  %s2357_s5 = inlined_call_operand.vmem [shape: f32[32,64], index: 5, kind: input, shape index: {}]   ;;  %s2358_s6 = inlined_call_operand.vmem [shape: f32[1,64], index: 6, kind: input, shape index: {}]   ;;  %s2359_s7 = inlined_call_operand.vmem [shape: f32[64,32], index: 7, kind: input, shape index: {}]   ;;  %s2360_s8 = inlined_call_operand.vmem [shape: f32[1,32], index: 8, kind: input, shape index: {}]   ;;  %s2361_s9 = inlined_call_operand.vmem [shape: f32[1,32], index: 9, kind: input, shape index: {}]   ;;  %s2362_s10 = inlined_call_operand.vmem [shape: f32[1,32], index: 10, kind: input, shape index: {}]   ;;  %s2363_s11 = inlined_call_operand.vmem [shape: f32[1,32], index: 11, kind: input, shape index: {}]   ;;  %s2364_s12 = inlined_call_operand.vmem [shape: f32[1,32], index: 12, kind: input, shape index: {}]   ;;  %s2365_s13 = inlined_call_operand.vmem [shape: f32[8,8], index: 13, kind: input, shape index: {}]   ;;  %s2366_s14 = inlined_call_operand.vmem [shape: f32[2,8,32], index: 14, kind: output, shape index: {}]  }
   0x1 LB: > { %s1808_s30 = sadd.s32 4294967295, %s2035_s29   ;;  %p1812_p0 = scmp.ge.s32.totalorder %s2035_s29, 1  ;;  %s2035_s29 = sphi %s2125_s29, %s24_s29  }
   0x2   : > { %p411_p1 = scmp.lt.s32.totalorder %s2035_s29, 3 }
   0x4   : > { %p412_p2 = pnand %p1812_p0, %p411_p1 }
   0x5   : > { %p455_p3 = scmp.lt.s32.totalorder (!%p412_p2), %s1808_s30, 1  ;;  %s2039_s15 = smov (!%p412_p2), 64  }
   0x6   : > { %415 = sbr.rel (%p412_p2) target bundleno = 3774 (0xebe), region = 76  ;;  %s2040_s16 = smov (!%p412_p2), 96  }
   0x7   : > { %s2041_s17 = smov (!%p412_p2), 88   ;;  %s2042_s20 = smov (!%p412_p2), 56  }
   0x8   : > { %s2043_s22 = smov (!%p412_p2), 120   ;;  %s2044_s25 = smov (!%p412_p2), 80  }
   0x9   : > { %s2049_s23 = smov (!%p412_p2), 40  }
   0xb   : > { %v467_v0 = vld [vmem:[%s2353_s1 + $0x18] sm:$0xff]  ;;  %v2037_v1 = vmov 0.0   ;;  %v466_v2 = vld [vmem:[%s2353_s1 + $0x10] sm:$0xff]  ;;  %vm2038_vm0 = vmmov 0   ;;  %s2368_s30 = smov (!%p455_p3, %s1808_s30), 1  ;;  %v465_v3 = vld [vmem:[%s2353_s1 + $0x8] sm:$0xff] }
   0xc   : > { %1887 = vmatprep.subr.mxu0 %v2037_v1  ;;  %1895 = vmatprep.mubr.msk.f32.mxu0 %vm2038_vm0, %v2037_v1  ;;  %s1813_s21 = sshll.u32 %s2368_s30, 3  ;;  %v464_v4 = vld [vmem:[%s2353_s1] sm:$0xff]  ;;  %vm475_vm1 = vcmask 261120   ;;  %vm559_vm2 = vcmask 64512   ;;  %v550_v48 = vld [vmem:[%s2355_s3 + $0x8] sm:$0xff]  ;;  %vm1650_vm3 = vcmask 523264  }
   0xd   : > { %1888 = vmatpush3.msra.mxu0 %v467_v0  ;;  %1903 = vmatprep.subr.mxu1 %v2037_v1  ;;  %s458_s26 = scalar_lea.vmem %s2352_s0, %s1813_s21  ;;  %v1815_v6 = vld [vmem:[%s2354_s2] ss:$0 sm:$0xff] }
   0xe   : > { %1889 = vmatprep.subr.mxu0 %v2037_v1  ;;  %1905 = vmatprep.mubr.msk.f32.mxu1 %vm2038_vm0, %v2037_v1  ;;  %v2161_v5 = vld [vmem:[%s458_s26] sm:$0xff]  ;;  %s2045_s26 = smov 112  }
   0xf   : > { %1890 = vmatpush3.msra.mxu0 %v466_v2  ;;  %v2190_v13 = vld [vmem:[%s2365_s13] sm:$0xff] }
  0x10   : > { %1891 = vmatprep.subr.mxu0 %v2037_v1  ;;  %v549_v23 = vld [vmem:[%s2355_s3] sm:$0xff] }
  0x11   : > { %1892 = vmatpush3.msra.mxu0 %v465_v3  ;;  %v1821_v61 = vld [vmem:[%s2356_s4] ss:$0 sm:$0xff] }
  0x12   : > { %1893 = vmatprep.subr.mxu0 %v2037_v1 }
  0x13   : > { %1894 = vmatpush3.msra.mxu0 %v464_v4 }
  0x14   : > { %1896 = vmatmul.mubr.msk.f32.vlgmr.msra.gmra.mxu0 %vm475_vm1, %v2161_v5  ;;  %1898 = vmatprep.subr.mxu0 %v2037_v1 }
  0x15   : > { %1900 = vmatprep.mubr.msk.f32.mxu0 %vm2038_vm0, %v2037_v1 }
  0xd4   : > { %v545_v7 = vpop.f32.mrf.mxu0 }
  0xd5   : > { %v2172_v8 = vadd.f32 %v1815_v6, %v545_v7 }
  0xd6   : > { %v1897_v9 = vpop.f32.mrf.mxu0 }
  0xd7   : > { %646 = vrot.lane.b32.xlu1 %v2172_v8, %s2039_s15  ;;  %557 = vrot.lane.b32.xlu0 %v2172_v8, %s2040_s16  ;;  %v2179_v12 = vmul.f32 0.35355338, %v2172_v8  ;;  %s2046_s15 = smov 48   ;;  %s2047_s16 = smov 72  }
  0xdb   : > { %804 = vrot.lane.b32.xlu1 %v2172_v8, %s2041_s17  ;;  %s2048_s17 = smov 104  }
 0x149   : > { %v647_v10 = vpop.permute.xlu1 %646  ;;  %v558_v11 = vpop.permute.xlu0 %557 }
 0x14a   : > { %1899 = vmatpush3.xpose.msk.msra.mxu0 %vm559_vm2, %v558_v11  ;;  %1904 = vmatpush3.msra.mxu1 %v647_v10  ;;  %v551_v10 = vld [vmem:[%s2355_s3 + $0x10] sm:$0xff] }
 0x14b   : > { %1913 = vmatprep.subr.mxu1 %v2037_v1  ;;  %1908 = vmatprep.subr.mxu0 %v2037_v1 }
 0x14d   : > { %1901 = vmatmul.mubr.msk.f32.vlgmr.msra.gmra.mxu0 %vm559_vm2, %v2179_v12  ;;  %v805_v24 = vpop.permute.xlu1 %804 }
 0x14e   : > { %1910 = vmatprep.mubr.msk.f32.mxu0 %vm2038_vm0, %v2037_v1  ;;  %1909 = vmatpush3.msra.mxu0 %v549_v23  ;;  %v552_v23 = vld [vmem:[%s2355_s3 + $0x18] sm:$0xff] }
 0x14f   : > { %1918 = vmatprep.subr.mxu0 %v2037_v1 }
 0x20d   : > { %v631_v14 = vpop.f32.mrf.mxu0 }
 0x20e   : > { %v632_v15 = vadd.f32 %v631_v14, %v2190_v13 }
 0x20f   : > { %v1902_v16 = vpop.f32.mrf.mxu0 }
 0x210   : > { %v635_v17 = vsel %vm559_vm2, %v632_v15, -inf }
 0x211   : > { %636 = vmax.xlane.f32.xlu0 %v635_v17 }
 0x227   : > { %891 = vrot.lane.b32.xlu0 %v2172_v8, %s2042_s20 }
 0x29a   : > { %v637_v18 = vpop.xlane.xlu0 %636 }
 0x29b   : > { %v638_v19 = vsub.f32 %v632_v15, %v637_v18 }
 0x29d   : > { %v639_v20 = vmul.f32 1.442695, %v638_v19 }
 0x29e   : > { %v892_v30 = vpop.permute.xlu0 %891 }
 0x29f   : > { %2009 = vpow2.f32 %v639_v20 }
 0x2ac   : > { %v2010_v21 = vpop.eup %2009 }
 0x2ad   : > { %v641_v22 = vsel %vm559_vm2, %v2010_v21, 0.0 }
 0x2ae   : > { %642 = vadd.xlane.f32.xlu1 %v641_v22 }
 0x2bf   : > { %802 = vrot.lane.b32.xlu1 %v2179_v12, %s2043_s22 }
 0x337   : > { %v643_v25 = vpop.xlane.xlu1 %642 }
 0x338   : > { %2011 = vrcp.f32 %v643_v25 }
 0x33b   : > { %v803_v28 = vpop.permute.xlu1 %802 }
 0x345   : > { %v2012_v26 = vpop.eup %2011 }
 0x346   : > { %v645_v27 = vmul.f32 %v2012_v26, %v2010_v21 }
 0x348   : > { %1906 = vmatmul.mubr.msk.f32.vlgmr.msra.gmra.mxu1 %vm559_vm2, %v645_v27 }
 0x349   : > { %1914 = vmatpush3.xpose.msk.msra.mxu1 %vm559_vm2, %v805_v24  ;;  %1915 = vmatprep.mubr.msk.f32.mxu1 %vm2038_vm0, %v2037_v1 }
 0x34a   : > { %1923 = vmatprep.subr.mxu1 %v2037_v1 }
 0x34c   : > { %1916 = vmatmul.mubr.msk.f32.vlgmr.msra.gmra.mxu1 %vm559_vm2, %v803_v28 }
 0x34d   : > { %1925 = vmatprep.mubr.msk.f32.mxu1 %vm2038_vm0, %v2037_v1  ;;  %1924 = vmatpush3.msra.mxu1 %v550_v48  ;;  %v1638_v48 = vld [vmem:[%s2359_s7 + $0x18] sm:$0xff] }
 0x34e   : > { %1933 = vmatprep.subr.mxu1 %v2037_v1 }
 0x408   : > { %v718_v29 = vpop.f32.mrf.mxu1 }
 0x409   : > { %1911 = vmatmul.mubr.msk.f32.vlgmr.msra.gmra.mxu0 %vm559_vm2, %v718_v29 }
 0x40a   : > { %1919 = vmatpush3.msra.mxu0 %v892_v30  ;;  %v1907_v31 = vpop.f32.mrf.mxu1  ;;  %1920 = vmatprep.mubr.msk.f32.mxu0 %vm2038_vm0, %v2037_v1 }
 0x40b   : > { %1928 = vmatprep.subr.mxu0 %v2037_v1 }
 0x40c   : > { %v876_v32 = vpop.f32.mrf.mxu1 }
 0x40d   : > { %v877_v33 = vadd.f32 %v876_v32, %v2190_v13 }
 0x40e   : > { %v1917_v34 = vpop.f32.mrf.mxu1 }
 0x40f   : > { %v880_v35 = vsel %vm559_vm2, %v877_v33, -inf }
 0x410   : > { %881 = vmax.xlane.f32.xlu1 %v880_v35 }
 0x499   : > { %v882_v36 = vpop.xlane.xlu1 %881 }
 0x49a   : > { %v883_v37 = vsub.f32 %v877_v33, %v882_v36 }
 0x49c   : > { %v884_v38 = vmul.f32 1.442695, %v883_v37 }
 0x49e   : > { %2013 = vpow2.f32 %v884_v38 }
 0x4ab   : > { %v2014_v39 = vpop.eup %2013 }
 0x4ac   : > { %v886_v40 = vsel %vm559_vm2, %v2014_v39, 0.0 }
 0x4ad   : > { %887 = vadd.xlane.f32.xlu0 %v886_v40 }
 0x4c3   : > { %1043 = vrot.lane.b32.xlu0 %v2172_v8, %s2044_s25  ;;  %s462_s25 = scalar_lea.vmem %s2366_s14, %s1813_s21 }
 0x4c7   : > { %1041 = vrot.lane.b32.xlu0 %v2179_v12, %s2045_s26 }
 0x4c9   : > { %v791_v41 = vpop.f32.mrf.mxu0 }
 0x4ca   : > { %v801_v62 = vadd.f32 %v1821_v61, %v791_v41  ;;  %v1553_v41 = vld [vmem:[%s2357_s5 + $0x18] sm:$0xff]  ;;  %v1836_v61 = vld [vmem:[%s2358_s6] ss:$0 sm:$0xff] }
 0x4cb   : > { %v1912_v42 = vpop.f32.mrf.mxu0 }
 0x4cc   : > { %v1552_v42 = vld [vmem:[%s2357_s5 + $0x10] sm:$0xff] }
 0x536   : > { %v888_v43 = vpop.xlane.xlu0 %887 }
 0x537   : > { %2015 = vrcp.f32 %v888_v43  ;;  %v1550_v43 = vld [vmem:[%s2357_s5] sm:$0xff] }
 0x53a   : > { %v1044_v45 = vpop.permute.xlu0 %1043 }
 0x53e   : > { %v1042_v47 = vpop.permute.xlu0 %1041 }
 0x544   : > { %v2016_v44 = vpop.eup %2015 }
 0x545   : > { %v890_v46 = vmul.f32 %v2016_v44, %v2014_v39  ;;  %v1642_v44 = vld [vmem:[%s2359_s7 + $0x38] sm:$0xff] }
 0x547   : > { %1921 = vmatmul.mubr.msk.f32.vlgmr.msra.gmra.mxu0 %vm559_vm2, %v890_v46  ;;  %v1640_v46 = vld [vmem:[%s2359_s7 + $0x28] sm:$0xff] }
 0x548   : > { %1929 = vmatpush3.xpose.msk.msra.mxu0 %vm559_vm2, %v1044_v45  ;;  %1930 = vmatprep.mubr.msk.f32.mxu0 %vm2038_vm0, %v2037_v1  ;;  %v1641_v45 = vld [vmem:[%s2359_s7 + $0x30] sm:$0xff] }
 0x549   : > { %1938 = vmatprep.subr.mxu0 %v2037_v1 }
 0x54b   : > { %1931 = vmatmul.mubr.msk.f32.vlgmr.msra.gmra.mxu0 %vm559_vm2, %v1042_v47  ;;  %v1639_v47 = vld [vmem:[%s2359_s7 + $0x20] sm:$0xff] }
 0x54c   : > { %1940 = vmatprep.mubr.msk.f32.mxu0 %vm2038_vm0, %v2037_v1  ;;  %1939 = vmatpush3.msra.mxu0 %v551_v10 }
 0x54d   : > { %1948 = vmatprep.subr.mxu0 %v2037_v1 }
 0x607   : > { %v963_v49 = vpop.f32.mrf.mxu0 }
 0x608   : > { %1926 = vmatmul.mubr.msk.f32.vlgmr.msra.gmra.mxu1 %vm559_vm2, %v963_v49 }
 0x609   : > { %v1922_v50 = vpop.f32.mrf.mxu0  ;;  %1935 = vmatprep.mubr.msk.f32.mxu1 %vm2038_vm0, %v2037_v1 }
 0x60b   : > { %v1115_v51 = vpop.f32.mrf.mxu0 }
 0x60c   : > { %v1116_v52 = vadd.f32 %v1115_v51, %v2190_v13 }
 0x60d   : > { %v1932_v53 = vpop.f32.mrf.mxu0 }
 0x60e   : > { %v1119_v54 = vsel %vm559_vm2, %v1116_v52, -inf  ;;  %v1834_v53 = vld [vmem:[%s2361_s9] ss:$0 sm:$0xff] }
 0x60f   : > { %1120 = vmax.xlane.f32.xlu1 %v1119_v54 }
 0x620   : > { %1130 = vrot.lane.b32.xlu1 %v2172_v8, %s2046_s15 }
 0x624   : > { %1282 = vrot.lane.b32.xlu1 %v2172_v8, %s2047_s16 }
 0x628   : > { %1280 = vrot.lane.b32.xlu1 %v2179_v12, %s2048_s17 }
 0x698   : > { %v1121_v55 = vpop.xlane.xlu1 %1120 }
 0x699   : > { %v1122_v56 = vsub.f32 %v1116_v52, %v1121_v55  ;;  %v1835_v55 = vld [vmem:[%s2362_s10] ss:$0 sm:$0xff] }
 0x69b   : > { %v1123_v57 = vmul.f32 1.442695, %v1122_v56 }
 0x69c   : > { %v1131_v58 = vpop.permute.xlu1 %1130 }
 0x69d   : > { %2017 = vpow2.f32 %v1123_v57  ;;  %1934 = vmatpush3.msra.mxu1 %v1131_v58  ;;  %v1637_v58 = vld [vmem:[%s2359_s7 + $0x10] sm:$0xff] }
 0x69e   : > { %1943 = vmatprep.subr.mxu1 %v2037_v1 }
 0x6a0   : > { %v1283_v6 = vpop.permute.xlu1 %1282 }
 0x6a4   : > { %v1281_v9 = vpop.permute.xlu1 %1280 }
 0x6aa   : > { %v2018_v59 = vpop.eup %2017 }
 0x6ab   : > { %v1125_v60 = vsel %vm559_vm2, %v2018_v59, 0.0 }
 0x6ac   : > { %1126 = vadd.xlane.f32.xlu0 %v1125_v60  ;;  %v1635_v60 = vld [vmem:[%s2359_s7] sm:$0xff] }
 0x6c8   : > { %v1036_v63 = vpop.f32.mrf.mxu1 }
 0x6c9   : > { %v1040_v0 = vadd.f32 %v1036_v63, %v801_v62 }
 0x6ca   : > { %v1927_v2 = vpop.f32.mrf.mxu1 }
 0x735   : > { %v1127_v3 = vpop.xlane.xlu0 %1126 }
 0x736   : > { %2019 = vrcp.f32 %v1127_v3  ;;  %v1838_v3 = vld [vmem:[%s2360_s8] ss:$0 sm:$0xff] }
 0x743   : > { %v2020_v4 = vpop.eup %2019 }
 0x744   : > { %v1129_v7 = vmul.f32 %v2020_v4, %v2018_v59  ;;  %v1636_v59 = vld [vmem:[%s2359_s7 + $0x8] sm:$0xff] }
 0x746   : > { %1936 = vmatmul.mubr.msk.f32.vlgmr.msra.gmra.mxu1 %vm559_vm2, %v1129_v7 }
 0x747   : > { %1944 = vmatpush3.xpose.msk.msra.mxu1 %vm559_vm2, %v1283_v6  ;;  %1945 = vmatprep.mubr.msk.f32.mxu1 %vm2038_vm0, %v2037_v1 }
 0x748   : > { %1953 = vmatprep.subr.mxu1 %v2037_v1 }
 0x74a   : > { %1946 = vmatmul.mubr.msk.f32.vlgmr.msra.gmra.mxu1 %vm559_vm2, %v1281_v9 }
 0x74b   : > { %1955 = vmatprep.mubr.msk.f32.mxu1 %vm2038_vm0, %v2037_v1  ;;  %1954 = vmatpush3.msra.mxu1 %v552_v23 }
 0x74c   : > { %1969 = vmatprep.subr.mxu1 %v2037_v1 }
 0x806   : > { %v1202_v11 = vpop.f32.mrf.mxu1 }
 0x807   : > { %1941 = vmatmul.mubr.msk.f32.vlgmr.msra.gmra.mxu0 %vm559_vm2, %v1202_v11 }
 0x808   : > { %v1937_v12 = vpop.f32.mrf.mxu1  ;;  %1950 = vmatprep.mubr.msk.f32.mxu0 %vm2038_vm0, %v2037_v1 }
 0x80a   : > { %v1354_v14 = vpop.f32.mrf.mxu1 }
 0x80b   : > { %v1355_v15 = vadd.f32 %v1354_v14, %v2190_v13 }
 0x80c   : > { %v1947_v16 = vpop.f32.mrf.mxu1 }
 0x80d   : > { %v1358_v17 = vsel %vm559_vm2, %v1355_v15, -inf }
 0x80e   : > { %1359 = vmax.xlane.f32.xlu1 %v1358_v17 }
 0x897   : > { %v1360_v18 = vpop.xlane.xlu1 %1359 }
 0x898   : > { %v1361_v19 = vsub.f32 %v1355_v15, %v1360_v18 }
 0x89a   : > { %v1362_v20 = vmul.f32 1.442695, %v1361_v19 }
 0x89c   : > { %2021 = vpow2.f32 %v1362_v20  ;;  %v1840_v20 = vld [vmem:[%s2363_s11] ss:$0 sm:$0xff] }
 0x8a9   : > { %v2022_v21 = vpop.eup %2021 }
 0x8aa   : > { %v1364_v22 = vsel %vm559_vm2, %v2022_v21, 0.0 }
 0x8ab   : > { %1365 = vadd.xlane.f32.xlu0 %v1364_v22  ;;  %v1841_v22 = vld [vmem:[%s2364_s12] ss:$0 sm:$0xff] }
 0x8c1   : > { %1369 = vrot.lane.b32.xlu0 %v2172_v8, %s2049_s23 }
 0x8c7   : > { %v1275_v13 = vpop.f32.mrf.mxu0 }
 0x8c8   : > { %v1279_v24 = vadd.f32 %v1275_v13, %v1040_v0 }
 0x8c9   : > { %v1942_v25 = vpop.f32.mrf.mxu0 }
 0x934   : > { %v1366_v26 = vpop.xlane.xlu0 %1365 }
 0x935   : > { %2023 = vrcp.f32 %v1366_v26 }
 0x938   : > { %v1370_v27 = vpop.permute.xlu0 %1369 }
 0x939   : > { %1949 = vmatpush3.msra.mxu0 %v1370_v27 }
 0x93a   : > { %1958 = vmatprep.subr.mxu0 %v2037_v1 }
 0x942   : > { %v2024_v28 = vpop.eup %2023 }
 0x943   : > { %v1368_v29 = vmul.f32 %v2024_v28, %v2022_v21 }
 0x945   : > { %1951 = vmatmul.mubr.msk.f32.vlgmr.msra.gmra.mxu0 %vm559_vm2, %v1368_v29 }
 0x946   : > { %1966 = vmatprep.mubr.msk.f32.mxu0 %vm2038_vm0, %v2037_v1  ;;  %1959 = vmatpush3.msra.mxu0 %v1553_v41 }
 0x947   : > { %1960 = vmatprep.subr.mxu0 %v2037_v1 }
 0x948   : > { %1961 = vmatpush3.msra.mxu0 %v1552_v42 }
 0x949   : > { %1962 = vmatprep.subr.mxu0 %v2037_v1 }
 0xa05   : > { %v1441_v8 = vpop.f32.mrf.mxu0 }
 0xa06   : > { %1956 = vmatmul.mubr.msk.f32.vlgmr.msra.gmra.mxu1 %vm559_vm2, %v1441_v8 }
 0xa07   : > { %v1952_v30 = vpop.f32.mrf.mxu0  ;;  %1985 = vmatprep.mubr.msk.f32.mxu1 %vm2038_vm0, %v2037_v1  ;;  %1970 = vmatpush3.msra.mxu1 %v1642_v44 }
 0xa08   : > { %1971 = vmatprep.subr.mxu1 %v2037_v1 }
 0xa09   : > { %1972 = vmatpush3.msra.mxu1 %v1641_v45 }
 0xa0a   : > { %1973 = vmatprep.subr.mxu1 %v2037_v1 }
 0xa0b   : > { %1974 = vmatpush3.msra.mxu1 %v1640_v46 }
 0xa0c   : > { %1975 = vmatprep.subr.mxu1 %v2037_v1 }
 0xa0d   : > { %1976 = vmatpush3.msra.mxu1 %v1639_v47 }
 0xa0e   : > { %1977 = vmatprep.subr.mxu1 %v2037_v1 }
 0xa0f   : > { %1978 = vmatpush3.msra.mxu1 %v1638_v48 }
 0xa10   : > { %1979 = vmatprep.subr.mxu1 %v2037_v1 }
 0xa11   : > { %1980 = vmatpush3.msra.mxu1 %v1637_v58 }
 0xa12   : > { %1981 = vmatprep.subr.mxu1 %v2037_v1 }
 0xa13   : > { %1982 = vmatpush3.msra.mxu1 %v1636_v59 }
 0xa14   : > { %1983 = vmatprep.subr.mxu1 %v2037_v1 }
 0xa15   : > { %1984 = vmatpush3.msra.mxu1 %v1635_v60 }
 0xac6   : > { %v1514_v31 = vpop.f32.mrf.mxu1 }
 0xac7   : > { %v1518_v32 = vadd.f32 %v1514_v31, %v1279_v24 }
 0xac8   : > { %v1957_v33 = vpop.f32.mrf.mxu1 }
 0xac9   : > { %v1519_v34 = vadd.f32 %v1518_v32, %v2161_v5  ;;  %v1551_v5 = vld [vmem:[%s2357_s5 + $0x8] sm:$0xff] }
 0xaca   : > { %1963 = vmatpush3.msra.mxu0 %v1551_v5 }
 0xacb   : > { %v1522_v35 = vsel %vm475_vm1, %v1519_v34, 0.0  ;;  %1964 = vmatprep.subr.mxu0 %v2037_v1 }
 0xacc   : > { %1523 = vadd.xlane.f32.xlu0 %v1522_v35  ;;  %1965 = vmatpush3.msra.mxu0 %v1550_v43 }
 0xb55   : > { %v1524_v36 = vpop.xlane.xlu0 %1523 }
 0xb56   : > { %v1526_v37 = vmul.f32 0.03125, %v1524_v36 }
 0xb58   : > { %v1527_v38 = vsub.f32 %v1519_v34, %v1526_v37 }
 0xb5a   : > { %v1528_v39 = vmul.f32 %v1527_v38, %v1527_v38 }
 0xb5c   : > { %v1529_v40 = vsel %vm475_vm1, %v1528_v39, 0.0 }
 0xb5d   : > { %1530 = vadd.xlane.f32.xlu1 %v1529_v40 }
 0xbe6   : > { %v1531_v49 = vpop.xlane.xlu1 %1530 }
 0xbe7   : > { %v1532_v50 = vmul.f32 0.03125, %v1531_v49 }
 0xbe9   : > { %v1533_v51 = vadd.f32 1e-05, %v1532_v50 }
 0xbeb   : > { %2025 = vrsqrt.f32 %v1533_v51 }
 0xbf8   : > { %v2026_v52 = vpop.eup %2025 }
 0xbf9   : > { %v1535_v54 = vmul.f32 %v2026_v52, %v1527_v38 }
 0xbfb   : > { %v1542_v56 = vmul.f32 %v1834_v53, %v1535_v54 }
 0xbfd   : > { %v1549_v57 = vadd.f32 %v1835_v55, %v1542_v56 }
 0xbff   : > { %1967 = vmatmul.mubr.msk.f32.vlgmr.msra.gmra.mxu0 %vm475_vm1, %v1549_v57 }
 0xcbf   : > { %v1630_v62 = vpop.f32.mrf.mxu0 }
 0xcc0   : > { %v1631_v63 = vadd.f32 %v1836_v61, %v1630_v62 }
 0xcc1   : > { %v1968_v0 = vpop.f32.mrf.mxu0 }
 0xcc2   : > { %v1634_v2 = vmax.f32 %v1631_v63, 0.0 }
 0xcc4   : > { %1986 = vmatmul.mubr.msk.f32.vlgmr.msra.gmra.mxu1 %vm1650_vm3, %v1634_v2 }
 0xd84   : > { %v1720_v4 = vpop.f32.mrf.mxu1 }
 0xd85   : > { %v1721_v6 = vadd.f32 %v1838_v3, %v1720_v4 }
 0xd86   : > { %v1987_v7 = vpop.f32.mrf.mxu1 }
 0xd87   : > { %v1724_v9 = vadd.f32 %v1721_v6, %v1549_v57 }
 0xd89   : > { %v1727_v1 = vsel %vm475_vm1, %v1724_v9, 0.0 }
 0xd8a   : > { %1728 = vadd.xlane.f32.xlu1 %v1727_v1 }
 0xe13   : > { %v1729_v10 = vpop.xlane.xlu1 %1728 }
 0xe14   : > { %v1730_v11 = vmul.f32 0.03125, %v1729_v10 }
 0xe16   : > { %v1731_v12 = vsub.f32 %v1724_v9, %v1730_v11 }
 0xe18   : > { %v1732_v14 = vmul.f32 %v1731_v12, %v1731_v12 }
 0xe1a   : > { %v1733_v15 = vsel %vm475_vm1, %v1732_v14, 0.0 }
 0xe1b   : > { %1734 = vadd.xlane.f32.xlu1 %v1733_v15 }
 0xea4   : > { %v1735_v16 = vpop.xlane.xlu1 %1734 }
 0xea5   : > { %v1736_v17 = vmul.f32 0.03125, %v1735_v16 }
 0xea7   : > { %v1737_v18 = vadd.f32 1e-05, %v1736_v17 }
 0xea9   : > { %2027 = vrsqrt.f32 %v1737_v18 }
 0xeb6   : > { %v2028_v19 = vpop.eup %2027 }
 0xeb7   : > { %v1739_v21 = vmul.f32 %v2028_v19, %v1731_v12 }
 0xeb9   : > { %v1746_v23 = vmul.f32 %v1840_v20, %v1739_v21 }
 0xebb   : > { %v1753_v13 = vadd.f32 %v1841_v22, %v1746_v23 }
 0xebd   : > { %1754 = vst.msk [vmem:[%s462_s25] sm:$0xff] %vm475_vm1, %v1753_v13 }
 0xebe PF: > { %s24_s29 = sadd.s32 1, %s2035_s29  }
 0xebf   : > { %p21_p4 = scmp.ge.s32.totalorder %s24_s29, 4  }
 0xec1   :  { %23 = sbr.rel (!%p21_p4) target bundleno = 1 (0x1), region = 106 }

// kernel: model_forward.13
= control target key start
LH: loop header
LB: loop body
LE: loop exit
PB: predicated region body
PF: predicated region fallthrough
CT: control target
= control target key end

     0   :  { %s472_s18 = smov 0   ;;  %s520_s0 = inlined_call_operand.vmem [shape: f32[2,8,32], index: 0, kind: input, shape index: {}]   ;;  %s521_s1 = inlined_call_operand.vmem [shape: f32[1,32], index: 1, kind: input, shape index: {}]   ;;  %s522_s2 = inlined_call_operand.vmem [shape: f32[1,32], index: 2, kind: input, shape index: {}]   ;;  %s523_s3 = inlined_call_operand.vmem [shape: f32[32,4], index: 3, kind: input, shape index: {}]   ;;  %s524_s4 = inlined_call_operand.vmem [shape: f32[1,4], index: 4, kind: input, shape index: {}]   ;;  %s525_s5 = inlined_call_operand.vmem [shape: f32[2,8,4], index: 5, kind: output, shape index: {}]  }
   0x1 LB: > { %s391_s19 = sadd.s32 4294967295, %s438_s18   ;;  %p395_p0 = scmp.ge.s32.totalorder %s438_s18, 1  ;;  %s438_s18 = sphi %s472_s18, %s15_s18  }
   0x2   : > { %p186_p1 = scmp.lt.s32.totalorder %s438_s18, 3 }
   0x4   : > { %p187_p2 = pnand %p395_p0, %p186_p1 }
   0x5   : > { %p212_p3 = scmp.lt.s32.totalorder (!%p187_p2), %s391_s19, 1 }
   0x6   : > { %190 = sbr.rel (%p187_p2) target bundleno = 519 (0x207), region = 40 }
   0xb   : > { %s527_s19 = smov (!%p212_p3, %s391_s19), 1  ;;  %vm223_vm0 = vcmask 261120   ;;  %v255_v7 = vld [vmem:[%s523_s3 + $0x18] sm:$0xff]  ;;  %v440_v8 = vmov 0.0   ;;  %v254_v9 = vld [vmem:[%s523_s3 + $0x10] sm:$0xff]  ;;  %vm441_vm1 = vmmov 0  }
   0xc   : > { %s396_s20 = sshll.u32 %s527_s19, 3  ;;  %409 = vmatprep.subr.mxu0 %v440_v8  ;;  %417 = vmatprep.mubr.msk.f32.mxu0 %vm441_vm1, %v440_v8  ;;  %v253_v10 = vld [vmem:[%s523_s3 + $0x8] sm:$0xff]  ;;  %v252_v11 = vld [vmem:[%s523_s3] sm:$0xff]  ;;  %vm336_vm2 = vcmask 31744  }
   0xd   : > { %s215_s23 = scalar_lea.vmem %s520_s0, %s396_s20  ;;  %410 = vmatpush3.msra.mxu0 %v255_v7  ;;  %v398_v16 = vld [vmem:[%s521_s1] ss:$0 sm:$0xff]  ;;  %s219_s15 = scalar_lea.vmem %s525_s5, %s396_s20 }
   0xe   : > { %v220_v0 = vld [vmem:[%s215_s23] sm:$0xff]  ;;  %411 = vmatprep.subr.mxu0 %v440_v8 }
   0xf   : > { %v224_v1 = vsel %vm223_vm0, %v220_v0, 0.0  ;;  %412 = vmatpush3.msra.mxu0 %v254_v9  ;;  %v399_v18 = vld [vmem:[%s522_s2] ss:$0 sm:$0xff] }
  0x10   : > { %225 = vadd.xlane.f32.xlu0 %v224_v1  ;;  %413 = vmatprep.subr.mxu0 %v440_v8  ;;  %v400_v21 = vld [vmem:[%s524_s4] ss:$0 sm:$0xff] }
  0x11   : > { %414 = vmatpush3.msra.mxu0 %v253_v10 }
  0x12   : > { %415 = vmatprep.subr.mxu0 %v440_v8 }
  0x13   : > { %416 = vmatpush3.msra.mxu0 %v252_v11 }
  0x99   : > { %v226_v2 = vpop.xlane.xlu0 %225 }
  0x9a   : > { %v228_v3 = vmul.f32 0.03125, %v226_v2 }
  0x9c   : > { %v229_v4 = vsub.f32 %v220_v0, %v228_v3 }
  0x9e   : > { %v230_v5 = vmul.f32 %v229_v4, %v229_v4 }
  0xa0   : > { %v231_v6 = vsel %vm223_vm0, %v230_v5, 0.0 }
  0xa1   : > { %232 = vadd.xlane.f32.xlu0 %v231_v6 }
 0x12a   : > { %v233_v12 = vpop.xlane.xlu0 %232 }
 0x12b   : > { %v234_v13 = vmul.f32 0.03125, %v233_v12 }
 0x12d   : > { %v235_v14 = vadd.f32 1e-05, %v234_v13 }
 0x12f   : > { %430 = vrsqrt.f32 %v235_v14 }
 0x13c   : > { %v431_v15 = vpop.eup %430 }
 0x13d   : > { %v237_v17 = vmul.f32 %v431_v15, %v229_v4 }
 0x13f   : > { %v244_v19 = vmul.f32 %v398_v16, %v237_v17 }
 0x141   : > { %v251_v20 = vadd.f32 %v399_v18, %v244_v19 }
 0x143   : > { %418 = vmatmul.mubr.msk.f32.vlgmr.msra.gmra.mxu0 %vm223_vm0, %v251_v20 }
 0x203   : > { %v332_v22 = vpop.f32.mrf.mxu0 }
 0x204   : > { %v333_v23 = vadd.f32 %v400_v21, %v332_v22 }
 0x205   : > { %v419_v24 = vpop.f32.mrf.mxu0 }
 0x206   : > { %337 = vst.msk [vmem:[%s219_s15] sm:$0xff] %vm336_vm2, %v333_v23 }
 0x207 PF: > { %s15_s18 = sadd.s32 1, %s438_s18  }
 0x208   : > { %p12_p4 = scmp.ge.s32.totalorder %s15_s18, 4  }
 0x20a   :  { %14 = sbr.rel (!%p12_p4) target bundleno = 1 (0x1), region = 70 }

// kernel: model_forward.12
= control target key start
LH: loop header
LB: loop body
LE: loop exit
PB: predicated region body
PF: predicated region fallthrough
CT: control target
= control target key end

     0   :  { %s4199_s0 = inlined_call_operand.vmem [shape: f32[2,8,32], index: 0, kind: input, shape index: {}]   ;;  %s4200_s1 = inlined_call_operand.vmem [shape: f32[2,8,32], index: 1, kind: input, shape index: {}]   ;;  %s4201_s2 = inlined_call_operand.vmem [shape: f32[32,96], index: 2, kind: input, shape index: {}]   ;;  %s4202_s3 = inlined_call_operand.vmem [shape: f32[1,96], index: 3, kind: input, shape index: {}]   ;;  %s4203_s4 = inlined_call_operand.vmem [shape: f32[32,32], index: 4, kind: input, shape index: {}]   ;;  %s4204_s5 = inlined_call_operand.vmem [shape: f32[1,32], index: 5, kind: input, shape index: {}]   ;;  %s4205_s6 = inlined_call_operand.vmem [shape: f32[32,32], index: 6, kind: input, shape index: {}]   ;;  %s4206_s7 = inlined_call_operand.vmem [shape: f32[1,32], index: 7, kind: input, shape index: {}]   ;;  %s4207_s8 = inlined_call_operand.vmem [shape: f32[32,64], index: 8, kind: input, shape index: {}]   ;;  %s4208_s9 = inlined_call_operand.vmem [shape: f32[1,64], index: 9, kind: input, shape index: {}]   ;;  %s4209_s10 = inlined_call_operand.vmem [shape: f32[32,32], index: 10, kind: input, shape index: {}]   ;;  %s4210_s11 = inlined_call_operand.vmem [shape: f32[1,32], index: 11, kind: input, shape index: {}]   ;;  %s4211_s12 = inlined_call_operand.vmem [shape: f32[32,64], index: 12, kind: input, shape index: {}]   ;;  %s4212_s13 = inlined_call_operand.vmem [shape: f32[1,64], index: 13, kind: input, shape index: {}]   ;;  %s4213_s14 = inlined_call_operand.vmem [shape: f32[64,32], index: 14, kind: input, shape index: {}]   ;;  %s4214_s15 = inlined_call_operand.vmem [shape: f32[1,32], index: 15, kind: input, shape index: {}]   ;;  %s4215_s16 = inlined_call_operand.vmem [shape: f32[1,32], index: 16, kind: input, shape index: {}]   ;;  %s4216_s17 = inlined_call_operand.vmem [shape: f32[1,32], index: 17, kind: input, shape index: {}]   ;;  %s4217_s18 = inlined_call_operand.vmem [shape: f32[1,32], index: 18, kind: input, shape index: {}]   ;;  %s4218_s19 = inlined_call_operand.vmem [shape: f32[1,32], index: 19, kind: input, shape index: {}]   ;;  %s4219_s20 = inlined_call_operand.vmem [shape: f32[1,32], index: 20, kind: input, shape index: {}]   ;;  %s4220_s21 = inlined_call_operand.vmem [shape: f32[1,32], index: 21, kind: input, shape index: {}]   ;;  %s4221_s22 = inlined_call_operand.vmem [shape: f32[8,8], index: 22, kind: input, shape index: {}, may-alias: {22,23}]   ;;  %s4222_s23 = inlined_call_operand.vmem [shape: f32[8,8], index: 23, kind: input, shape index: {}, may-alias: {22,23}]   ;;  %s4223_s24 = inlined_call_operand.vmem [shape: f32[2,8,32], index: 24, kind: output, shape index: {}]  }
   0x1   :  { %4240 = sst [smem:[#allocation2_spill]] %s4199_s0 }
   0x2   :  { %4241 = sst [smem:[#allocation3_spill]] %s4200_s1 }
   0x3   :  { %4242 = sst [smem:[#allocation4_spill]] %s4201_s2 }
   0x4   :  { %4243 = sst [smem:[#allocation5_spill]] %s4202_s3 }
   0x5   :  { %4244 = sst [smem:[#allocation6_spill]] %s4203_s4 }
   0x6   :  { %4245 = sst [smem:[#allocation7_spill]] %s4204_s5  ;;  %s3798_s5 = smov 0  }
   0x7   :  { %4246 = sst [smem:[#allocation8_spill]] %s4205_s6 }
   0x8   :  { %4247 = sst [smem:[#allocation9_spill]] %s4206_s7 }
   0x9   :  { %4248 = sst [smem:[#allocation10_spill]] %s4207_s8 }
   0xa   :  { %4249 = sst [smem:[#allocation11_spill]] %s4221_s22 }
   0xb LB: > { %s3273_s26 = sadd.s32 4294967295, %s3658_s5   ;;  %p3277_p0 = scmp.ge.s32.totalorder %s3658_s5, 1  ;;  %s3658_s5 = sphi %s3798_s5, %s34_s5  }
   0xc   : > { %p670_p1 = scmp.lt.s32.totalorder %s3658_s5, 3 }
   0xe   : > { %p671_p2 = pnand %p3277_p0, %p670_p1 }
   0xf   : > { %s4250_s6 = sld [smem:[#allocation4_spill]] (!%p671_p2)  ;;  %p738_p3 = scmp.lt.s32.totalorder (!%p671_p2), %s3273_s26, 1 }
  0x10   : > { %674 = sbr.rel (%p671_p2) target bundleno = 6719 (0x1a3f), region = 116  ;;  %s4251_s1 = sld [smem:[#allocation2_spill]] (!%p671_p2) }
  0x11   : > { %s4252_s2 = sld [smem:[#allocation5_spill]] (!%p671_p2)  ;;  %s3662_s29 = smov (!%p671_p2), 64  }
  0x12   : > { %s4235_s0 = smov (!%p671_p2), 96   ;;  %s4234_s7 = smov (!%p671_p2), 88  }
  0x13   : > { %s4253_s22 = sld [smem:[#allocation11_spill]] (!%p671_p2)  ;;  %s3665_s8 = smov (!%p671_p2), 56  }
  0x14   : > { %s4236_s4 = smov (!%p671_p2), 120   ;;  %s4231_s28 = smov (!%p671_p2), 80  }
  0x15   : > { %v755_v0 = vld [vmem:[%s4250_s6 + $0x18] sm:$0xff]  ;;  %v3660_v1 = vmov 0.0   ;;  %v754_v2 = vld [vmem:[%s4250_s6 + $0x10] sm:$0xff]  ;;  %vm3661_vm0 = vmmov 0   ;;  %s4268_s26 = smov (!%p738_p3, %s3273_s26), 1  ;;  %v753_v3 = vld [vmem:[%s4250_s6 + $0x8] sm:$0xff] }
  0x16   : > { %3410 = vmatprep.subr.mxu0 %v3660_v1  ;;  %3418 = vmatprep.mubr.msk.f32.mxu0 %vm3661_vm0, %v3660_v1  ;;  %s3822_s30 = sshll.u32 %s4268_s26, 3  ;;  %v752_v4 = vld [vmem:[%s4250_s6] sm:$0xff]  ;;  %vm763_vm1 = vcmask 261120   ;;  %vm847_vm2 = vcmask 64512   ;;  %s4254_s26 = sld [smem:[#allocation6_spill]]  ;;  %vm3103_vm3 = vcmask 523264  }
  0x17   : > { %3411 = vmatpush3.msra.mxu0 %v755_v0  ;;  %3426 = vmatprep.subr.mxu1 %v3660_v1  ;;  %s741_s27 = scalar_lea.vmem %s4251_s1, %s3822_s30  ;;  %v3281_v6 = vld [vmem:[%s4252_s2] ss:$0 sm:$0xff]  ;;  %s4232_s2 = smov 112  }
  0x18   : > { %3412 = vmatprep.subr.mxu0 %v3660_v1  ;;  %3428 = vmatprep.mubr.msk.f32.mxu1 %vm3661_vm0, %v3660_v1  ;;  %v3832_v5 = vld [vmem:[%s741_s27] sm:$0xff]  ;;  %s3669_s25 = smov 48   ;;  %s4229_s1 = smov 104  }
  0x19   : > { %3413 = vmatpush3.msra.mxu0 %v754_v2  ;;  %v3863_v13 = vld [vmem:[%s4253_s22] sm:$0xff]  ;;  %s4255_s3 = sld [smem:[#allocation7_spill]]  ;;  %s4263_s27 = smov 112  }
  0x1a   : > { %3414 = vmatprep.subr.mxu0 %v3660_v1  ;;  %s4258_s22 = sld [smem:[#allocation3_spill]] }
  0x1b   : > { %3415 = vmatpush3.msra.mxu0 %v753_v3 }
  0x1c   : > { %3416 = vmatprep.subr.mxu0 %v3660_v1  ;;  %v837_v23 = vld [vmem:[%s4254_s26] sm:$0xff]  ;;  %v838_v48 = vld [vmem:[%s4254_s26 + $0x8] sm:$0xff] }
  0x1d   : > { %3417 = vmatpush3.msra.mxu0 %v752_v4 }
  0x1e   : > { %3419 = vmatmul.mubr.msk.f32.vlgmr.msra.gmra.mxu0 %vm763_vm1, %v3832_v5  ;;  %3421 = vmatprep.subr.mxu0 %v3660_v1 }
  0x1f   : > { %3423 = vmatprep.mubr.msk.f32.mxu0 %vm3661_vm0, %v3660_v1  ;;  %v3287_v61 = vld [vmem:[%s4255_s3] ss:$0 sm:$0xff]  ;;  %s4256_s3 = sld [smem:[#allocation10_spill]] }
  0xde   : > { %v833_v7 = vpop.f32.mrf.mxu0 }
  0xdf   : > { %v3843_v8 = vadd.f32 %v3281_v6, %v833_v7 }
  0xe0   : > { %v3420_v9 = vpop.f32.mrf.mxu0 }
  0xe1   : > { %934 = vrot.lane.b32.xlu1 %v3843_v8, %s3662_s29  ;;  %845 = vrot.lane.b32.xlu0 %v3843_v8, %s4235_s0  ;;  %v3852_v12 = vmul.f32 0.35355338, %v3843_v8  ;;  %s3672_s29 = smov 40  }
  0xe5   : > { %1092 = vrot.lane.b32.xlu1 %v3843_v8, %s4234_s7  ;;  %s4266_s7 = smov 72  }
 0x153   : > { %v935_v10 = vpop.permute.xlu1 %934  ;;  %v846_v11 = vpop.permute.xlu0 %845 }
 0x154   : > { %3422 = vmatpush3.xpose.msk.msra.mxu0 %vm847_vm2, %v846_v11  ;;  %3427 = vmatpush3.msra.mxu1 %v935_v10  ;;  %v839_v10 = vld [vmem:[%s4254_s26 + $0x10] sm:$0xff] }
 0x155   : > { %3436 = vmatprep.subr.mxu1 %v3660_v1  ;;  %3431 = vmatprep.subr.mxu0 %v3660_v1 }
 0x157   : > { %3424 = vmatmul.mubr.msk.f32.vlgmr.msra.gmra.mxu0 %vm847_vm2, %v3852_v12  ;;  %v1093_v24 = vpop.permute.xlu1 %1092 }
 0x158   : > { %3433 = vmatprep.mubr.msk.f32.mxu0 %vm3661_vm0, %v3660_v1  ;;  %3432 = vmatpush3.msra.mxu0 %v837_v23  ;;  %v840_v23 = vld [vmem:[%s4254_s26 + $0x18] sm:$0xff]  ;;  %s4262_s26 = smov 88  }
 0x159   : > { %3441 = vmatprep.subr.mxu0 %v3660_v1 }
 0x217   : > { %v919_v14 = vpop.f32.mrf.mxu0 }
 0x218   : > { %v920_v15 = vadd.f32 %v919_v14, %v3863_v13 }
 0x219   : > { %v3425_v16 = vpop.f32.mrf.mxu0 }
 0x21a   : > { %v923_v17 = vsel %vm847_vm2, %v920_v15, -inf }
 0x21b   : > { %924 = vmax.xlane.f32.xlu0 %v923_v17 }
 0x231   : > { %1179 = vrot.lane.b32.xlu0 %v3843_v8, %s3665_s8  ;;  %s4228_s8 = smov 72  }
 0x2a4   : > { %v925_v18 = vpop.xlane.xlu0 %924 }
 0x2a5   : > { %v926_v19 = vsub.f32 %v920_v15, %v925_v18 }
 0x2a7   : > { %v927_v20 = vmul.f32 1.442695, %v926_v19 }
 0x2a8   : > { %v1180_v30 = vpop.permute.xlu0 %1179 }
 0x2a9   : > { %3614 = vpow2.f32 %v927_v20 }
 0x2b6   : > { %v3615_v21 = vpop.eup %3614 }
 0x2b7   : > { %v929_v22 = vsel %vm847_vm2, %v3615_v21, 0.0 }
 0x2b8   : > { %930 = vadd.xlane.f32.xlu1 %v929_v22 }
 0x2c9   : > { %1090 = vrot.lane.b32.xlu1 %v3852_v12, %s4236_s4 }
 0x341   : > { %v931_v25 = vpop.xlane.xlu1 %930 }
 0x342   : > { %3616 = vrcp.f32 %v931_v25 }
 0x345   : > { %v1091_v28 = vpop.permute.xlu1 %1090 }
 0x34f   : > { %v3617_v26 = vpop.eup %3616 }
 0x350   : > { %v933_v27 = vmul.f32 %v3617_v26, %v3615_v21 }
 0x352   : > { %3429 = vmatmul.mubr.msk.f32.vlgmr.msra.gmra.mxu1 %vm847_vm2, %v933_v27 }
 0x353   : > { %3437 = vmatpush3.xpose.msk.msra.mxu1 %vm847_vm2, %v1093_v24  ;;  %3438 = vmatprep.mubr.msk.f32.mxu1 %vm3661_vm0, %v3660_v1 }
 0x354   : > { %3446 = vmatprep.subr.mxu1 %v3660_v1 }
 0x356   : > { %3439 = vmatmul.mubr.msk.f32.vlgmr.msra.gmra.mxu1 %vm847_vm2, %v1091_v28 }
 0x357   : > { %3448 = vmatprep.mubr.msk.f32.mxu1 %vm3661_vm0, %v3660_v1  ;;  %3447 = vmatpush3.msra.mxu1 %v838_v48 }
 0x358   : > { %3456 = vmatprep.subr.mxu1 %v3660_v1 }
 0x412   : > { %v1006_v29 = vpop.f32.mrf.mxu1 }
 0x413   : > { %3434 = vmatmul.mubr.msk.f32.vlgmr.msra.gmra.mxu0 %vm847_vm2, %v1006_v29 }
 0x414   : > { %3442 = vmatpush3.msra.mxu0 %v1180_v30  ;;  %v3430_v31 = vpop.f32.mrf.mxu1  ;;  %3443 = vmatprep.mubr.msk.f32.mxu0 %vm3661_vm0, %v3660_v1 }
 0x415   : > { %3451 = vmatprep.subr.mxu0 %v3660_v1 }
 0x416   : > { %v1164_v32 = vpop.f32.mrf.mxu1 }
 0x417   : > { %v1165_v33 = vadd.f32 %v1164_v32, %v3863_v13 }
 0x418   : > { %v3440_v34 = vpop.f32.mrf.mxu1 }
 0x419   : > { %v1168_v35 = vsel %vm847_vm2, %v1165_v33, -inf }
 0x41a   : > { %1169 = vmax.xlane.f32.xlu1 %v1168_v35 }
 0x4a3   : > { %v1170_v36 = vpop.xlane.xlu1 %1169 }
 0x4a4   : > { %v1171_v37 = vsub.f32 %v1165_v33, %v1170_v36 }
 0x4a6   : > { %v1172_v38 = vmul.f32 1.442695, %v1171_v37 }
 0x4a8   : > { %3618 = vpow2.f32 %v1172_v38 }
 0x4b5   : > { %v3619_v39 = vpop.eup %3618 }
 0x4b6   : > { %v1174_v40 = vsel %vm847_vm2, %v3619_v39, 0.0 }
 0x4b7   : > { %1175 = vadd.xlane.f32.xlu0 %v1174_v40 }
 0x4cd   : > { %1331 = vrot.lane.b32.xlu0 %v3843_v8, %s4231_s28  ;;  %s745_s28 = scalar_lea.vmem %s4258_s22, %s3822_s30  ;;  %s4261_s22 = smov 96  }
 0x4d1   : > { %1329 = vrot.lane.b32.xlu0 %v3852_v12, %s4232_s2  ;;  %s4257_s2 = sld [smem:[#allocation8_spill]] }
 0x4d3   : > { %v1079_v41 = vpop.f32.mrf.mxu0 }
 0x4d4   : > { %v1089_v62 = vadd.f32 %v3287_v61, %v1079_v41  ;;  %v1925_v41 = vld [vmem:[%s4256_s3 + $0x18] sm:$0xff] }
 0x4d5   : > { %v3435_v42 = vpop.f32.mrf.mxu0 }
 0x4d7   : > { %v1841_v42 = vld [vmem:[%s4257_s2 + $0x18] sm:$0xff]  ;;  %v1838_v48 = vld [vmem:[%s4257_s2] sm:$0xff] }
 0x540   : > { %v1176_v43 = vpop.xlane.xlu0 %1175 }
 0x541   : > { %3620 = vrcp.f32 %v1176_v43  ;;  %v1923_v43 = vld [vmem:[%s4256_s3 + $0x8] sm:$0xff] }
 0x544   : > { %v1332_v45 = vpop.permute.xlu0 %1331 }
 0x548   : > { %v1330_v47 = vpop.permute.xlu0 %1329 }
 0x54e   : > { %v3621_v44 = vpop.eup %3620 }
 0x54f   : > { %v1178_v46 = vmul.f32 %v3621_v44, %v3619_v39  ;;  %v1840_v44 = vld [vmem:[%s4257_s2 + $0x10] sm:$0xff] }
 0x551   : > { %3444 = vmatmul.mubr.msk.f32.vlgmr.msra.gmra.mxu0 %vm847_vm2, %v1178_v46  ;;  %v1839_v46 = vld [vmem:[%s4257_s2 + $0x8] sm:$0xff] }
 0x552   : > { %3452 = vmatpush3.xpose.msk.msra.mxu0 %vm847_vm2, %v1332_v45  ;;  %3453 = vmatprep.mubr.msk.f32.mxu0 %vm3661_vm0, %v3660_v1  ;;  %v1922_v45 = vld [vmem:[%s4256_s3] sm:$0xff] }
 0x553   : > { %3461 = vmatprep.subr.mxu0 %v3660_v1 }
 0x555   : > { %3454 = vmatmul.mubr.msk.f32.vlgmr.msra.gmra.mxu0 %vm847_vm2, %v1330_v47  ;;  %v751_v47 = vld [vmem:[%s745_s28] sm:$0xff]  ;;  %s4265_s28 = smov 104  }
 0x556   : > { %3463 = vmatprep.mubr.msk.f32.mxu0 %vm3661_vm0, %v3660_v1  ;;  %3462 = vmatpush3.msra.mxu0 %v839_v10 }
 0x557   : > { %3471 = vmatprep.subr.mxu0 %v3660_v1 }
 0x611   : > { %v1251_v49 = vpop.f32.mrf.mxu0 }
 0x612   : > { %3449 = vmatmul.mubr.msk.f32.vlgmr.msra.gmra.mxu1 %vm847_vm2, %v1251_v49 }
 0x613   : > { %v3445_v50 = vpop.f32.mrf.mxu0  ;;  %3458 = vmatprep.mubr.msk.f32.mxu1 %vm3661_vm0, %v3660_v1 }
 0x615   : > { %v1403_v51 = vpop.f32.mrf.mxu0 }
 0x616   : > { %v1404_v52 = vadd.f32 %v1403_v51, %v3863_v13 }
 0x617   : > { %v3455_v53 = vpop.f32.mrf.mxu0 }
 0x618   : > { %v1407_v54 = vsel %vm847_vm2, %v1404_v52, -inf  ;;  %v3300_v53 = vld [vmem:[%s4215_s16] ss:$0 sm:$0xff] }
 0x619   : > { %1408 = vmax.xlane.f32.xlu1 %v1407_v54 }
 0x62a   : > { %1418 = vrot.lane.b32.xlu1 %v3843_v8, %s3669_s25  ;;  %s4264_s25 = smov 80  }
 0x62e   : > { %1570 = vrot.lane.b32.xlu1 %v3843_v8, %s4228_s8  ;;  %s4259_s8 = smov 120  }
 0x632   : > { %1568 = vrot.lane.b32.xlu1 %v3852_v12, %s4229_s1  ;;  %s4260_s1 = sld [smem:[#allocation9_spill]] }
 0x6a2   : > { %v1409_v55 = vpop.xlane.xlu1 %1408 }
 0x6a3   : > { %v1410_v56 = vsub.f32 %v1404_v52, %v1409_v55  ;;  %v3301_v55 = vld [vmem:[%s4216_s17] ss:$0 sm:$0xff] }
 0x6a5   : > { %v1411_v57 = vmul.f32 1.442695, %v1410_v56 }
 0x6a6   : > { %v1419_v58 = vpop.permute.xlu1 %1418 }
 0x6a7   : > { %3622 = vpow2.f32 %v1411_v57  ;;  %3457 = vmatpush3.msra.mxu1 %v1419_v58  ;;  %v3304_v58 = vld [vmem:[%s4208_s9] ss:$0 sm:$0xff] }
 0x6a8   : > { %3466 = vmatprep.subr.mxu1 %v3660_v1 }
 0x6aa   : > { %v1571_v6 = vpop.permute.xlu1 %1570 }
 0x6ae   : > { %v1569_v9 = vpop.permute.xlu1 %1568 }
 0x6b4   : > { %v3623_v59 = vpop.eup %3622 }
 0x6b5   : > { %v1413_v60 = vsel %vm847_vm2, %v3623_v59, 0.0 }
 0x6b6   : > { %1414 = vadd.xlane.f32.xlu0 %v1413_v60 }
 0x6d2   : > { %v1324_v63 = vpop.f32.mrf.mxu1 }
 0x6d3   : > { %v1328_v0 = vadd.f32 %v1324_v63, %v1089_v62  ;;  %v3302_v62 = vld [vmem:[%s4260_s1] ss:$0 sm:$0xff] }
 0x6d4   : > { %v3450_v2 = vpop.f32.mrf.mxu1 }
 0x73f   : > { %v1415_v3 = vpop.xlane.xlu0 %1414 }
 0x740   : > { %3624 = vrcp.f32 %v1415_v3 }
 0x74d   : > { %v3625_v4 = vpop.eup %3624 }
 0x74e   : > { %v1417_v7 = vmul.f32 %v3625_v4, %v3623_v59  ;;  %v4027_v4 = vld [vmem:[%s4222_s23] sm:$0xff] }
 0x750   : > { %3459 = vmatmul.mubr.msk.f32.vlgmr.msra.gmra.mxu1 %vm847_vm2, %v1417_v7 }
 0x751   : > { %3467 = vmatpush3.xpose.msk.msra.mxu1 %vm847_vm2, %v1571_v6  ;;  %3468 = vmatprep.mubr.msk.f32.mxu1 %vm3661_vm0, %v3660_v1 }
 0x752   : > { %3476 = vmatprep.subr.mxu1 %v3660_v1 }
 0x754   : > { %3469 = vmatmul.mubr.msk.f32.vlgmr.msra.gmra.mxu1 %vm847_vm2, %v1569_v9 }
 0x755   : > { %3478 = vmatprep.mubr.msk.f32.mxu1 %vm3661_vm0, %v3660_v1  ;;  %3477 = vmatpush3.msra.mxu1 %v840_v23  ;;  %v2006_v23 = vld [vmem:[%s4209_s10] sm:$0xff] }
 0x756   : > { %3492 = vmatprep.subr.mxu1 %v3660_v1 }
 0x810   : > { %v1490_v11 = vpop.f32.mrf.mxu1 }
 0x811   : > { %3464 = vmatmul.mubr.msk.f32.vlgmr.msra.gmra.mxu0 %vm847_vm2, %v1490_v11 }
 0x812   : > { %v3460_v12 = vpop.f32.mrf.mxu1  ;;  %3473 = vmatprep.mubr.msk.f32.mxu0 %vm3661_vm0, %v3660_v1 }
 0x814   : > { %v1642_v14 = vpop.f32.mrf.mxu1 }
 0x815   : > { %v1643_v15 = vadd.f32 %v1642_v14, %v3863_v13 }
 0x816   : > { %v3470_v16 = vpop.f32.mrf.mxu1 }
 0x817   : > { %v1646_v17 = vsel %vm847_vm2, %v1643_v15, -inf }
 0x818   : > { %1647 = vmax.xlane.f32.xlu1 %v1646_v17 }
 0x8a1   : > { %v1648_v18 = vpop.xlane.xlu1 %1647 }
 0x8a2   : > { %v1649_v19 = vsub.f32 %v1643_v15, %v1648_v18 }
 0x8a4   : > { %v1650_v20 = vmul.f32 1.442695, %v1649_v19 }
 0x8a6   : > { %3626 = vpow2.f32 %v1650_v20 }
 0x8b3   : > { %v3627_v21 = vpop.eup %3626 }
 0x8b4   : > { %v1652_v22 = vsel %vm847_vm2, %v3627_v21, 0.0 }
 0x8b5   : > { %1653 = vadd.xlane.f32.xlu0 %v1652_v22 }
 0x8cb   : > { %1657 = vrot.lane.b32.xlu0 %v3843_v8, %s3672_s29 }
 0x8d1   : > { %v1563_v13 = vpop.f32.mrf.mxu0 }
 0x8d2   : > { %v1567_v24 = vadd.f32 %v1563_v13, %v1328_v0 }
 0x8d3   : > { %v3465_v25 = vpop.f32.mrf.mxu0 }
 0x93e   : > { %v1654_v26 = vpop.xlane.xlu0 %1653 }
 0x93f   : > { %3628 = vrcp.f32 %v1654_v26 }
 0x942   : > { %v1658_v27 = vpop.permute.xlu0 %1657 }
 0x943   : > { %3472 = vmatpush3.msra.mxu0 %v1658_v27 }
 0x944   : > { %3481 = vmatprep.subr.mxu0 %v3660_v1 }
 0x94c   : > { %v3629_v28 = vpop.eup %3628 }
 0x94d   : > { %v1656_v29 = vmul.f32 %v3629_v28, %v3627_v21 }
 0x94f   : > { %3474 = vmatmul.mubr.msk.f32.vlgmr.msra.gmra.mxu0 %vm847_vm2, %v1656_v29 }
 0x950   : > { %3489 = vmatprep.mubr.msk.f32.mxu0 %vm3661_vm0, %v3660_v1  ;;  %3482 = vmatpush3.msra.mxu0 %v1841_v42 }
 0x951   : > { %3483 = vmatprep.subr.mxu0 %v3660_v1 }
 0x952   : > { %3484 = vmatpush3.msra.mxu0 %v1840_v44 }
 0x953   : > { %3485 = vmatprep.subr.mxu0 %v3660_v1 }
 0x954   : > { %3486 = vmatpush3.msra.mxu0 %v1839_v46 }
 0x955   : > { %3487 = vmatprep.subr.mxu0 %v3660_v1 }
 0x956   : > { %3488 = vmatpush3.msra.mxu0 %v1838_v48 }
 0x957   : > { %3503 = vmatprep.subr.mxu0 %v3660_v1 }
 0xa0f   : > { %v1729_v8 = vpop.f32.mrf.mxu0 }
 0xa10   : > { %3479 = vmatmul.mubr.msk.f32.vlgmr.msra.gmra.mxu1 %vm847_vm2, %v1729_v8 }
 0xa11   : > { %v3475_v30 = vpop.f32.mrf.mxu0  ;;  %3500 = vmatprep.mubr.msk.f32.mxu1 %vm3661_vm0, %v3660_v1  ;;  %3493 = vmatpush3.msra.mxu1 %v1925_v41  ;;  %v2007_v41 = vld [vmem:[%s4209_s10 + $0x8] sm:$0xff] }
 0xa12   : > { %3494 = vmatprep.subr.mxu1 %v3660_v1 }
 0xad0   : > { %v1802_v31 = vpop.f32.mrf.mxu1 }
 0xad1   : > { %v1806_v32 = vadd.f32 %v1802_v31, %v1567_v24 }
 0xad2   : > { %v3480_v33 = vpop.f32.mrf.mxu1 }
 0xad3   : > { %v1807_v34 = vadd.f32 %v1806_v32, %v3832_v5  ;;  %v1924_v5 = vld [vmem:[%s4256_s3 + $0x10] sm:$0xff] }
 0xad4   : > { %3495 = vmatpush3.msra.mxu1 %v1924_v5 }
 0xad5   : > { %v1810_v35 = vsel %vm763_vm1, %v1807_v34, 0.0  ;;  %3496 = vmatprep.subr.mxu1 %v3660_v1 }
 0xad6   : > { %1811 = vadd.xlane.f32.xlu0 %v1810_v35  ;;  %3497 = vmatpush3.msra.mxu1 %v1923_v43 }
 0xad7   : > { %3498 = vmatprep.subr.mxu1 %v3660_v1 }
 0xad8   : > { %3499 = vmatpush3.msra.mxu1 %v1922_v45 }
 0xad9   : > { %3501 = vmatmul.mubr.msk.f32.vlgmr.msra.gmra.mxu1 %vm763_vm1, %v751_v47  ;;  %3508 = vmatprep.subr.mxu1 %v3660_v1 }
 0xada   : > { %3510 = vmatprep.mubr.msk.f32.mxu1 %vm3661_vm0, %v3660_v1 }
 0xb5f   : > { %v1812_v36 = vpop.xlane.xlu0 %1811 }
 0xb60   : > { %v1814_v37 = vmul.f32 0.03125, %v1812_v36 }
 0xb62   : > { %v1815_v38 = vsub.f32 %v1807_v34, %v1814_v37 }
 0xb64   : > { %v1816_v39 = vmul.f32 %v1815_v38, %v1815_v38 }
 0xb66   : > { %v1817_v40 = vsel %vm763_vm1, %v1816_v39, 0.0 }
 0xb67   : > { %1818 = vadd.xlane.f32.xlu1 %v1817_v40 }
 0xb99   : > { %v2002_v59 = vpop.f32.mrf.mxu1 }
 0xb9a   : > { %v4008_v60 = vadd.f32 %v3304_v58, %v2002_v59 }
 0xb9b   : > { %v3502_v61 = vpop.f32.mrf.mxu1 }
 0xb9c   : > { %2258 = vrot.lane.b32.xlu0 %v4008_v60, %s4259_s8 }
 0xbf0   : > { %v1819_v49 = vpop.xlane.xlu1 %1818 }
 0xbf1   : > { %v1820_v50 = vmul.f32 0.03125, %v1819_v49 }
 0xbf3   : > { %v1821_v51 = vadd.f32 1e-05, %v1820_v50 }
 0xbf5   : > { %3630 = vrsqrt.f32 %v1821_v51 }
 0xc02   : > { %v3631_v52 = vpop.eup %3630 }
 0xc03   : > { %v1823_v54 = vmul.f32 %v3631_v52, %v1815_v38 }
 0xc05   : > { %v1830_v56 = vmul.f32 %v3300_v53, %v1823_v54  ;;  %v3310_v53 = vld [vmem:[%s4210_s11] ss:$0 sm:$0xff] }
 0xc07   : > { %v3999_v57 = vadd.f32 %v3301_v55, %v1830_v56 }
 0xc09   : > { %3490 = vmatmul.mubr.msk.f32.vlgmr.msra.gmra.mxu0 %vm763_vm1, %v3999_v57 }
 0xc0a   : > { %3505 = vmatprep.mubr.msk.f32.mxu0 %vm3661_vm0, %v3660_v1  ;;  %3504 = vmatpush3.xpose.msk.msra.mxu0 %vm847_vm2, %v4008_v60 }
 0xc0b   : > { %3513 = vmatprep.subr.mxu0 %v3660_v1 }
 0xc0e   : > { %v2259_v21 = vpop.permute.xlu0 %2258 }
 0xcc9   : > { %v1918_v63 = vpop.f32.mrf.mxu0 }
 0xcca   : > { %v1919_v0 = vadd.f32 %v3302_v62, %v1918_v63 }
 0xccb   : > { %v3491_v2 = vpop.f32.mrf.mxu0 }
 0xccc   : > { %v4018_v3 = vmul.f32 0.35355338, %v1919_v0  ;;  %v2008_v2 = vld [vmem:[%s4209_s10 + $0x10] sm:$0xff] }
 0xcce   : > { %3506 = vmatmul.mubr.msk.f32.vlgmr.msra.gmra.mxu0 %vm847_vm2, %v4018_v3 }
 0xccf   : > { %3515 = vmatprep.mubr.msk.f32.mxu0 %vm3661_vm0, %v3660_v1  ;;  %3514 = vmatpush3.msra.mxu0 %v2006_v23 }
 0xcd0   : > { %3523 = vmatprep.subr.mxu0 %v3660_v1 }
 0xd8e   : > { %v2085_v6 = vpop.f32.mrf.mxu0 }
 0xd8f   : > { %v2086_v7 = vadd.f32 %v2085_v6, %v4027_v4 }
 0xd90   : > { %v3507_v9 = vpop.f32.mrf.mxu0 }
 0xd91   : > { %v2089_v10 = vsel %vm847_vm2, %v2086_v7, -inf }
 0xd92   : > { %2090 = vmax.xlane.f32.xlu1 %v2089_v10 }
 0xda3   : > { %2100 = vrot.lane.b32.xlu1 %v4008_v60, %s4261_s22 }
 0xe1b   : > { %v2091_v11 = vpop.xlane.xlu1 %2090 }
 0xe1c   : > { %v2092_v12 = vsub.f32 %v2086_v7, %v2091_v11 }
 0xe1e   : > { %v2093_v14 = vmul.f32 1.442695, %v2092_v12 }
 0xe1f   : > { %v2101_v15 = vpop.permute.xlu1 %2100 }
 0xe20   : > { %3632 = vpow2.f32 %v2093_v14  ;;  %3509 = vmatpush3.msra.mxu1 %v2101_v15 }
 0xe21   : > { %3518 = vmatprep.subr.mxu1 %v3660_v1 }
 0xe2d   : > { %v3633_v16 = vpop.eup %3632 }
 0xe2e   : > { %v2095_v17 = vsel %vm847_vm2, %v3633_v16, 0.0 }
 0xe2f   : > { %2096 = vadd.xlane.f32.xlu1 %v2095_v17 }
 0xe40   : > { %2256 = vrot.lane.b32.xlu1 %v4018_v3, %s4259_s8  ;;  %s749_s8 = scalar_lea.vmem %s4223_s24, %s3822_s30 }
 0xeb8   : > { %v2097_v18 = vpop.xlane.xlu1 %2096 }
 0xeb9   : > { %3634 = vrcp.f32 %v2097_v18 }
 0xebc   : > { %v2257_v22 = vpop.permute.xlu1 %2256 }
 0xec6   : > { %v3635_v19 = vpop.eup %3634 }
 0xec7   : > { %v2099_v20 = vmul.f32 %v3635_v19, %v3633_v16 }
 0xec9   : > { %3511 = vmatmul.mubr.msk.f32.vlgmr.msra.gmra.mxu1 %vm847_vm2, %v2099_v20 }
 0xeca   : > { %3519 = vmatpush3.xpose.msk.msra.mxu1 %vm847_vm2, %v2259_v21  ;;  %3520 = vmatprep.mubr.msk.f32.mxu1 %vm3661_vm0, %v3660_v1 }
 0xecb   : > { %3528 = vmatprep.subr.mxu1 %v3660_v1 }
 0xecd   : > { %3521 = vmatmul.mubr.msk.f32.vlgmr.msra.gmra.mxu1 %vm847_vm2, %v2257_v22 }
 0xece   : > { %3530 = vmatprep.mubr.msk.f32.mxu1 %vm3661_vm0, %v3660_v1  ;;  %3529 = vmatpush3.msra.mxu1 %v2007_v41  ;;  %v3091_v41 = vld [vmem:[%s4213_s14 + $0x18] sm:$0xff] }
 0xecf   : > { %3538 = vmatprep.subr.mxu1 %v3660_v1 }
 0xf89   : > { %v2172_v13 = vpop.f32.mrf.mxu1 }
 0xf8a   : > { %3516 = vmatmul.mubr.msk.f32.vlgmr.msra.gmra.mxu0 %vm847_vm2, %v2172_v13 }
 0xf8b   : > { %v3512_v24 = vpop.f32.mrf.mxu1  ;;  %3525 = vmatprep.mubr.msk.f32.mxu0 %vm3661_vm0, %v3660_v1 }
 0xf8d   : > { %v2330_v25 = vpop.f32.mrf.mxu1 }
 0xf8e   : > { %v2331_v26 = vadd.f32 %v2330_v25, %v4027_v4 }
 0xf8f   : > { %v3522_v27 = vpop.f32.mrf.mxu1 }
 0xf90   : > { %v2334_v28 = vsel %vm847_vm2, %v2331_v26, -inf }
 0xf91   : > { %2335 = vmax.xlane.f32.xlu1 %v2334_v28 }
 0xfa2   : > { %2345 = vrot.lane.b32.xlu1 %v4008_v60, %s4262_s26 }
 0xfa6   : > { %2495 = vrot.lane.b32.xlu1 %v4018_v3, %s4263_s27 }
0x101a   : > { %v2336_v29 = vpop.xlane.xlu1 %2335 }
0x101b   : > { %v2337_v8 = vsub.f32 %v2331_v26, %v2336_v29 }
0x101d   : > { %v2338_v30 = vmul.f32 1.442695, %v2337_v8 }
0x101e   : > { %v2346_v31 = vpop.permute.xlu1 %2345 }
0x101f   : > { %3636 = vpow2.f32 %v2338_v30  ;;  %3524 = vmatpush3.msra.mxu0 %v2346_v31 }
0x1020   : > { %3533 = vmatprep.subr.mxu0 %v3660_v1 }
0x1022   : > { %v2496_v40 = vpop.permute.xlu1 %2495 }
0x102c   : > { %v3637_v32 = vpop.eup %3636 }
0x102d   : > { %v2340_v33 = vsel %vm847_vm2, %v3637_v32, 0.0 }
0x102e   : > { %2341 = vadd.xlane.f32.xlu0 %v2340_v33 }
0x1044   : > { %2497 = vrot.lane.b32.xlu0 %v4008_v60, %s4263_s27 }
0x104a   : > { %v2245_v34 = vpop.f32.mrf.mxu0 }
0x104b   : > { %v2255_v54 = vadd.f32 %v3310_v53, %v2245_v34  ;;  %v3006_v34 = vld [vmem:[%s4211_s12 + $0x18] sm:$0xff]  ;;  %v3325_v53 = vld [vmem:[%s4212_s13] ss:$0 sm:$0xff] }
0x104c   : > { %v3517_v35 = vpop.f32.mrf.mxu0 }
0x104d   : > { %v3005_v35 = vld [vmem:[%s4211_s12 + $0x10] sm:$0xff] }
0x10b7   : > { %v2342_v36 = vpop.xlane.xlu0 %2341 }
0x10b8   : > { %3638 = vrcp.f32 %v2342_v36  ;;  %v3003_v36 = vld [vmem:[%s4211_s12] sm:$0xff] }
0x10bb   : > { %v2498_v39 = vpop.permute.xlu0 %2497 }
0x10c5   : > { %v3639_v37 = vpop.eup %3638 }
0x10c6   : > { %v2344_v38 = vmul.f32 %v3639_v37, %v3637_v32  ;;  %v3095_v37 = vld [vmem:[%s4213_s14 + $0x38] sm:$0xff] }
0x10c8   : > { %3526 = vmatmul.mubr.msk.f32.vlgmr.msra.gmra.mxu0 %vm847_vm2, %v2344_v38  ;;  %v3094_v38 = vld [vmem:[%s4213_s14 + $0x30] sm:$0xff] }
0x10c9   : > { %3534 = vmatpush3.xpose.msk.msra.mxu0 %vm847_vm2, %v2498_v39  ;;  %3535 = vmatprep.mubr.msk.f32.mxu0 %vm3661_vm0, %v3660_v1  ;;  %v3093_v39 = vld [vmem:[%s4213_s14 + $0x28] sm:$0xff] }
0x10ca   : > { %3543 = vmatprep.subr.mxu0 %v3660_v1 }
0x10cc   : > { %3536 = vmatmul.mubr.msk.f32.vlgmr.msra.gmra.mxu0 %vm847_vm2, %v2496_v40  ;;  %v3092_v40 = vld [vmem:[%s4213_s14 + $0x20] sm:$0xff] }
0x10cd   : > { %3545 = vmatprep.mubr.msk.f32.mxu0 %vm3661_vm0, %v3660_v1  ;;  %3544 = vmatpush3.msra.mxu0 %v2008_v2 }
0x10ce   : > { %3553 = vmatprep.subr.mxu0 %v3660_v1 }
0x1188   : > { %v2417_v5 = vpop.f32.mrf.mxu0 }
0x1189   : > { %3531 = vmatmul.mubr.msk.f32.vlgmr.msra.gmra.mxu1 %vm847_vm2, %v2417_v5 }
0x118a   : > { %v3527_v42 = vpop.f32.mrf.mxu0  ;;  %3540 = vmatprep.mubr.msk.f32.mxu1 %vm3661_vm0, %v3660_v1 }
0x118c   : > { %v2569_v43 = vpop.f32.mrf.mxu0 }
0x118d   : > { %v2570_v44 = vadd.f32 %v2569_v43, %v4027_v4 }
0x118e   : > { %v3537_v45 = vpop.f32.mrf.mxu0 }
0x118f   : > { %v2573_v46 = vsel %vm847_vm2, %v2570_v44, -inf  ;;  %v3323_v45 = vld [vmem:[%s4217_s18] ss:$0 sm:$0xff] }
0x1190   : > { %2574 = vmax.xlane.f32.xlu1 %v2573_v46 }
0x11a1   : > { %2584 = vrot.lane.b32.xlu1 %v4008_v60, %s4264_s25 }
0x11a5   : > { %2734 = vrot.lane.b32.xlu1 %v4018_v3, %s4265_s28 }
0x1219   : > { %v2575_v47 = vpop.xlane.xlu1 %2574 }
0x121a   : > { %v2576_v48 = vsub.f32 %v2570_v44, %v2575_v47  ;;  %v3324_v47 = vld [vmem:[%s4218_s19] ss:$0 sm:$0xff] }
0x121c   : > { %v2577_v49 = vmul.f32 1.442695, %v2576_v48 }
0x121d   : > { %v2585_v50 = vpop.permute.xlu1 %2584 }
0x121e   : > { %3640 = vpow2.f32 %v2577_v49  ;;  %3539 = vmatpush3.msra.mxu1 %v2585_v50  ;;  %v3090_v50 = vld [vmem:[%s4213_s14 + $0x10] sm:$0xff] }
0x121f   : > { %3548 = vmatprep.subr.mxu1 %v3660_v1 }
0x1221   : > { %v2735_v0 = vpop.permute.xlu1 %2734 }
0x122b   : > { %v3641_v51 = vpop.eup %3640 }
0x122c   : > { %v2579_v52 = vsel %vm847_vm2, %v3641_v51, 0.0 }
0x122d   : > { %2580 = vadd.xlane.f32.xlu0 %v2579_v52  ;;  %v3088_v52 = vld [vmem:[%s4213_s14] sm:$0xff] }
0x1243   : > { %2736 = vrot.lane.b32.xlu0 %v4008_v60, %s4265_s28 }
0x1249   : > { %v2490_v55 = vpop.f32.mrf.mxu1 }
0x124a   : > { %v2494_v56 = vadd.f32 %v2490_v55, %v2255_v54 }
0x124b   : > { %v3532_v58 = vpop.f32.mrf.mxu1 }
0x12b6   : > { %v2581_v59 = vpop.xlane.xlu0 %2580 }
0x12b7   : > { %3642 = vrcp.f32 %v2581_v59  ;;  %v3327_v59 = vld [vmem:[%s4214_s15] ss:$0 sm:$0xff] }
0x12ba   : > { %v2737_v63 = vpop.permute.xlu0 %2736 }
0x12c4   : > { %v3643_v61 = vpop.eup %3642 }
0x12c5   : > { %v2583_v62 = vmul.f32 %v3643_v61, %v3641_v51  ;;  %v3089_v51 = vld [vmem:[%s4213_s14 + $0x8] sm:$0xff] }
0x12c7   : > { %3541 = vmatmul.mubr.msk.f32.vlgmr.msra.gmra.mxu1 %vm847_vm2, %v2583_v62 }
0x12c8   : > { %3549 = vmatpush3.xpose.msk.msra.mxu1 %vm847_vm2, %v2737_v63  ;;  %3550 = vmatprep.mubr.msk.f32.mxu1 %vm3661_vm0, %v3660_v1 }
0x12c9   : > { %3558 = vmatprep.subr.mxu1 %v3660_v1 }
0x12cb   : > { %3551 = vmatmul.mubr.msk.f32.vlgmr.msra.gmra.mxu1 %vm847_vm2, %v2735_v0 }
0x12cc   : > { %3560 = vmatprep.mubr.msk.f32.mxu1 %vm3661_vm0, %v3660_v1 }
0x1387   : > { %v2656_v3 = vpop.f32.mrf.mxu1 }
0x1388   : > { %3546 = vmatmul.mubr.msk.f32.vlgmr.msra.gmra.mxu0 %vm847_vm2, %v2656_v3 }
0x1389   : > { %v3542_v6 = vpop.f32.mrf.mxu1  ;;  %3555 = vmatprep.mubr.msk.f32.mxu0 %vm3661_vm0, %v3660_v1 }
0x138b   : > { %v2808_v7 = vpop.f32.mrf.mxu1 }
0x138c   : > { %v2809_v9 = vadd.f32 %v2808_v7, %v4027_v4  ;;  %v2009_v4 = vld [vmem:[%s4209_s10 + $0x18] sm:$0xff] }
0x138d   : > { %v3552_v10 = vpop.f32.mrf.mxu1  ;;  %3559 = vmatpush3.msra.mxu1 %v2009_v4 }
0x138e   : > { %v2812_v11 = vsel %vm847_vm2, %v2809_v9, -inf  ;;  %3574 = vmatprep.subr.mxu1 %v3660_v1 }
0x138f   : > { %2813 = vmax.xlane.f32.xlu1 %v2812_v11 }
0x13a0   : > { %2823 = vrot.lane.b32.xlu1 %v4008_v60, %s4266_s7 }
0x1418   : > { %v2814_v12 = vpop.xlane.xlu1 %2813 }
0x1419   : > { %v2815_v14 = vsub.f32 %v2809_v9, %v2814_v12 }
0x141b   : > { %v2816_v15 = vmul.f32 1.442695, %v2815_v14 }
0x141c   : > { %v2824_v16 = vpop.permute.xlu1 %2823 }
0x141d   : > { %3644 = vpow2.f32 %v2816_v15  ;;  %3554 = vmatpush3.msra.mxu0 %v2824_v16  ;;  %v3329_v15 = vld [vmem:[%s4219_s20] ss:$0 sm:$0xff] }
0x141e   : > { %3563 = vmatprep.subr.mxu0 %v3660_v1 }
0x142a   : > { %v3645_v17 = vpop.eup %3644 }
0x142b   : > { %v2818_v18 = vsel %vm847_vm2, %v3645_v17, 0.0 }
0x142c   : > { %2819 = vadd.xlane.f32.xlu0 %v2818_v18 }
0x1448   : > { %v2729_v19 = vpop.f32.mrf.mxu0 }
0x1449   : > { %v2733_v60 = vadd.f32 %v2729_v19, %v2494_v56 }
0x144a   : > { %v3547_v20 = vpop.f32.mrf.mxu0 }
0x14b5   : > { %v2820_v21 = vpop.xlane.xlu0 %2819 }
0x14b6   : > { %3646 = vrcp.f32 %v2820_v21 }
0x14c3   : > { %v3647_v22 = vpop.eup %3646 }
0x14c4   : > { %v2822_v23 = vmul.f32 %v3647_v22, %v3645_v17  ;;  %v3330_v17 = vld [vmem:[%s4220_s21] ss:$0 sm:$0xff] }
0x14c6   : > { %3556 = vmatmul.mubr.msk.f32.vlgmr.msra.gmra.mxu0 %vm847_vm2, %v2822_v23 }
0x14c7   : > { %3571 = vmatprep.mubr.msk.f32.mxu0 %vm3661_vm0, %v3660_v1  ;;  %3564 = vmatpush3.msra.mxu0 %v3006_v34 }
0x14c8   : > { %3565 = vmatprep.subr.mxu0 %v3660_v1 }
0x14c9   : > { %3566 = vmatpush3.msra.mxu0 %v3005_v35 }
0x14ca   : > { %3567 = vmatprep.subr.mxu0 %v3660_v1 }
0x1586   : > { %v2895_v13 = vpop.f32.mrf.mxu0 }
0x1587   : > { %3561 = vmatmul.mubr.msk.f32.vlgmr.msra.gmra.mxu1 %vm847_vm2, %v2895_v13 }
0x1588   : > { %v3557_v24 = vpop.f32.mrf.mxu0  ;;  %3590 = vmatprep.mubr.msk.f32.mxu1 %vm3661_vm0, %v3660_v1  ;;  %3575 = vmatpush3.msra.mxu1 %v3095_v37 }
0x1589   : > { %3576 = vmatprep.subr.mxu1 %v3660_v1 }
0x158a   : > { %3577 = vmatpush3.msra.mxu1 %v3094_v38 }
0x158b   : > { %3578 = vmatprep.subr.mxu1 %v3660_v1 }
0x158c   : > { %3579 = vmatpush3.msra.mxu1 %v3093_v39 }
0x158d   : > { %3580 = vmatprep.subr.mxu1 %v3660_v1 }
0x158e   : > { %3581 = vmatpush3.msra.mxu1 %v3092_v40 }
0x158f   : > { %3582 = vmatprep.subr.mxu1 %v3660_v1 }
0x1590   : > { %3583 = vmatpush3.msra.mxu1 %v3091_v41 }
0x1591   : > { %3584 = vmatprep.subr.mxu1 %v3660_v1 }
0x1592   : > { %3585 = vmatpush3.msra.mxu1 %v3090_v50 }
0x1593   : > { %3586 = vmatprep.subr.mxu1 %v3660_v1 }
0x1594   : > { %3587 = vmatpush3.msra.mxu1 %v3089_v51 }
0x1595   : > { %3588 = vmatprep.subr.mxu1 %v3660_v1 }
0x1596   : > { %3589 = vmatpush3.msra.mxu1 %v3088_v52 }
0x1647   : > { %v2968_v25 = vpop.f32.mrf.mxu1 }
0x1648   : > { %v2972_v26 = vadd.f32 %v2968_v25, %v2733_v60 }
0x1649   : > { %v3562_v27 = vpop.f32.mrf.mxu1 }
0x164a   : > { %v2973_v28 = vadd.f32 %v2972_v26, %v3999_v57  ;;  %v3004_v57 = vld [vmem:[%s4211_s12 + $0x8] sm:$0xff] }
0x164b   : > { %3568 = vmatpush3.msra.mxu0 %v3004_v57 }
0x164c   : > { %v2976_v29 = vsel %vm763_vm1, %v2973_v28, 0.0  ;;  %3569 = vmatprep.subr.mxu0 %v3660_v1 }
0x164d   : > { %2977 = vadd.xlane.f32.xlu0 %v2976_v29  ;;  %3570 = vmatpush3.msra.mxu0 %v3003_v36 }
0x16d6   : > { %v2978_v8 = vpop.xlane.xlu0 %2977 }
0x16d7   : > { %v2979_v30 = vmul.f32 0.03125, %v2978_v8 }
0x16d9   : > { %v2980_v31 = vsub.f32 %v2973_v28, %v2979_v30 }
0x16db   : > { %v2981_v32 = vmul.f32 %v2980_v31, %v2980_v31 }
0x16dd   : > { %v2982_v33 = vsel %vm763_vm1, %v2981_v32, 0.0 }
0x16de   : > { %2983 = vadd.xlane.f32.xlu0 %v2982_v33 }
0x1767   : > { %v2984_v5 = vpop.xlane.xlu0 %2983 }
0x1768   : > { %v2985_v42 = vmul.f32 0.03125, %v2984_v5 }
0x176a   : > { %v2986_v43 = vadd.f32 1e-05, %v2985_v42 }
0x176c   : > { %3648 = vrsqrt.f32 %v2986_v43 }
0x1779   : > { %v3649_v44 = vpop.eup %3648 }
0x177a   : > { %v2988_v46 = vmul.f32 %v3649_v44, %v2980_v31 }
0x177c   : > { %v2995_v48 = vmul.f32 %v3323_v45, %v2988_v46 }
0x177e   : > { %v3002_v49 = vadd.f32 %v3324_v47, %v2995_v48 }
0x1780   : > { %3572 = vmatmul.mubr.msk.f32.vlgmr.msra.gmra.mxu0 %vm763_vm1, %v3002_v49 }
0x1840   : > { %v3083_v54 = vpop.f32.mrf.mxu0 }
0x1841   : > { %v3084_v55 = vadd.f32 %v3325_v53, %v3083_v54 }
0x1842   : > { %v3573_v56 = vpop.f32.mrf.mxu0 }
0x1843   : > { %v3087_v58 = vmax.f32 %v3084_v55, 0.0 }
0x1845   : > { %3591 = vmatmul.mubr.msk.f32.vlgmr.msra.gmra.mxu1 %vm3103_vm3, %v3087_v58 }
0x1905   : > { %v3173_v61 = vpop.f32.mrf.mxu1 }
0x1906   : > { %v3174_v62 = vadd.f32 %v3327_v59, %v3173_v61 }
0x1907   : > { %v3592_v63 = vpop.f32.mrf.mxu1 }
0x1908   : > { %v3177_v0 = vadd.f32 %v3174_v62, %v3002_v49 }
0x190a   : > { %v3180_v1 = vsel %vm763_vm1, %v3177_v0, 0.0 }
0x190b   : > { %3181 = vadd.xlane.f32.xlu0 %v3180_v1 }
0x1994   : > { %v3182_v2 = vpop.xlane.xlu0 %3181 }
0x1995   : > { %v3183_v3 = vmul.f32 0.03125, %v3182_v2 }
0x1997   : > { %v3184_v6 = vsub.f32 %v3177_v0, %v3183_v3 }
0x1999   : > { %v3185_v7 = vmul.f32 %v3184_v6, %v3184_v6 }
0x199b   : > { %v3186_v9 = vsel %vm763_vm1, %v3185_v7, 0.0 }
0x199c   : > { %3187 = vadd.xlane.f32.xlu0 %v3186_v9 }
0x1a25   : > { %v3188_v10 = vpop.xlane.xlu0 %3187 }
0x1a26   : > { %v3189_v11 = vmul.f32 0.03125, %v3188_v10 }
0x1a28   : > { %v3190_v12 = vadd.f32 1e-05, %v3189_v11 }
0x1a2a   : > { %3650 = vrsqrt.f32 %v3190_v12 }
0x1a37   : > { %v3651_v14 = vpop.eup %3650 }
0x1a38   : > { %v3192_v16 = vmul.f32 %v3651_v14, %v3184_v6 }
0x1a3a   : > { %v3199_v18 = vmul.f32 %v3329_v15, %v3192_v16 }
0x1a3c   : > { %v3206_v4 = vadd.f32 %v3330_v17, %v3199_v18 }
0x1a3e   : > { %3207 = vst.msk [vmem:[%s749_s8] sm:$0xff] %vm763_vm1, %v3206_v4 }
0x1a3f PF: > { %s34_s5 = sadd.s32 1, %s3658_s5  }
0x1a40   : > { %p31_p4 = scmp.ge.s32.totalorder %s34_s5, 4  }
0x1a42   :  { %33 = sbr.rel (!%p31_p4) target bundleno = 11 (0xb), region = 149 }

</bundles_post_ra>
